<compile_context>
chip_gen: v6e
topology: v6e:2x2x1
jax: 0.10.0
libtpu: 0.0.40
codegen_flags: <defaults>
</compile_context>

<pallas_src>
import functools

import jax
import jax.numpy as jnp
from jax import lax
from jax.experimental import pallas as pl
from jax.experimental.pallas import tpu as pltpu

_LANE = 128      # channel padding target (lane width)
_SUB = 8         # sublane width (W padding target)
_MID_PAD = 8     # left W pad of the mid scratch -> sublane-aligned interior


def _basic_block_kernel(x_ref, w1_ref, w2_ref, s1_ref, b1_ref, s2_ref, b2_ref,
                        o_ref, mid_ref, *, w_real):
    # x_ref  : (Nb, H+2, We+2, Cp) bf16  zero-padded input (H by 1, W by
    #          1+(We-W), C to Cp)
    # w*_ref : (3, 3*Cp, Cp) bf16        conv weights, kw-major, kh stacked in K
    # s*,b*  : (1, Cp) f32               folded BN scale / bias
    # o_ref  : (Nb, H, We, Cp) f32
    # mid_ref: (Nb, H+2, We+_MID_PAD+1, Cp) f32 VMEM scratch, interior at
    #          [1:1+H, _MID_PAD:_MID_PAD+We]
    # w_real : real (unpadded) spatial width; columns >= w_real are stripped
    #          by the wrapper.
    Nb, H, We, Cp = o_ref.shape
    M = Nb * H * We
    P = _MID_PAD

    def conv3x3(get_slab, w_ref):
        # get_slab(kw): (Nb, H+2, We, Cp) bf16, W already shifted by kw.
        acc = None
        for kw in range(3):
            slab = get_slab(kw)
            # Stack the three kh-shifted views along channels: kh slices are
            # along a major axis (free), the reshape is tile-preserving
            # (We % 8 == 0, Cp % 128 == 0), and the lane-axis concat of
            # Cp-wide chunks is vreg placement, not a relayout.  One K=3*Cp
            # MXU dot per kw instead of three K=Cp dots.
            patch = jnp.concatenate(
                [slab[:, kh:kh + H].reshape(M, Cp) for kh in range(3)],
                axis=-1)
            d = jnp.dot(patch, w_ref[kw], preferred_element_type=jnp.float32)
            acc = d if acc is None else acc + d
        return acc

    # ---- conv1 (3x3, stride 1, pad 1) + bn1 + relu ----
    acc1 = conv3x3(lambda kw: x_ref[:, :, kw:kw + We, :], w1_ref)
    y1 = jnp.maximum(acc1 * s1_ref[0] + b1_ref[0], 0.0)

    # ---- stage the intermediate into the halo-padded VMEM scratch ----
    # Zero only the cells conv2 actually reads as halo (2 rows + 2 columns per
    # image).  Re-zeroed every step so the kernel stays correct when the
    # parallel grid axis is sharded across TensorCores.
    zrow = jnp.zeros((Nb, 1, w_real + 2, Cp), jnp.float32)
    zcol = jnp.zeros((Nb, H, 1, Cp), jnp.float32)
    mid_ref[:, 0:1, P - 1:P + w_real + 1, :] = zrow
    mid_ref[:, H + 1:H + 2, P - 1:P + w_real + 1, :] = zrow
    mid_ref[:, 1:1 + H, P - 1:P, :] = zcol
    # Interior starts at W offset 8 -> unmasked, sublane-aligned store.
    mid_ref[:, 1:1 + H, P:P + We, :] = y1.reshape(Nb, H, We, Cp)
    # Right halo of the REAL width, zeroed after the interior store so it also
    # masks conv1's output in the W-padding columns when We > w_real.
    mid_ref[:, 1:1 + H, P + w_real:P + w_real + 1, :] = zcol

    # ---- conv2 (3x3, stride 1, pad 1) + bn2 ----
    acc2 = conv3x3(
        lambda kw: mid_ref[:, :, P - 1 + kw:P - 1 + kw + We, :].astype(
            jnp.bfloat16),
        w2_ref)
    y2 = acc2 * s2_ref[0] + b2_ref[0]

    # ---- residual add + final relu ----
    # Fresh load of the identity from the VMEM-resident input block (nothing
    # from conv1 kept live across both convs); upcast bf16 -> f32 here.
    identity = x_ref[:, 1:1 + H, 1:1 + We, :].reshape(M, Cp).astype(jnp.float32)
    out = jnp.maximum(y2 + identity, 0.0)
    o_ref[...] = out.reshape(Nb, H, We, Cp).astype(o_ref.dtype)


def _pick_batch_block(n, h, w):
    """Fold batch into the matmul M dim (~2K rows/step), preferring >=2 grid
    steps (v7x megacore) as long as each step keeps >= 256 rows."""
    target_rows = 2048
    nb = max(1, min(n, target_rows // max(1, h * w)))
    while n % nb:
        nb -= 1
    if n // nb < 2 and n >= 2:
        nb2 = nb - 1
        while nb2 >= 1 and (n % nb2 or n // nb2 < 2):
            nb2 -= 1
        if nb2 >= 1 and nb2 * h * w >= 256:
            nb = nb2
    return nb


@jax.jit
def basic_block_forward(x_nchw, w1, w2, bn1_scale, bn1_bias, bn2_scale,
                        bn2_bias):
    """x_nchw: (N, C, H, W) float32.  w*: (3, 3, C, C) HWIO.  bn*: (C,)."""
    N, Cin, H, W = x_nchw.shape
    Cout = w1.shape[-1]
    assert Cin == Cout, "default BasicBlock: stride=1, downsample=None"
    C = Cin
    Cp = max(_LANE, ((C + _LANE - 1) // _LANE) * _LANE)   # lane-dense channels
    We = ((W + _SUB - 1) // _SUB) * _SUB                  # sublane-dense width
    nb = _pick_batch_block(N, H, We)
    grid = (N // nb,)

    # NCHW -> NHWC; cast activations to bf16 (halves input DMA; the MXU
    # operands are bf16 anyway) and do the halo pad (1), W pad (to We) and
    # channel pad (to Cp) in one op.
    # TODO(synk): a real pipeline would keep activations NHWC end-to-end and
    # skip this transpose/pad materialization entirely.
    x_nhwc = jnp.transpose(x_nchw, (0, 2, 3, 1))
    x_pad = jnp.pad(x_nhwc.astype(jnp.bfloat16),
                    ((0, 0), (1, 1), (1, 1 + We - W), (0, Cp - C)))

    def pack_w(wt):
        # (kh, kw, Cin, Cout) -> (kw, 3*Cp, Cp): kh stacked along K so each kw
        # becomes a single K=3*Cp MXU dot in the kernel.
        wp = jnp.pad(wt, ((0, 0), (0, 0), (0, Cp - C), (0, Cp - C)))
        wp = jnp.transpose(wp, (1, 0, 2, 3)).reshape(3, 3 * Cp, Cp)
        return wp.astype(jnp.bfloat16)

    def pad_v(v):
        return jnp.pad(v, (0, Cp - C)).reshape(1, Cp).astype(jnp.float32)

    w1_p, w2_p = pack_w(w1), pack_w(w2)
    s1, b1 = pad_v(bn1_scale), pad_v(bn1_bias)
    s2, b2 = pad_v(bn2_scale), pad_v(bn2_bias)

    cost = pl.CostEstimate(
        flops=36 * N * H * We * Cp * Cp,                    # 2 convs x 9 taps
        transcendentals=0,
        bytes_accessed=(x_pad.size * 2 + N * H * We * Cp * 4 +
                        2 * 3 * 3 * Cp * Cp * 2 + 4 * Cp * 4))

    # Explicit VMEM budget: double-buffered in/out blocks + weights + the mid
    # scratch + a generous allowance for the in-kernel patches/accumulators.
    in_blk = nb * (H + 2) * (We + 2) * Cp * 2
    out_blk = nb * H * We * Cp * 4
    w_blk = 2 * 3 * (3 * Cp) * Cp * 2 + 4 * Cp * 4
    scratch_blk = nb * (H + 2) * (We + _MID_PAD + 1) * Cp * 4
    work_blk = nb * H * We * Cp * 16
    vmem_limit = int(min(max(2 * (in_blk + out_blk + w_blk)
                             + scratch_blk + work_blk, 32 * 2**20),
                         96 * 2**20))

    out_nhwc = pl.pallas_call(
        functools.partial(_basic_block_kernel, w_real=W),
        out_shape=jax.ShapeDtypeStruct((N, H, We, Cp), x_nchw.dtype),
        grid_spec=pltpu.PrefetchScalarGridSpec(
            num_scalar_prefetch=0,
            grid=grid,
            in_specs=[
                pl.BlockSpec((nb, H + 2, We + 2, Cp), lambda n: (n, 0, 0, 0)),
                pl.BlockSpec((3, 3 * Cp, Cp), lambda n: (0, 0, 0)),
                pl.BlockSpec((3, 3 * Cp, Cp), lambda n: (0, 0, 0)),
                pl.BlockSpec((1, Cp), lambda n: (0, 0)),
                pl.BlockSpec((1, Cp), lambda n: (0, 0)),
                pl.BlockSpec((1, Cp), lambda n: (0, 0)),
                pl.BlockSpec((1, Cp), lambda n: (0, 0)),
            ],
            out_specs=pl.BlockSpec((nb, H, We, Cp), lambda n: (n, 0, 0, 0)),
            scratch_shapes=[
                pltpu.VMEM((nb, H + 2, We + _MID_PAD + 1, Cp), jnp.float32)
            ],
        ),
        compiler_params=pltpu.CompilerParams(
            dimension_semantics=("parallel",),
            vmem_limit_bytes=vmem_limit),
        cost_estimate=cost,
    )(x_pad, w1_p, w2_p, s1, b1, s2, b2)

    # Strip W / channel padding, NHWC -> NCHW to match the PyTorch convention.
    return jnp.transpose(out_nhwc[:, :, :W, :C], (0, 3, 1, 2))


def _reference_forward(x_nchw, w1, w2, s1, b1, s2, b2):
    """Pure-JAX f32 reference (lax.conv) for validation."""
    x = jnp.transpose(x_nchw, (0, 2, 3, 1))
    dn = ("NHWC", "HWIO", "NHWC")
    out = lax.conv_general_dilated(x, w1, (1, 1), "SAME", dimension_numbers=dn)
    out = jnp.maximum(out * s1 + b1, 0.0)
    out = lax.conv_general_dilated(out, w2, (1, 1), "SAME",
                                   dimension_numbers=dn)
    out = out * s2 + b2
    out = jnp.maximum(out + x, 0.0)
    return jnp.transpose(out, (0, 3, 1, 2))


if __name__ == "__main__":
    # Small shapes consistent with BasicBlock(inplanes=4, planes=4).
    N, C, H, W = 2, 4, 16, 16
    eps = 1e-5

    key = jax.random.PRNGKey(0)
    kx, kw1, kw2, kg1, kb1, kg2, kb2, km1, kv1, km2, kv2 = jax.random.split(
        key, 11)

    x = jax.random.normal(kx, (N, C, H, W), jnp.float32)

    # Conv weights in HWIO layout (PyTorch OIHW, transposed).
    w1 = jax.random.normal(kw1, (3, 3, C, C), jnp.float32) * 0.1
    w2 = jax.random.normal(kw2, (3, 3, C, C), jnp.float32) * 0.1

    # BatchNorm parameters + running stats (inference-mode fold).
    gamma1 = 1.0 + 0.1 * jax.random.normal(kg1, (C,), jnp.float32)
    beta1 = 0.1 * jax.random.normal(kb1, (C,), jnp.float32)
    mean1 = 0.1 * jax.random.normal(km1, (C,), jnp.float32)
    var1 = 1.0 + 0.1 * jax.random.uniform(kv1, (C,), jnp.float32)
    gamma2 = 1.0 + 0.1 * jax.random.normal(kg2, (C,), jnp.float32)
    beta2 = 0.1 * jax.random.normal(kb2, (C,), jnp.float32)
    mean2 = 0.1 * jax.random.normal(km2, (C,), jnp.float32)
    var2 = 1.0 + 0.1 * jax.random.uniform(kv2, (C,), jnp.float32)

    s1 = gamma1 / jnp.sqrt(var1 + eps)
    b1 = beta1 - mean1 * s1
    s2 = gamma2 / jnp.sqrt(var2 + eps)
    b2 = beta2 - mean2 * s2

    out = basic_block_forward(x, w1, w2, s1, b1, s2, b2)
    out = jax.block_until_ready(out)

    ref = _reference_forward(x, w1, w2, s1, b1, s2, b2)
    assert out.shape == (N, C, H, W)
    # bf16 activations + bf16 MXU operands (f32 accumulation) vs an f32
    # reference -> compare at relaxed tolerance.
    assert jnp.allclose(out, ref, rtol=4e-2, atol=4e-2), (
        float(jnp.max(jnp.abs(out - ref))))

    print("KERNEL_OK")
</pallas_src>

<mosaic_0001>
module attributes {stable_mosaic.version = 11 : i64} {
  func.func @_basic_block_kernel(%arg0: i32, %arg1: memref<1x18x18x128xbf16, #tpu.memory_space<vmem>>, %arg2: memref<3x384x128xbf16, #tpu.memory_space<vmem>>, %arg3: memref<3x384x128xbf16, #tpu.memory_space<vmem>>, %arg4: memref<1x128xf32, #tpu.memory_space<vmem>>, %arg5: memref<1x128xf32, #tpu.memory_space<vmem>>, %arg6: memref<1x128xf32, #tpu.memory_space<vmem>>, %arg7: memref<1x128xf32, #tpu.memory_space<vmem>>, %arg8: memref<1x16x16x128xf32, #tpu.memory_space<vmem>>, %arg9: memref<1x18x25x128xf32, #tpu.memory_space<vmem>>) attributes {dimension_semantics = [#tpu.dimension_semantics<parallel>], iteration_bounds = array<i64: 2>, scalar_prefetch = 0 : i64, scratch_operands = 1 : i64, tpu.core_type = #tpu.core_type<tc>, window_params = [{transform_indices = @transform_0, window_bounds = array<i64: 1, 18, 18, 128>}, {pipeline_mode = #tpu.pipeline_mode<synchronous>, transform_indices = @transform_1, window_bounds = array<i64: 3, 384, 128>}, {pipeline_mode = #tpu.pipeline_mode<synchronous>, transform_indices = @transform_2, window_bounds = array<i64: 3, 384, 128>}, {pipeline_mode = #tpu.pipeline_mode<synchronous>, transform_indices = @transform_3, window_bounds = array<i64: 1, 128>}, {pipeline_mode = #tpu.pipeline_mode<synchronous>, transform_indices = @transform_4, window_bounds = array<i64: 1, 128>}, {pipeline_mode = #tpu.pipeline_mode<synchronous>, transform_indices = @transform_5, window_bounds = array<i64: 1, 128>}, {pipeline_mode = #tpu.pipeline_mode<synchronous>, transform_indices = @transform_6, window_bounds = array<i64: 1, 128>}, {transform_indices = @transform_7, window_bounds = array<i64: 1, 16, 16, 128>}]} {
    %c0 = arith.constant 0 : index
    %c0_0 = arith.constant 0 : index
    %c0_1 = arith.constant 0 : index
    %c0_2 = arith.constant 0 : index
    %0 = vector.load %arg1[%c0, %c0_0, %c0_1, %c0_2] : memref<1x18x18x128xbf16, #tpu.memory_space<vmem>>, vector<1x18x16x128xbf16>
    %1 = vector.extract_strided_slice %0 {offsets = [0, 0, 0, 0], sizes = [1, 16, 16, 128], strides = [1, 1, 1, 1]} : vector<1x18x16x128xbf16> to vector<1x16x16x128xbf16>
    %2 = vector.shape_cast %1 : vector<1x16x16x128xbf16> to vector<256x128xbf16>
    %3 = vector.extract_strided_slice %0 {offsets = [0, 1, 0, 0], sizes = [1, 16, 16, 128], strides = [1, 1, 1, 1]} : vector<1x18x16x128xbf16> to vector<1x16x16x128xbf16>
    %4 = vector.shape_cast %3 : vector<1x16x16x128xbf16> to vector<256x128xbf16>
    %5 = vector.extract_strided_slice %0 {offsets = [0, 2, 0, 0], sizes = [1, 16, 16, 128], strides = [1, 1, 1, 1]} : vector<1x18x16x128xbf16> to vector<1x16x16x128xbf16>
    %6 = vector.shape_cast %5 : vector<1x16x16x128xbf16> to vector<256x128xbf16>
    %7 = tpu.concatenate %2, %4, %6 in 1 : vector<256x128xbf16>, vector<256x128xbf16>, vector<256x128xbf16> -> vector<256x384xbf16>
    %c0_3 = arith.constant 0 : index
    %c0_4 = arith.constant 0 : index
    %c0_5 = arith.constant 0 : index
    %8 = vector.load %arg2[%c0_3, %c0_4, %c0_5] : memref<3x384x128xbf16, #tpu.memory_space<vmem>>, vector<1x384x128xbf16>
    %9 = vector.shape_cast %8 : vector<1x384x128xbf16> to vector<384x128xbf16>
    %cst = arith.constant dense<0.000000e+00> : vector<256x128xf32>
    %10 = tpu.matmul %7, %9, %cst {dimension_numbers = #tpu.dot_dimension_numbers<[1], [0], [0], [1], [0, 0, 1, 1], [], []>} : vector<256x384xbf16>, vector<384x128xbf16>, vector<256x128xf32> -> vector<256x128xf32>
    %c0_6 = arith.constant 0 : index
    %c0_7 = arith.constant 0 : index
    %c1 = arith.constant 1 : index
    %c0_8 = arith.constant 0 : index
    %11 = vector.load %arg1[%c0_6, %c0_7, %c1, %c0_8] : memref<1x18x18x128xbf16, #tpu.memory_space<vmem>>, vector<1x18x16x128xbf16>
    %12 = vector.extract_strided_slice %11 {offsets = [0, 0, 0, 0], sizes = [1, 16, 16, 128], strides = [1, 1, 1, 1]} : vector<1x18x16x128xbf16> to vector<1x16x16x128xbf16>
    %13 = vector.shape_cast %12 : vector<1x16x16x128xbf16> to vector<256x128xbf16>
    %14 = vector.extract_strided_slice %11 {offsets = [0, 1, 0, 0], sizes = [1, 16, 16, 128], strides = [1, 1, 1, 1]} : vector<1x18x16x128xbf16> to vector<1x16x16x128xbf16>
    %15 = vector.shape_cast %14 : vector<1x16x16x128xbf16> to vector<256x128xbf16>
    %16 = vector.extract_strided_slice %11 {offsets = [0, 2, 0, 0], sizes = [1, 16, 16, 128], strides = [1, 1, 1, 1]} : vector<1x18x16x128xbf16> to vector<1x16x16x128xbf16>
    %17 = vector.shape_cast %16 : vector<1x16x16x128xbf16> to vector<256x128xbf16>
    %18 = tpu.concatenate %13, %15, %17 in 1 : vector<256x128xbf16>, vector<256x128xbf16>, vector<256x128xbf16> -> vector<256x384xbf16>
    %c1_9 = arith.constant 1 : index
    %c0_10 = arith.constant 0 : index
    %c0_11 = arith.constant 0 : index
    %19 = vector.load %arg2[%c1_9, %c0_10, %c0_11] : memref<3x384x128xbf16, #tpu.memory_space<vmem>>, vector<1x384x128xbf16>
    %20 = vector.shape_cast %19 : vector<1x384x128xbf16> to vector<384x128xbf16>
    %cst_12 = arith.constant dense<0.000000e+00> : vector<256x128xf32>
    %21 = tpu.matmul %18, %20, %cst_12 {dimension_numbers = #tpu.dot_dimension_numbers<[1], [0], [0], [1], [0, 0, 1, 1], [], []>} : vector<256x384xbf16>, vector<384x128xbf16>, vector<256x128xf32> -> vector<256x128xf32>
    %22 = arith.addf %10, %21 : vector<256x128xf32>
    %c0_13 = arith.constant 0 : index
    %c0_14 = arith.constant 0 : index
    %c2 = arith.constant 2 : index
    %c0_15 = arith.constant 0 : index
    %23 = vector.load %arg1[%c0_13, %c0_14, %c2, %c0_15] : memref<1x18x18x128xbf16, #tpu.memory_space<vmem>>, vector<1x18x16x128xbf16>
    %24 = vector.extract_strided_slice %23 {offsets = [0, 0, 0, 0], sizes = [1, 16, 16, 128], strides = [1, 1, 1, 1]} : vector<1x18x16x128xbf16> to vector<1x16x16x128xbf16>
    %25 = vector.shape_cast %24 : vector<1x16x16x128xbf16> to vector<256x128xbf16>
    %26 = vector.extract_strided_slice %23 {offsets = [0, 1, 0, 0], sizes = [1, 16, 16, 128], strides = [1, 1, 1, 1]} : vector<1x18x16x128xbf16> to vector<1x16x16x128xbf16>
    %27 = vector.shape_cast %26 : vector<1x16x16x128xbf16> to vector<256x128xbf16>
    %28 = vector.extract_strided_slice %23 {offsets = [0, 2, 0, 0], sizes = [1, 16, 16, 128], strides = [1, 1, 1, 1]} : vector<1x18x16x128xbf16> to vector<1x16x16x128xbf16>
    %29 = vector.shape_cast %28 : vector<1x16x16x128xbf16> to vector<256x128xbf16>
    %30 = tpu.concatenate %25, %27, %29 in 1 : vector<256x128xbf16>, vector<256x128xbf16>, vector<256x128xbf16> -> vector<256x384xbf16>
    %c2_16 = arith.constant 2 : index
    %c0_17 = arith.constant 0 : index
    %c0_18 = arith.constant 0 : index
    %31 = vector.load %arg2[%c2_16, %c0_17, %c0_18] : memref<3x384x128xbf16, #tpu.memory_space<vmem>>, vector<1x384x128xbf16>
    %32 = vector.shape_cast %31 : vector<1x384x128xbf16> to vector<384x128xbf16>
    %cst_19 = arith.constant dense<0.000000e+00> : vector<256x128xf32>
    %33 = tpu.matmul %30, %32, %cst_19 {dimension_numbers = #tpu.dot_dimension_numbers<[1], [0], [0], [1], [0, 0, 1, 1], [], []>} : vector<256x384xbf16>, vector<384x128xbf16>, vector<256x128xf32> -> vector<256x128xf32>
    %34 = arith.addf %22, %33 : vector<256x128xf32>
    %c0_20 = arith.constant 0 : index
    %c0_21 = arith.constant 0 : index
    %35 = vector.load %arg4[%c0_20, %c0_21] : memref<1x128xf32, #tpu.memory_space<vmem>>, vector<1x128xf32>
    %36 = vector.shape_cast %35 : vector<1x128xf32> to vector<128xf32>
    %37 = vector.shape_cast %36 : vector<128xf32> to vector<1x128xf32>
    %38 = vector.broadcast %37 : vector<1x128xf32> to vector<256x128xf32>
    %39 = arith.mulf %34, %38 : vector<256x128xf32>
    %c0_22 = arith.constant 0 : index
    %c0_23 = arith.constant 0 : index
    %40 = vector.load %arg5[%c0_22, %c0_23] : memref<1x128xf32, #tpu.memory_space<vmem>>, vector<1x128xf32>
    %41 = vector.shape_cast %40 : vector<1x128xf32> to vector<128xf32>
    %42 = vector.shape_cast %41 : vector<128xf32> to vector<1x128xf32>
    %43 = vector.broadcast %42 : vector<1x128xf32> to vector<256x128xf32>
    %44 = arith.addf %39, %43 : vector<256x128xf32>
    %cst_24 = arith.constant 0.000000e+00 : f32
    %45 = vector.broadcast %cst_24 : f32 to vector<256x128xf32>
    %46 = arith.maximumf %44, %45 : vector<256x128xf32>
    %cst_25 = arith.constant 0.000000e+00 : f32
    %47 = vector.broadcast %cst_25 : f32 to vector<1x1x18x128xf32>
    %cst_26 = arith.constant 0.000000e+00 : f32
    %48 = vector.broadcast %cst_26 : f32 to vector<1x16x1x128xf32>
    %c0_27 = arith.constant 0 : index
    %c0_28 = arith.constant 0 : index
    %c7 = arith.constant 7 : index
    %c0_29 = arith.constant 0 : index
    %49 = vector.load %arg9[%c0_27, %c0_28, %c7, %c0_29] : memref<1x18x25x128xf32, #tpu.memory_space<vmem>>, vector<1x1x18x128xf32>
    tpu.vector_store %arg9[%c0_27, %c0_28, %c7, %c0_29], %47 {strides = array<i32>} : memref<1x18x25x128xf32, #tpu.memory_space<vmem>>, vector<1x1x18x128xf32>,
    %c0_30 = arith.constant 0 : index
    %c17 = arith.constant 17 : index
    %c7_31 = arith.constant 7 : index
    %c0_32 = arith.constant 0 : index
    %50 = vector.load %arg9[%c0_30, %c17, %c7_31, %c0_32] : memref<1x18x25x128xf32, #tpu.memory_space<vmem>>, vector<1x1x18x128xf32>
    tpu.vector_store %arg9[%c0_30, %c17, %c7_31, %c0_32], %47 {strides = array<i32>} : memref<1x18x25x128xf32, #tpu.memory_space<vmem>>, vector<1x1x18x128xf32>,
    %c0_33 = arith.constant 0 : index
    %c1_34 = arith.constant 1 : index
    %c7_35 = arith.constant 7 : index
    %c0_36 = arith.constant 0 : index
    %51 = vector.load %arg9[%c0_33, %c1_34, %c7_35, %c0_36] : memref<1x18x25x128xf32, #tpu.memory_space<vmem>>, vector<1x16x1x128xf32>
    tpu.vector_store %arg9[%c0_33, %c1_34, %c7_35, %c0_36], %48 {strides = array<i32>} : memref<1x18x25x128xf32, #tpu.memory_space<vmem>>, vector<1x16x1x128xf32>,
    %52 = vector.shape_cast %46 : vector<256x128xf32> to vector<1x16x16x128xf32>
    %c0_37 = arith.constant 0 : index
    %c1_38 = arith.constant 1 : index
    %c8 = arith.constant 8 : index
    %c0_39 = arith.constant 0 : index
    %53 = vector.load %arg9[%c0_37, %c1_38, %c8, %c0_39] : memref<1x18x25x128xf32, #tpu.memory_space<vmem>>, vector<1x16x16x128xf32>
    tpu.vector_store %arg9[%c0_37, %c1_38, %c8, %c0_39], %52 {strides = array<i32>} : memref<1x18x25x128xf32, #tpu.memory_space<vmem>>, vector<1x16x16x128xf32>,
    %c0_40 = arith.constant 0 : index
    %c1_41 = arith.constant 1 : index
    %c24 = arith.constant 24 : index
    %c0_42 = arith.constant 0 : index
    %54 = vector.load %arg9[%c0_40, %c1_41, %c24, %c0_42] : memref<1x18x25x128xf32, #tpu.memory_space<vmem>>, vector<1x16x1x128xf32>
    tpu.vector_store %arg9[%c0_40, %c1_41, %c24, %c0_42], %48 {strides = array<i32>} : memref<1x18x25x128xf32, #tpu.memory_space<vmem>>, vector<1x16x1x128xf32>,
    %c0_43 = arith.constant 0 : index
    %c0_44 = arith.constant 0 : index
    %c7_45 = arith.constant 7 : index
    %c0_46 = arith.constant 0 : index
    %55 = vector.load %arg9[%c0_43, %c0_44, %c7_45, %c0_46] : memref<1x18x25x128xf32, #tpu.memory_space<vmem>>, vector<1x18x16x128xf32>
    %56 = arith.truncf %55 : vector<1x18x16x128xf32> to vector<1x18x16x128xbf16>
    %57 = vector.extract_strided_slice %56 {offsets = [0, 0, 0, 0], sizes = [1, 16, 16, 128], strides = [1, 1, 1, 1]} : vector<1x18x16x128xbf16> to vector<1x16x16x128xbf16>
    %58 = vector.shape_cast %57 : vector<1x16x16x128xbf16> to vector<256x128xbf16>
    %59 = vector.extract_strided_slice %56 {offsets = [0, 1, 0, 0], sizes = [1, 16, 16, 128], strides = [1, 1, 1, 1]} : vector<1x18x16x128xbf16> to vector<1x16x16x128xbf16>
    %60 = vector.shape_cast %59 : vector<1x16x16x128xbf16> to vector<256x128xbf16>
    %61 = vector.extract_strided_slice %56 {offsets = [0, 2, 0, 0], sizes = [1, 16, 16, 128], strides = [1, 1, 1, 1]} : vector<1x18x16x128xbf16> to vector<1x16x16x128xbf16>
    %62 = vector.shape_cast %61 : vector<1x16x16x128xbf16> to vector<256x128xbf16>
    %63 = tpu.concatenate %58, %60, %62 in 1 : vector<256x128xbf16>, vector<256x128xbf16>, vector<256x128xbf16> -> vector<256x384xbf16>
    %c0_47 = arith.constant 0 : index
    %c0_48 = arith.constant 0 : index
    %c0_49 = arith.constant 0 : index
    %64 = vector.load %arg3[%c0_47, %c0_48, %c0_49] : memref<3x384x128xbf16, #tpu.memory_space<vmem>>, vector<1x384x128xbf16>
    %65 = vector.shape_cast %64 : vector<1x384x128xbf16> to vector<384x128xbf16>
    %cst_50 = arith.constant dense<0.000000e+00> : vector<256x128xf32>
    %66 = tpu.matmul %63, %65, %cst_50 {dimension_numbers = #tpu.dot_dimension_numbers<[1], [0], [0], [1], [0, 0, 1, 1], [], []>} : vector<256x384xbf16>, vector<384x128xbf16>, vector<256x128xf32> -> vector<256x128xf32>
    %c0_51 = arith.constant 0 : index
    %c0_52 = arith.constant 0 : index
    %c8_53 = arith.constant 8 : index
    %c0_54 = arith.constant 0 : index
    %67 = vector.load %arg9[%c0_51, %c0_52, %c8_53, %c0_54] : memref<1x18x25x128xf32, #tpu.memory_space<vmem>>, vector<1x18x16x128xf32>
    %68 = arith.truncf %67 : vector<1x18x16x128xf32> to vector<1x18x16x128xbf16>
    %69 = vector.extract_strided_slice %68 {offsets = [0, 0, 0, 0], sizes = [1, 16, 16, 128], strides = [1, 1, 1, 1]} : vector<1x18x16x128xbf16> to vector<1x16x16x128xbf16>
    %70 = vector.shape_cast %69 : vector<1x16x16x128xbf16> to vector<256x128xbf16>
    %71 = vector.extract_strided_slice %68 {offsets = [0, 1, 0, 0], sizes = [1, 16, 16, 128], strides = [1, 1, 1, 1]} : vector<1x18x16x128xbf16> to vector<1x16x16x128xbf16>
    %72 = vector.shape_cast %71 : vector<1x16x16x128xbf16> to vector<256x128xbf16>
    %73 = vector.extract_strided_slice %68 {offsets = [0, 2, 0, 0], sizes = [1, 16, 16, 128], strides = [1, 1, 1, 1]} : vector<1x18x16x128xbf16> to vector<1x16x16x128xbf16>
    %74 = vector.shape_cast %73 : vector<1x16x16x128xbf16> to vector<256x128xbf16>
    %75 = tpu.concatenate %70, %72, %74 in 1 : vector<256x128xbf16>, vector<256x128xbf16>, vector<256x128xbf16> -> vector<256x384xbf16>
    %c1_55 = arith.constant 1 : index
    %c0_56 = arith.constant 0 : index
    %c0_57 = arith.constant 0 : index
    %76 = vector.load %arg3[%c1_55, %c0_56, %c0_57] : memref<3x384x128xbf16, #tpu.memory_space<vmem>>, vector<1x384x128xbf16>
    %77 = vector.shape_cast %76 : vector<1x384x128xbf16> to vector<384x128xbf16>
    %cst_58 = arith.constant dense<0.000000e+00> : vector<256x128xf32>
    %78 = tpu.matmul %75, %77, %cst_58 {dimension_numbers = #tpu.dot_dimension_numbers<[1], [0], [0], [1], [0, 0, 1, 1], [], []>} : vector<256x384xbf16>, vector<384x128xbf16>, vector<256x128xf32> -> vector<256x128xf32>
    %79 = arith.addf %66, %78 : vector<256x128xf32>
    %c0_59 = arith.constant 0 : index
    %c0_60 = arith.constant 0 : index
    %c9 = arith.constant 9 : index
    %c0_61 = arith.constant 0 : index
    %80 = vector.load %arg9[%c0_59, %c0_60, %c9, %c0_61] : memref<1x18x25x128xf32, #tpu.memory_space<vmem>>, vector<1x18x16x128xf32>
    %81 = arith.truncf %80 : vector<1x18x16x128xf32> to vector<1x18x16x128xbf16>
    %82 = vector.extract_strided_slice %81 {offsets = [0, 0, 0, 0], sizes = [1, 16, 16, 128], strides = [1, 1, 1, 1]} : vector<1x18x16x128xbf16> to vector<1x16x16x128xbf16>
    %83 = vector.shape_cast %82 : vector<1x16x16x128xbf16> to vector<256x128xbf16>
    %84 = vector.extract_strided_slice %81 {offsets = [0, 1, 0, 0], sizes = [1, 16, 16, 128], strides = [1, 1, 1, 1]} : vector<1x18x16x128xbf16> to vector<1x16x16x128xbf16>
    %85 = vector.shape_cast %84 : vector<1x16x16x128xbf16> to vector<256x128xbf16>
    %86 = vector.extract_strided_slice %81 {offsets = [0, 2, 0, 0], sizes = [1, 16, 16, 128], strides = [1, 1, 1, 1]} : vector<1x18x16x128xbf16> to vector<1x16x16x128xbf16>
    %87 = vector.shape_cast %86 : vector<1x16x16x128xbf16> to vector<256x128xbf16>
    %88 = tpu.concatenate %83, %85, %87 in 1 : vector<256x128xbf16>, vector<256x128xbf16>, vector<256x128xbf16> -> vector<256x384xbf16>
    %c2_62 = arith.constant 2 : index
    %c0_63 = arith.constant 0 : index
    %c0_64 = arith.constant 0 : index
    %89 = vector.load %arg3[%c2_62, %c0_63, %c0_64] : memref<3x384x128xbf16, #tpu.memory_space<vmem>>, vector<1x384x128xbf16>
    %90 = vector.shape_cast %89 : vector<1x384x128xbf16> to vector<384x128xbf16>
    %cst_65 = arith.constant dense<0.000000e+00> : vector<256x128xf32>
    %91 = tpu.matmul %88, %90, %cst_65 {dimension_numbers = #tpu.dot_dimension_numbers<[1], [0], [0], [1], [0, 0, 1, 1], [], []>} : vector<256x384xbf16>, vector<384x128xbf16>, vector<256x128xf32> -> vector<256x128xf32>
    %92 = arith.addf %79, %91 : vector<256x128xf32>
    %c0_66 = arith.constant 0 : index
    %c0_67 = arith.constant 0 : index
    %93 = vector.load %arg6[%c0_66, %c0_67] : memref<1x128xf32, #tpu.memory_space<vmem>>, vector<1x128xf32>
    %94 = vector.shape_cast %93 : vector<1x128xf32> to vector<128xf32>
    %95 = vector.shape_cast %94 : vector<128xf32> to vector<1x128xf32>
    %96 = vector.broadcast %95 : vector<1x128xf32> to vector<256x128xf32>
    %97 = arith.mulf %92, %96 : vector<256x128xf32>
    %c0_68 = arith.constant 0 : index
    %c0_69 = arith.constant 0 : index
    %98 = vector.load %arg7[%c0_68, %c0_69] : memref<1x128xf32, #tpu.memory_space<vmem>>, vector<1x128xf32>
    %99 = vector.shape_cast %98 : vector<1x128xf32> to vector<128xf32>
    %100 = vector.shape_cast %99 : vector<128xf32> to vector<1x128xf32>
    %101 = vector.broadcast %100 : vector<1x128xf32> to vector<256x128xf32>
    %102 = arith.addf %97, %101 : vector<256x128xf32>
    %c0_70 = arith.constant 0 : index
    %c1_71 = arith.constant 1 : index
    %c1_72 = arith.constant 1 : index
    %c0_73 = arith.constant 0 : index
    %103 = vector.load %arg1[%c0_70, %c1_71, %c1_72, %c0_73] : memref<1x18x18x128xbf16, #tpu.memory_space<vmem>>, vector<1x16x16x128xbf16>
    %104 = vector.shape_cast %103 : vector<1x16x16x128xbf16> to vector<256x128xbf16>
    %105 = arith.extf %104 : vector<256x128xbf16> to vector<256x128xf32>
    %106 = arith.addf %102, %105 : vector<256x128xf32>
    %cst_74 = arith.constant 0.000000e+00 : f32
    %107 = vector.broadcast %cst_74 : f32 to vector<256x128xf32>
    %108 = arith.maximumf %106, %107 : vector<256x128xf32>
    %109 = vector.shape_cast %108 : vector<256x128xf32> to vector<1x16x16x128xf32>
    %c0_75 = arith.constant 0 : index
    %c0_76 = arith.constant 0 : index
    %c0_77 = arith.constant 0 : index
    %c0_78 = arith.constant 0 : index
    %110 = vector.load %arg8[%c0_75, %c0_76, %c0_77, %c0_78] : memref<1x16x16x128xf32, #tpu.memory_space<vmem>>, vector<1x16x16x128xf32>
    tpu.vector_store %arg8[%c0_75, %c0_76, %c0_77, %c0_78], %109 {strides = array<i32>} : memref<1x16x16x128xf32, #tpu.memory_space<vmem>>, vector<1x16x16x128xf32>,
    return
  }
  func.func @transform_0(%arg0: i32) -> (i32, i32, i32, i32) {
    %c0_i32 = arith.constant 0 : i32
    %c0_i32_0 = arith.constant 0 : i32
    %c0_i32_1 = arith.constant 0 : i32
    %c0_i32_2 = arith.constant 0 : i32
    return %arg0, %c0_i32, %c0_i32_0, %c0_i32_1 : i32, i32, i32, i32
  }
  func.func @transform_1(%arg0: i32) -> (i32, i32, i32) {
    %c0_i32 = arith.constant 0 : i32
    %c0_i32_0 = arith.constant 0 : i32
    %c0_i32_1 = arith.constant 0 : i32
    %c0_i32_2 = arith.constant 0 : i32
    return %c0_i32, %c0_i32_0, %c0_i32_1 : i32, i32, i32
  }
  func.func @transform_2(%arg0: i32) -> (i32, i32, i32) {
    %c0_i32 = arith.constant 0 : i32
    %c0_i32_0 = arith.constant 0 : i32
    %c0_i32_1 = arith.constant 0 : i32
    %c0_i32_2 = arith.constant 0 : i32
    return %c0_i32, %c0_i32_0, %c0_i32_1 : i32, i32, i32
  }
  func.func @transform_3(%arg0: i32) -> (i32, i32) {
    %c0_i32 = arith.constant 0 : i32
    %c0_i32_0 = arith.constant 0 : i32
    %c0_i32_1 = arith.constant 0 : i32
    return %c0_i32, %c0_i32_0 : i32, i32
  }
  func.func @transform_4(%arg0: i32) -> (i32, i32) {
    %c0_i32 = arith.constant 0 : i32
    %c0_i32_0 = arith.constant 0 : i32
    %c0_i32_1 = arith.constant 0 : i32
    return %c0_i32, %c0_i32_0 : i32, i32
  }
  func.func @transform_5(%arg0: i32) -> (i32, i32) {
    %c0_i32 = arith.constant 0 : i32
    %c0_i32_0 = arith.constant 0 : i32
    %c0_i32_1 = arith.constant 0 : i32
    return %c0_i32, %c0_i32_0 : i32, i32
  }
  func.func @transform_6(%arg0: i32) -> (i32, i32) {
    %c0_i32 = arith.constant 0 : i32
    %c0_i32_0 = arith.constant 0 : i32
    %c0_i32_1 = arith.constant 0 : i32
    return %c0_i32, %c0_i32_0 : i32, i32
  }
  func.func @transform_7(%arg0: i32) -> (i32, i32, i32, i32) {
    %c0_i32 = arith.constant 0 : i32
    %c0_i32_0 = arith.constant 0 : i32
    %c0_i32_1 = arith.constant 0 : i32
    %c0_i32_2 = arith.constant 0 : i32
    return %arg0, %c0_i32, %c0_i32_0, %c0_i32_1 : i32, i32, i32, i32
  }
}

</mosaic_0001>

<bundles_post_ra>
// kernel: basic_block_forward.1
= control target key start
LH: loop header
LB: loop body
LE: loop exit
PB: predicated region body
PF: predicated region fallthrough
CT: control target
= control target key end

     0   :  { %s7271_s24 = smov 0   ;;  %s9614_s0 = inlined_call_operand.vmem [shape: bf16[2,18,18,128], index: 0, kind: input, shape index: {}]   ;;  %s9615_s1 = inlined_call_operand.vmem [shape: bf16[3,384,128], index: 1, kind: input, shape index: {}]   ;;  %s9616_s2 = inlined_call_operand.vmem [shape: bf16[3,384,128], index: 2, kind: input, shape index: {}]   ;;  %s9617_s3 = inlined_call_operand.vmem [shape: f32[1,128], index: 3, kind: input, shape index: {}]   ;;  %s9618_s4 = inlined_call_operand.vmem [shape: f32[1,128], index: 4, kind: input, shape index: {}]   ;;  %s9619_s5 = inlined_call_operand.vmem [shape: f32[1,128], index: 5, kind: input, shape index: {}]   ;;  %s9620_s6 = inlined_call_operand.vmem [shape: f32[1,128], index: 6, kind: input, shape index: {}]   ;;  %s9621_s7 = inlined_call_operand.vmem [shape: f32[2,16,16,128], index: 7, kind: output, shape index: {}]  }
   0x1 LB: > { %s5426_s25 = sadd.s32 4294967295, %s7228_s24   ;;  %p5430_p0 = scmp.ge.s32.totalorder %s7228_s24, 1  ;;  %s7228_s24 = sphi %s7271_s24, %s17_s24  }
   0x2   : > { %p237_p1 = scmp.lt.s32.totalorder %s7228_s24, 3 }
   0x4   : > { %p238_p2 = pnand %p5430_p0, %p237_p1 }
   0x6   : > { %241 = sbr.rel (%p238_p2) target bundleno = 986 (0x3da), region = 48 }
   0xb   : > { %v7011_v0 = vld [vmem:[%s9615_s1 + $0x138] sm:$0xff]   ;;  %v7014_v3 = vld [vmem:[%s9615_s1 + $0x130] sm:$0xff]   ;;  %v7017_v6 = vld [vmem:[%s9615_s1 + $0x128] sm:$0xff]   ;;  %p269_p3 = scmp.lt.s32.totalorder %s5426_s25, 1  ;;  %vm490_vm0 = vsmask.f32 3328 }
   0xc   : > { %v7012_v1 = vld [vmem:[%s9615_s1 + $0x178] sm:$0xff]   ;;  %5897 = vmatprep.subr.bf16.mxu0 %v7011_v0  ;;  %v7015_v4 = vld [vmem:[%s9615_s1 + $0x170] sm:$0xff]   ;;  %v7018_v7 = vld [vmem:[%s9615_s1 + $0x168] sm:$0xff]   ;;  %vm491_vm1 = vsmask.f32 7440  ;;  %v9624_v48 = vmov 0 }
   0xd   : > { %v7013_v2 = vld [vmem:[%s9615_s1 + $0xf8] sm:$0xff]   ;;  %6713 = vmatprep.subr.bf16.mxu1 %v7012_v1  ;;  %v7016_v5 = vld [vmem:[%s9615_s1 + $0xf0] sm:$0xff]   ;;  %v7019_v8 = vld [vmem:[%s9615_s1 + $0xe8] sm:$0xff]   ;;  %s9737_s25 = smov (!%p269_p3, %s5426_s25), 1  ;;  %vm2028_vm3 = vcmask 1042432   ;;  %vm2029_vm4 = vcmask 1046532  }
   0xe   : > { %5898 = vmatpush3.bf16.msra.mxu0 %v7013_v2  ;;  %6714 = vmatpush3.bf16.msra.mxu1 %v7012_v1  ;;  %v7020_v9 = vld [vmem:[%s9615_s1 + $0x120] sm:$0xff]   ;;  %v7023_v12 = vld [vmem:[%s9615_s1 + $0x118] sm:$0xff]   ;;  %v7026_v15 = vld [vmem:[%s9615_s1 + $0x110] sm:$0xff]   ;;  %s7001_s16 = smul.u32 216, %s9737_s25  ;;  %s5896_s21 = sshll.u32 %s9737_s25, 8 }
   0xf   : > { %5899 = vmatprep.subr.bf16.mxu0 %v7014_v3  ;;  %6715 = vmatprep.subr.bf16.mxu1 %v7015_v4  ;;  %v7021_v10 = vld [vmem:[%s9615_s1 + $0x160] sm:$0xff]   ;;  %v7024_v13 = vld [vmem:[%s9615_s1 + $0x158] sm:$0xff]   ;;  %v7027_v16 = vld [vmem:[%s9615_s1 + $0x150] sm:$0xff]   ;;  %s9336_s23 = scalar_lea.vmem %s9621_s7, %s5896_s21 }
  0x10   : > { %v7022_v11 = vld [vmem:[%s9615_s1 + $0xe0] sm:$0xff]   ;;  %v7025_v14 = vld [vmem:[%s9615_s1 + $0xd8] sm:$0xff]   ;;  %v7028_v17 = vld [vmem:[%s9615_s1 + $0xd0] sm:$0xff]   ;;  %s7349_s27 = scalar_lea.vmem %s9614_s0, %s7001_s16 }
  0x11   : > { %v7029_v18 = vld [vmem:[%s9615_s1 + $0x108] sm:$0xff]   ;;  %v7032_v21 = vld [vmem:[%s9615_s1 + $0x100] sm:$0xff]   ;;  %v283_v24 = vld [vmem:[%s7349_s27 + $0x10] sm:$0xf] }
  0x12   : > { %5900 = vmatpush3.bf16.msra.mxu0 %v7016_v5  ;;  %6716 = vmatpush3.bf16.msra.mxu1 %v7015_v4  ;;  %v7030_v19 = vld [vmem:[%s9615_s1 + $0x148] sm:$0xff]   ;;  %v7033_v22 = vld [vmem:[%s9615_s1 + $0x140] sm:$0xff]   ;;  %v473_v25 = vld [vmem:[%s7349_s27 + $0x14] sm:$0x1]  ;;  %v527_v29 = vshll.u32 %v283_v24, 16  ;;  %v531_v30 = vshrl.u32 %v283_v24, 16 }
  0x13   : > { %5901 = vmatprep.subr.bf16.mxu0 %v7017_v6  ;;  %6717 = vmatprep.subr.bf16.mxu1 %v7018_v7  ;;  %v7031_v20 = vld [vmem:[%s9615_s1 + $0xc8] sm:$0xff]   ;;  %v7034_v28 = vld [vmem:[%s9615_s1 + $0xc0] sm:$0xff]   ;;  %v537_v31 = vshll.u32 %v473_v25, 16  ;;  %v284_v32 = vld [vmem:[%s7349_s27 + $0x18] sm:$0xf] }
  0x14   : > { %v282_v23 = vld [vmem:[%s7349_s27 + $0xc] sm:$0xf]  ;;  %v285_v35 = vld [vmem:[%s7349_s27 + $0x1c] sm:$0xf]  ;;  %v474_v36 = vld [vmem:[%s7349_s27 + $0x20] sm:$0x1] }
  0x15   : > { %v518_v26 = vshrl.u32 %v282_v23, 16  ;;  %v521_v27 = vshll.u32 %v282_v23, 16  ;;  %v529_v37 = vrot.slane %v527_v29, 5  ;;  %v533_v38 = vrot.slane %v531_v30, 4  ;;  %v280_v41 = vld [vmem:[%s7349_s27] sm:$0xf]  ;;  %vm7380_vm2 = vmor %vm490_vm0, %vm491_vm1 }
  0x16   : > { %5902 = vmatpush3.bf16.msra.mxu0 %v7019_v8  ;;  %6718 = vmatpush3.bf16.msra.mxu1 %v7018_v7  ;;  %v539_v39 = vrot.slane %v537_v31, 5  ;;  %v542_v40 = vshrl.u32 %v284_v32, 16  ;;  %v545_v43 = vshll.u32 %v284_v32, 16  ;;  %v551_v44 = vshll.u32 %v285_v35, 16  ;;  %v7373_v46 = vld [vmem:[%s9615_s1 + $0xb8] sm:$0xff]   ;;  %vm7853_vm5 = vmor %vm2028_vm3, %vm2029_vm4 }
  0x17   : > { %5903 = vmatprep.subr.bf16.mxu0 %v7020_v9  ;;  %6719 = vmatprep.subr.bf16.mxu1 %v7021_v10  ;;  %v520_v33 = vrot.slane %v518_v26, 4  ;;  %v523_v34 = vrot.slane %v521_v27, 5  ;;  %v555_v45 = vshrl.u32 %v285_v35, 16  ;;  %v7036_v47 = vld [vmem:[%s9615_s1 + $0x78] sm:$0xff]   ;;  %v9625_v48 = vsel %vm7380_vm2, 4294967295, %v9624_v48 }
  0x18   : > { %9626 = vst [vmem:[#allocation3_spill] sm:$0xff] %v9625_v48  ;;  %v534_v49 = vor.u32 %v533_v38, %v529_v37  ;;  %v544_v50 = vrot.slane %v542_v40, 4  ;;  %v561_v51 = vshll.u32 %v474_v36, 16  ;;  %v281_v52 = vld [vmem:[%s7349_s27 + $0x4] sm:$0xf]  ;;  %v494_v53 = vshrl.u32 %v280_v41, 16 }
  0x19   : > { %v524_v42 = vor.u32 %v523_v34, %v520_v33  ;;  %v547_v55 = vrot.slane %v545_v43, 5  ;;  %v553_v56 = vrot.slane %v551_v44, 5  ;;  %v557_v57 = vrot.slane %v555_v45, 4  ;;  %v472_v58 = vld [vmem:[%s7349_s27 + $0x8] sm:$0x1]  ;;  %v7040_v45 = vld [vmem:[%s9615_s1 + $0xb0] sm:$0xff]  }
  0x1a   : > { %5904 = vmatpush3.bf16.msra.mxu0 %v7022_v11  ;;  %6720 = vmatpush3.bf16.msra.mxu1 %v7021_v10  ;;  %v535_v59 = vrot.slane %v534_v49, 4  ;;  %v563_v60 = vrot.slane %v561_v51, 5  ;;  %v496_v61 = vrot.slane %v494_v53, 4  ;;  %v497_v62 = vshll.u32 %v280_v41, 16  ;;  %v286_v63 = vld [vmem:[%s7349_s27 + $0x24] sm:$0xf] }
  0x1b   : > { %5905 = vmatprep.subr.bf16.mxu0 %v7023_v12  ;;  %6721 = vmatprep.subr.bf16.mxu1 %v7024_v13  ;;  %v525_v54 = vrot.slane %v524_v42, 4  ;;  %v548_v1 = vor.u32 %v547_v55, %v544_v50  ;;  %v558_v2 = vor.u32 %v557_v57, %v553_v56  ;;  %v503_v3 = vshll.u32 %v281_v52, 16  ;;  %v287_v4 = vld [vmem:[%s7349_s27 + $0x28] sm:$0xf]  ;;  %v288_v25 = vld [vmem:[%s7349_s27 + $0x30] sm:$0xf] }
  0x1c   : > { %v540_v5 = vsel %vm7380_vm2, %v535_v59, %v539_v39  ;;  %v499_v6 = vrot.slane %v497_v62, 5  ;;  %v507_v7 = vshrl.u32 %v281_v52, 16  ;;  %v513_v8 = vshll.u32 %v472_v58, 16  ;;  %v7405_v30 = vld [vmem:[%s7349_s27 + $0x34] sm:$0xf]  ;;  %v7037_v58 = vld [vmem:[%s9615_s1 + $0x38] sm:$0xff]  }
  0x1d   : > { %v530_v0 = vsel %vm7380_vm2, %v525_v54, %v529_v37  ;;  %v549_v10 = vrot.slane %v548_v1, 4  ;;  %v559_v11 = vrot.slane %v558_v2, 4  ;;  %v505_v12 = vrot.slane %v503_v3, 5  ;;  %v476_v34 = vld [vmem:[%s7349_s27 + $0x38] sm:$0x1] }
  0x1e   : > { %5906 = vmatpush3.bf16.msra.mxu0 %v7025_v14  ;;  %6722 = vmatpush3.bf16.msra.mxu1 %v7024_v13  ;;  %v7393_v9 = vcombine.low %v530_v0, %v540_v5  ;;  %v500_v13 = vor.u32 %v499_v6, %v496_v61  ;;  %v509_v14 = vrot.slane %v507_v7, 4  ;;  %v575_v24 = vshll.u32 %v287_v4, 16  ;;  %v290_v39 = vld [vmem:[%s7349_s27 + $0x3c] sm:$0xf]  ;;  %v291_v44 = vld [vmem:[%s7349_s27 + $0x40] sm:$0xf] }
  0x1f   : > { %5907 = vmatprep.subr.bf16.mxu0 %v7026_v15  ;;  %6723 = vmatprep.subr.bf16.mxu1 %v7027_v16  ;;  %v515_v15 = vrot.slane %v513_v8, 5  ;;  %v590_v38 = vshrl.u32 %v288_v25, 16  ;;  %v593_v41 = vshll.u32 %v288_v25, 16  ;;  %v599_v42 = vshll.u32 %v7405_v30, 16  ;;  %v477_v0 = vld [vmem:[%s7349_s27 + $0x44] sm:$0x1] }
  0x20   : > { %1222 = vmatprep.mubr.bf16.mxu0 %v7393_v9  ;;  %v510_v23 = vor.u32 %v509_v14, %v505_v12  ;;  %v577_v33 = vrot.slane %v575_v24, 5  ;;  %v603_v43 = vshrl.u32 %v7405_v30, 16  ;;  %v609_v55 = vshll.u32 %v476_v34, 16  ;;  %v292_v2 = vld [vmem:[%s7349_s27 + $0x48] sm:$0xf] }
  0x21   : > { %v592_v51 = vrot.slane %v590_v38, 4  ;;  %v595_v52 = vrot.slane %v593_v41, 5  ;;  %v601_v53 = vrot.slane %v599_v42, 5  ;;  %v614_v59 = vshrl.u32 %v290_v39, 16  ;;  %v293_v7 = vld [vmem:[%s7349_s27 + $0x4c] sm:$0xf] }
  0x22   : > { %5908 = vmatpush3.bf16.msra.mxu0 %v7028_v17  ;;  %6724 = vmatpush3.bf16.msra.mxu1 %v7027_v16  ;;  %v475_v16 = vld [vmem:[%s7349_s27 + $0x2c] sm:$0x1]  ;;  %v554_v17 = vsel %vm7380_vm2, %v549_v10, %v553_v56  ;;  %v511_v32 = vrot.slane %v510_v23, 4  ;;  %v605_v54 = vrot.slane %v603_v43, 4  ;;  %v623_v1 = vshll.u32 %v291_v44, 16 }
  0x23   : > { %5909 = vmatprep.subr.bf16.mxu0 %v7029_v18  ;;  %6725 = vmatprep.subr.bf16.mxu1 %v7030_v19  ;;  %v564_v18 = vsel %vm7380_vm2, %v559_v11, %v563_v60  ;;  %v585_v29 = vshll.u32 %v475_v16, 16  ;;  %v617_v60 = vshll.u32 %v290_v39, 16  ;;  %v596_v61 = vor.u32 %v595_v52, %v592_v51  ;;  %v478_v14 = vld [vmem:[%s7349_s27 + $0x50] sm:$0x1]  ;;  %v7042_v52 = vld [vmem:[%s9615_s1 + $0x28] sm:$0xff]  }
  0x24   : > { %v516_v40 = vsel %vm7380_vm2, %v511_v32, %v515_v15  ;;  %v606_v62 = vor.u32 %v605_v54, %v601_v53  ;;  %v627_v6 = vshrl.u32 %v291_v44, 16  ;;  %v641_v24 = vshll.u32 %v292_v2, 16 }
  0x25   : > { %v587_v37 = vrot.slane %v585_v29, 5  ;;  %v619_v5 = vrot.slane %v617_v60, 5  ;;  %v597_v10 = vrot.slane %v596_v61, 4  ;;  %v647_v25 = vshll.u32 %v293_v7, 16 }
  0x26   : > { %5910 = vmatpush3.bf16.msra.mxu0 %v7031_v20  ;;  %6726 = vmatpush3.bf16.msra.mxu1 %v7030_v19  ;;  %v566_v19 = vshrl.u32 %v286_v63, 16  ;;  %v569_v20 = vshll.u32 %v286_v63, 16  ;;  %v611_v63 = vrot.slane %v609_v55, 5  ;;  %v607_v11 = vrot.slane %v606_v62, 4 }
  0x27   : > { %5911 = vmatprep.subr.bf16.mxu0 %v7032_v21  ;;  %6727 = vmatprep.subr.bf16.mxu1 %v7033_v22  ;;  %v7401_v21 = vcombine.low %v554_v17, %v564_v18  ;;  %v629_v16 = vrot.slane %v627_v6, 4  ;;  %v633_v17 = vshll.u32 %v477_v0, 16  ;;  %v7039_v18 = vld [vmem:[%s9615_s1 + $0x30] sm:$0xff]   ;;  %v643_v34 = vrot.slane %v641_v24, 5 }
  0x28   : > { %v568_v26 = vrot.slane %v566_v19, 4  ;;  %v571_v27 = vrot.slane %v569_v20, 5  ;;  %v638_v19 = vshrl.u32 %v292_v2, 16  ;;  %v294_v20 = vld [vmem:[%s7349_s27 + $0x54] sm:$0xf]  ;;  %v612_v23 = vsel %vm7380_vm2, %v607_v11, %v611_v63 }
  0x29   : > { %6729 = vmatprep.mubr.bf16.mxu1 %v7401_v21  ;;  %v635_v32 = vrot.slane %v633_v17, 5  ;;  %v662_v41 = vshrl.u32 %v294_v20, 16  ;;  %v665_v44 = vshll.u32 %v294_v20, 16  ;;  %v480_v63 = vld [vmem:[%s7349_s27 + $0x68] sm:$0x1]  ;;  %v7046_v17 = vld [vmem:[%s9615_s1 + $0x58] sm:$0xff]  }
  0x2a   : > { %5912 = vmatpush3.bf16.msra.mxu0 %v7034_v28  ;;  %6728 = vmatpush3.bf16.msra.mxu1 %v7033_v22  ;;  %v501_v22 = vrot.slane %v500_v13, 4  ;;  %v579_v28 = vshrl.u32 %v287_v4, 16  ;;  %v572_v35 = vor.u32 %v571_v27, %v568_v26  ;;  %v616_v4 = vrot.slane %v614_v59, 4  ;;  %v7038_v13 = vld [vmem:[%s9615_s1 + $0x70] sm:$0xff]   ;;  %v295_v26 = vld [vmem:[%s7349_s27 + $0x58] sm:$0xf] }
  0x2b   : > { %6761 = vmatprep.subr.bf16.mxu0 %v7373_v46  ;;  %6033 = vmatprep.subr.bf16.mxu1 %v7036_v47  ;;  %v7041_v27 = vld [vmem:[%s9615_s1 + $0x68] sm:$0xff]   ;;  %v675_v51 = vshrl.u32 %v295_v26, 16  ;;  %v7043_v59 = vld [vmem:[%s9615_s1 + $0x60] sm:$0xff]   ;;  %v299_v6 = vld [vmem:[%s7349_s27 + $0x70] sm:$0xf] }
  0x2c   : > { %v506_v31 = vsel %vm7380_vm2, %v501_v22, %v505_v12  ;;  %v581_v36 = vrot.slane %v579_v28, 4  ;;  %v573_v49 = vrot.slane %v572_v35, 4  ;;  %v625_v12 = vrot.slane %v623_v1, 5 }
  0x2d   : > { %v5452_v47 = vcombine.low %v506_v31, %v516_v40  ;;  %v620_v15 = vor.u32 %v619_v5, %v616_v4  ;;  %v602_v22 = vsel %vm7380_vm2, %v597_v10, %v601_v53  ;;  %v649_v35 = vrot.slane %v647_v25, 5  ;;  %v296_v53 = vld [vmem:[%s7349_s27 + $0x60] sm:$0xf]  ;;  %v298_v5 = vld [vmem:[%s7349_s27 + $0x6c] sm:$0xf] }
  0x2e   : > { %v582_v50 = vor.u32 %v581_v36, %v577_v33  ;;  %v578_v56 = vsel %vm7380_vm2, %v573_v49, %v577_v33  ;;  %v7454_v28 = vcombine.low %v602_v22, %v612_v23  ;;  %v630_v31 = vor.u32 %v629_v16, %v625_v12  ;;  %v7047_v23 = vld [vmem:[%s9615_s1 + $0x18] sm:$0xff]  }
  0x2f   : > { %1223 = vmatmul.mubr.bf16.vlgmr.msra.gmra.mxu0 %v5452_v47  ;;  %v621_v29 = vrot.slane %v620_v15, 4  ;;  %v640_v33 = vrot.slane %v638_v19, 4  ;;  %v651_v36 = vshrl.u32 %v293_v7, 16  ;;  %v657_v40 = vshll.u32 %v478_v14, 16  ;;  %v7050_v47 = vld [vmem:[%s9615_s1 + $0xa0] sm:$0xff]  }
  0x30   : > { %v583_v57 = vrot.slane %v582_v50, 4  ;;  %6762 = vmatpush3.bf16.msra.mxu0 %v7373_v46  ;;  %1230 = vmatprep.mubr.bf16.mxu0 %v7401_v21  ;;  %v7045_v46 = vld [vmem:[%s9615_s1 + $0xa8] sm:$0xff]   ;;  %v631_v39 = vrot.slane %v630_v31, 4  ;;  %v664_v50 = vrot.slane %v662_v41, 4  ;;  %v677_v61 = vrot.slane %v675_v51, 4  ;;  %v7048_v41 = vld [vmem:[%s9615_s1 + $0x50] sm:$0xff]  }
  0x31   : > { %6763 = vmatprep.subr.bf16.mxu0 %v7040_v45  ;;  %v626_v38 = vsel %vm7380_vm2, %v621_v29, %v625_v12  ;;  %v644_v42 = vor.u32 %v643_v34, %v640_v33  ;;  %v653_v43 = vrot.slane %v651_v36, 4  ;;  %v659_v49 = vrot.slane %v657_v40, 5  ;;  %v7044_v12 = vld [vmem:[%s9615_s1 + $0x20] sm:$0xff]   ;;  %v300_v34 = vld [vmem:[%s7349_s27 + $0x78] sm:$0xf] }
  0x32   : > { %v588_v3 = vsel %vm7380_vm2, %v583_v57, %v587_v37  ;;  %v479_v37 = vld [vmem:[%s7349_s27 + $0x5c] sm:$0x1]  ;;  %v667_v57 = vrot.slane %v665_v44, 5  ;;  %v686_v0 = vshrl.u32 %v296_v53, 16  ;;  %v689_v4 = vshll.u32 %v296_v53, 16 }
  0x33   : > { %v7435_v8 = vcombine.low %v578_v56, %v588_v3  ;;  %v645_v55 = vrot.slane %v644_v42, 4  ;;  %v654_v56 = vor.u32 %v653_v43, %v649_v35  ;;  %v681_v62 = vshll.u32 %v479_v37, 16  ;;  %v301_v40 = vld [vmem:[%s7349_s27 + $0x7c] sm:$0xf]  ;;  %v303_v53 = vld [vmem:[%s7349_s27 + $0x88] sm:$0xf] }
  0x34   : > { %6764 = vmatpush3.bf16.msra.mxu0 %v7040_v45  ;;  %v671_v45 = vshll.u32 %v295_v26, 16  ;;  %v668_v3 = vor.u32 %v667_v57, %v664_v50  ;;  %v688_v10 = vrot.slane %v686_v0, 4  ;;  %v691_v15 = vrot.slane %v689_v4, 5 }
  0x35   : > { %6730 = vmatmul.mubr.bf16.vlgmr.msra.gmra.mxu1 %v7435_v8  ;;  %6765 = vmatprep.subr.bf16.mxu0 %v7045_v46  ;;  %v650_v1 = vsel %vm7380_vm2, %v645_v55, %v649_v35  ;;  %v655_v2 = vrot.slane %v654_v56, 4  ;;  %v705_v22 = vshll.u32 %v480_v63, 16  ;;  %v710_v29 = vshrl.u32 %v298_v5, 16  ;;  %v7057_v35 = vld [vmem:[%s9615_s1 + $0x98] sm:$0xff]   ;;  %v7049_v55 = vld [vmem:[%s9615_s1 + $0x10] sm:$0xff]  }
  0x36   : > { %6034 = vmatpush3.bf16.msra.mxu1 %v7037_v58  ;;  %6733 = vmatprep.mubr.bf16.mxu1 %v7454_v28  ;;  %v7474_v58 = vld [vmem:[%s7349_s27 + $0x64] sm:$0xf]  ;;  %v673_v60 = vrot.slane %v671_v45, 5  ;;  %v669_v14 = vrot.slane %v668_v3, 4  ;;  %v692_v25 = vor.u32 %v691_v15, %v688_v10  ;;  %v719_v33 = vshll.u32 %v299_v6, 16 }
  0x37   : > { %6035 = vmatprep.subr.bf16.mxu1 %v7038_v13  ;;  %1231 = vmatmul.mubr.bf16.gmra.mxu0 %v7393_v9  ;;  %v636_v9 = vsel %vm7380_vm2, %v631_v39, %v635_v32  ;;  %v695_v11 = vshll.u32 %v7474_v58, 16  ;;  %v660_v13 = vsel %vm7380_vm2, %v655_v2, %v659_v49  ;;  %v699_v16 = vshrl.u32 %v7474_v58, 16  ;;  %v7051_v2 = vld [vmem:[%s9615_s1 + $0x48] sm:$0xff]  }
  0x38   : > { %1238 = vmatprep.mubr.bf16.mxu0 %v7435_v8  ;;  %6766 = vmatpush3.bf16.msra.mxu0 %v7045_v46  ;;  %v7471_v54 = vcombine.low %v626_v38, %v636_v9  ;;  %v678_v7 = vor.u32 %v677_v61, %v673_v60  ;;  %v683_v46 = vrot.slane %v681_v62, 5  ;;  %v674_v24 = vsel %vm7380_vm2, %v669_v14, %v673_v60  ;;  %v302_v9 = vld [vmem:[%s7349_s27 + $0x84] sm:$0xf]  ;;  %v7061_v61 = vld [vmem:[%s9615_s1 + $0x90] sm:$0xff]  }
  0x39   : > { %6767 = vmatprep.subr.bf16.mxu0 %v7050_v47  ;;  %v697_v20 = vrot.slane %v695_v11, 5  ;;  %v701_v26 = vrot.slane %v699_v16, 4  ;;  %v707_v31 = vrot.slane %v705_v22, 5  ;;  %v713_v32 = vshll.u32 %v298_v5, 16 }
  0x3a   : > { %6036 = vmatpush3.bf16.msra.mxu1 %v7039_v18  ;;  %v7495_v18 = vcombine.low %v650_v1, %v660_v13  ;;  %v679_v19 = vrot.slane %v678_v7, 4  ;;  %v693_v37 = vrot.slane %v692_v25, 4  ;;  %v712_v39 = vrot.slane %v710_v29, 4  ;;  %v483_v7 = vld [vmem:[%s7349_s27 + $0x8c] sm:$0x1] }
  0x3b   : > { %6037 = vmatprep.subr.bf16.mxu1 %v7041_v27  ;;  %v481_v27 = vld [vmem:[%s7349_s27 + $0x74] sm:$0x1]  ;;  %v702_v38 = vor.u32 %v701_v26, %v697_v20  ;;  %v715_v42 = vrot.slane %v713_v32, 5  ;;  %v721_v43 = vrot.slane %v719_v33, 5  ;;  %v723_v44 = vshrl.u32 %v299_v6, 16  ;;  %v7069_v26 = vld [vmem:[%s9615_s1 + $0x80] sm:$0xff]  }
  0x3c   : > { %6768 = vmatpush3.bf16.msra.mxu0 %v7050_v47  ;;  %v729_v45 = vshll.u32 %v481_v27, 16  ;;  %v482_v47 = vld [vmem:[%s7349_s27 + $0x80] sm:$0x1]  ;;  %v698_v49 = vsel %vm7380_vm2, %v693_v37, %v697_v20  ;;  %v734_v51 = vshrl.u32 %v300_v34, 16  ;;  %v743_v60 = vshll.u32 %v301_v40, 16 }
  0x3d   : > { %6734 = vmatmul.mubr.bf16.gmra.mxu1 %v7471_v54  ;;  %6769 = vmatprep.subr.bf16.mxu0 %v7057_v35  ;;  %v703_v50 = vrot.slane %v702_v38, 4  ;;  %v716_v56 = vor.u32 %v715_v42, %v712_v39  ;;  %v725_v57 = vrot.slane %v723_v44, 4  ;;  %v747_v1 = vshrl.u32 %v301_v40, 16  ;;  %v7553_v25 = vld [vmem:[%s7349_s27 + $0x90] sm:$0xf]  ;;  %v7054_v38 = vld [vmem:[%s9615_s1] sm:$0xff]  }
  0x3e   : > { %6038 = vmatpush3.bf16.msra.mxu1 %v7042_v52  ;;  %6737 = vmatprep.mubr.bf16.mxu1 %v7495_v18  ;;  %v737_v52 = vshll.u32 %v300_v34, 16  ;;  %v736_v63 = vrot.slane %v734_v51, 4  ;;  %v745_v6 = vrot.slane %v743_v60, 5  ;;  %v758_v13 = vshrl.u32 %v302_v9, 16  ;;  %v7561_v32 = vld [vmem:[%s7349_s27 + $0x94] sm:$0xf] }
  0x3f   : > { %6039 = vmatprep.subr.bf16.mxu1 %v7043_v59  ;;  %1239 = vmatmul.mubr.bf16.gmra.mxu0 %v7401_v21  ;;  %v684_v21 = vsel %vm7380_vm2, %v679_v19, %v683_v46  ;;  %v731_v59 = vrot.slane %v729_v45, 5  ;;  %v708_v62 = vsel %vm7380_vm2, %v703_v50, %v707_v31  ;;  %v717_v4 = vrot.slane %v716_v56, 4  ;;  %v7052_v46 = vld [vmem:[%s9615_s1 + $0x8] sm:$0xff]   ;;  %v7053_v19 = vld [vmem:[%s9615_s1 + $0x40] sm:$0xff]   ;;  %v7573_v39 = vld [vmem:[%s9615_s1 + $0x238] sm:$0xff]  }
  0x40   : > { %1246 = vmatprep.mubr.bf16.mxu0 %v7454_v28  ;;  %v7512_v36 = vcombine.low %v674_v24, %v684_v21  ;;  %6770 = vmatpush3.bf16.msra.mxu0 %v7057_v35  ;;  %v739_v0 = vrot.slane %v737_v52, 5  ;;  %v7535_v3 = vcombine.low %v698_v49, %v708_v62  ;;  %v726_v5 = vor.u32 %v725_v57, %v721_v43  ;;  %v484_v42 = vld [vmem:[%s7349_s27 + $0x98] sm:$0x1]  ;;  %v7578_v44 = vld [vmem:[%s7349_s27 + $0x9c] sm:$0xf] }
  0x41   : > { %6771 = vmatprep.subr.bf16.mxu0 %v7061_v61  ;;  %v749_v11 = vrot.slane %v747_v1, 4  ;;  %v722_v14 = vsel %vm7380_vm2, %v717_v4, %v721_v43  ;;  %v761_v16 = vshll.u32 %v302_v9, 16  ;;  %v760_v24 = vrot.slane %v758_v13, 4  ;;  %v7586_v50 = vld [vmem:[%s7349_s27 + $0xa0] sm:$0xf]  ;;  %v7073_v51 = vld [vmem:[%s9615_s1 + $0x1f8] sm:$0xff]  }
  0x42   : > { %6040 = vmatpush3.bf16.msra.mxu1 %v7044_v12  ;;  %v740_v10 = vor.u32 %v739_v0, %v736_v63  ;;  %v753_v12 = vshll.u32 %v482_v47, 16  ;;  %v727_v15 = vrot.slane %v726_v5, 4  ;;  %v771_v31 = vshrl.u32 %v303_v53, 16  ;;  %v485_v5 = vld [vmem:[%s7349_s27 + $0xa4] sm:$0x1] }
  0x43   : > { %6041 = vmatprep.subr.bf16.mxu1 %v7046_v17  ;;  %v767_v17 = vshll.u32 %v303_v53, 16  ;;  %v750_v22 = vor.u32 %v749_v11, %v745_v6  ;;  %v763_v29 = vrot.slane %v761_v16, 5  ;;  %v777_v37 = vshll.u32 %v483_v7, 16  ;;  %v7613_v16 = vld [vmem:[%s7349_s27 + $0xac] sm:$0xf] }
  0x44   : > { %6772 = vmatpush3.bf16.msra.mxu0 %v7061_v61  ;;  %v741_v20 = vrot.slane %v740_v10, 4  ;;  %v732_v27 = vsel %vm7380_vm2, %v727_v15, %v731_v59  ;;  %v782_v43 = vshrl.u32 %v7553_v25, 16  ;;  %v785_v9 = vshll.u32 %v7553_v25, 16 }
  0x45   : > { %6738 = vmatmul.mubr.bf16.gmra.mxu1 %v7512_v36  ;;  %v769_v21 = vrot.slane %v767_v17, 5  ;;  %v7563_v33 = vcombine.low %v722_v14, %v732_v27  ;;  %v751_v35 = vrot.slane %v750_v22, 4  ;;  %v764_v40 = vor.u32 %v763_v29, %v760_v24  ;;  %v486_v22 = vld [vmem:[%s7349_s27 + $0xb0] sm:$0x1] }
  0x46   : > { %6042 = vmatpush3.bf16.msra.mxu1 %v7047_v23  ;;  %6741 = vmatprep.mubr.bf16.mxu1 %v7535_v3  ;;  %v755_v23 = vrot.slane %v753_v12, 5  ;;  %v746_v34 = vsel %vm7380_vm2, %v741_v20, %v745_v6  ;;  %v779_v47 = vrot.slane %v777_v37, 5  ;;  %v791_v49 = vshll.u32 %v7561_v32, 16  ;;  %v7608_v12 = vld [vmem:[%s7349_s27 + $0xa8] sm:$0xf] }
  0x47   : > { %6043 = vmatprep.subr.bf16.mxu1 %v7048_v41  ;;  %1247 = vmatmul.mubr.bf16.gmra.mxu0 %v7435_v8  ;;  %v7065_v8 = vld [vmem:[%s9615_s1 + $0x88] sm:$0xff]   ;;  %v773_v41 = vrot.slane %v771_v31, 4  ;;  %v765_v53 = vrot.slane %v764_v40, 4  ;;  %v784_v56 = vrot.slane %v782_v43, 4  ;;  %v787_v57 = vrot.slane %v785_v9, 5 }
  0x48   : > { %1254 = vmatprep.mubr.bf16.mxu0 %v7471_v54  ;;  %6773 = vmatprep.subr.bf16.mxu0 %v7065_v8  ;;  %v756_v45 = vsel %vm7380_vm2, %v751_v35, %v755_v23  ;;  %v793_v59 = vrot.slane %v791_v49, 5  ;;  %v795_v60 = vshrl.u32 %v7561_v32, 16  ;;  %v801_v61 = vshll.u32 %v484_v42, 16  ;;  %v7617_v23 = vld [vmem:[%s7349_s27 + $0xb4] sm:$0xf] }
  0x49   : > { %6774 = vmatpush3.bf16.msra.mxu0 %v7065_v8  ;;  %v7591_v52 = vcombine.low %v746_v34, %v756_v45  ;;  %v770_v62 = vsel %vm7380_vm2, %v765_v53, %v769_v21  ;;  %v809_v0 = vshll.u32 %v7578_v44, 16  ;;  %v788_v1 = vor.u32 %v787_v57, %v784_v56  ;;  %v487_v9 = vld [vmem:[%s7349_s27 + $0xbc] sm:$0x1] }
  0x4a   : > { %6044 = vmatpush3.bf16.msra.mxu1 %v7049_v55  ;;  %6775 = vmatprep.subr.bf16.mxu0 %v7069_v26  ;;  %v774_v55 = vor.u32 %v773_v41, %v769_v21  ;;  %v803_v4 = vrot.slane %v801_v61, 5  ;;  %v815_v6 = vshll.u32 %v7586_v50, 16  ;;  %v819_v11 = vshrl.u32 %v7586_v50, 16  ;;  %v7625_v21 = vld [vmem:[%s7349_s27 + $0xb8] sm:$0xf] }
  0x4b   : > { %6045 = vmatprep.subr.bf16.mxu1 %v7051_v2  ;;  %v797_v2 = vrot.slane %v795_v60, 4  ;;  %v811_v10 = vrot.slane %v809_v0, 5  ;;  %v789_v8 = vrot.slane %v788_v1, 4  ;;  %v825_v20 = vshll.u32 %v485_v5, 16  ;;  %v7648_v0 = vld [vmem:[%s7349_s27 + $0xc0] sm:$0xf] }
  0x4c   : > { %v775_v63 = vrot.slane %v774_v55, 4  ;;  %v817_v15 = vrot.slane %v815_v6, 5  ;;  %v830_v27 = vshrl.u32 %v7608_v12, 16  ;;  %v833_v29 = vshll.u32 %v7608_v12, 16  ;;  %v7651_v6 = vld [vmem:[%s7349_s27 + $0xc4] sm:$0xf] }
  0x4d   : > { %6742 = vmatmul.mubr.bf16.gmra.mxu1 %v7563_v33  ;;  %6776 = vmatpush3.bf16.msra.mxu0 %v7069_v26  ;;  %v798_v14 = vor.u32 %v797_v2, %v793_v59  ;;  %v794_v24 = vsel %vm7380_vm2, %v789_v8, %v793_v59  ;;  %v827_v35 = vrot.slane %v825_v20, 5  ;;  %v839_v37 = vshll.u32 %v7613_v16, 16 }
  0x4e   : > { %6046 = vmatpush3.bf16.msra.mxu1 %v7052_v46  ;;  %6745 = vmatprep.mubr.bf16.mxu1 %v7591_v52  ;;  %v780_v7 = vsel %vm7380_vm2, %v775_v63, %v779_v47  ;;  %v832_v40 = vrot.slane %v830_v27, 4  ;;  %v835_v41 = vrot.slane %v833_v29, 5  ;;  %v843_v42 = vshrl.u32 %v7613_v16, 16 }
  0x4f   : > { %6047 = vmatprep.subr.bf16.mxu1 %v7053_v19  ;;  %1255 = vmatmul.mubr.bf16.gmra.mxu0 %v7454_v28  ;;  %v806_v28 = vshrl.u32 %v7578_v44, 16  ;;  %v7610_v13 = vcombine.low %v770_v62, %v780_v7  ;;  %v821_v19 = vrot.slane %v819_v11, 4  ;;  %v799_v26 = vrot.slane %v798_v14, 4  ;;  %v488_v14 = vld [vmem:[%s7349_s27 + $0xc8] sm:$0x1] }
  0x50   : > { %1262 = vmatprep.mubr.bf16.mxu0 %v7495_v18  ;;  %6169 = vmatprep.subr.bf16.mxu0 %v7073_v51  ;;  %v841_v47 = vrot.slane %v839_v37, 5  ;;  %v836_v49 = vor.u32 %v835_v41, %v832_v40  ;;  %v845_v51 = vrot.slane %v843_v42, 4  ;;  %v849_v53 = vshll.u32 %v486_v22, 16 }
  0x51   : > { %v808_v46 = vrot.slane %v806_v28, 4  ;;  %v822_v34 = vor.u32 %v821_v19, %v817_v15  ;;  %v854_v55 = vshrl.u32 %v7617_v23, 16  ;;  %v857_v57 = vshll.u32 %v7617_v23, 16  ;;  %v7661_v19 = vld [vmem:[%s7349_s27 + $0xcc] sm:$0xf] }
  0x52   : > { %6048 = vmatpush3.bf16.msra.mxu1 %v7054_v38  ;;  %v804_v38 = vsel %vm7380_vm2, %v799_v26, %v803_v4  ;;  %v863_v59 = vshll.u32 %v7625_v21, 16  ;;  %v867_v60 = vshrl.u32 %v7625_v21, 16  ;;  %v837_v62 = vrot.slane %v836_v49, 4  ;;  %v7669_v26 = vld [vmem:[%s7349_s27 + $0xd0] sm:$0xf] }
  0x53   : > { %6809 = vmatprep.subr.bf16.mxu1 %v7573_v39  ;;  %v812_v17 = vor.u32 %v811_v10, %v808_v46  ;;  %v7633_v43 = vcombine.low %v794_v24, %v804_v38  ;;  %v846_v63 = vor.u32 %v845_v51, %v841_v47  ;;  %v851_v28 = vrot.slane %v849_v53, 5 }
  0x54   : > { %v856_v1 = vrot.slane %v854_v55, 4  ;;  %v859_v2 = vrot.slane %v857_v57, 5  ;;  %v865_v4 = vrot.slane %v863_v59, 5  ;;  %v869_v5 = vrot.slane %v867_v60, 4 }
  0x55   : > { %6746 = vmatmul.mubr.bf16.gmra.mxu1 %v7610_v13  ;;  %v813_v31 = vrot.slane %v812_v17, 4  ;;  %v842_v7 = vsel %vm7380_vm2, %v837_v62, %v841_v47  ;;  %v847_v46 = vrot.slane %v846_v63, 4  ;;  %v873_v10 = vshll.u32 %v487_v9, 16 }
  0x56   : > { %6749 = vmatprep.mubr.bf16.mxu1 %v7633_v43  ;;  %v860_v11 = vor.u32 %v859_v2, %v856_v1  ;;  %v870_v8 = vor.u32 %v869_v5, %v865_v4  ;;  %v881_v17 = vshll.u32 %v7648_v0, 16  ;;  %v887_v24 = vshll.u32 %v7651_v6, 16 }
  0x57   : > { %1263 = vmatmul.mubr.bf16.gmra.mxu0 %v7471_v54  ;;  %v818_v45 = vsel %vm7380_vm2, %v813_v31, %v817_v15  ;;  %v823_v54 = vrot.slane %v822_v34, 4  ;;  %v878_v15 = vshrl.u32 %v7648_v0, 16  ;;  %v852_v20 = vsel %vm7380_vm2, %v847_v46, %v851_v28 }
  0x58   : > { %1270 = vmatprep.mubr.bf16.mxu0 %v7512_v36  ;;  %v875_v22 = vrot.slane %v873_v10, 5  ;;  %v7671_v27 = vcombine.low %v842_v7, %v852_v20  ;;  %v861_v29 = vrot.slane %v860_v11, 4  ;;  %v871_v31 = vrot.slane %v870_v8, 4 }
  0x59   : > { %v828_v56 = vsel %vm7380_vm2, %v823_v54, %v827_v35  ;;  %v880_v34 = vrot.slane %v878_v15, 4  ;;  %v489_v35 = vld [vmem:[%s7349_s27 + $0xd4] sm:$0x1]  ;;  %v883_v37 = vrot.slane %v881_v17, 5  ;;  %v889_v38 = vrot.slane %v887_v24, 5 }
  0x5a   : > { %v7645_v61 = vcombine.low %v818_v45, %v828_v56  ;;  %v897_v41 = vshll.u32 %v488_v14, 16  ;;  %v866_v42 = vsel %vm7380_vm2, %v861_v29, %v865_v4  ;;  %v876_v45 = vsel %vm7380_vm2, %v871_v31, %v875_v22  ;;  %v7173_v15 = vld [vmem:[%s7349_s27 + $0xc] sm:$0xf]  ;;  %v7701_v17 = vld [vmem:[%s7349_s27 + $0x10] sm:$0xf] }
  0x5b   : > { %v902_v54 = vshrl.u32 %v7661_v19, 16  ;;  %v905_v47 = vshll.u32 %v7661_v19, 16  ;;  %v7681_v9 = vcombine.low %v866_v42, %v876_v45  ;;  %v884_v49 = vor.u32 %v883_v37, %v880_v34  ;;  %v7175_v24 = vld [vmem:[%s7349_s27] sm:$0xf]  ;;  %v7062_v31 = vld [vmem:[%s9615_s1 + $0x230] sm:$0xff]   ;;  %v7066_v37 = vld [vmem:[%s9615_s1 + $0x228] sm:$0xff]  }
  0x5c   : > { %v899_v53 = vrot.slane %v897_v41, 5  ;;  %v911_v57 = vshll.u32 %v7669_v26, 16  ;;  %v915_v59 = vshrl.u32 %v7669_v26, 16  ;;  %v921_v63 = vshll.u32 %v489_v35, 16  ;;  %v7177_v34 = vld [vmem:[%s7349_s27 + $0x18] sm:$0xf] }
  0x5d   : > { %6750 = vmatmul.mubr.bf16.gmra.mxu1 %v7645_v61  ;;  %v904_v55 = vrot.slane %v902_v54, 4  ;;  %v907_v56 = vrot.slane %v905_v47, 5  ;;  %v885_v60 = vrot.slane %v884_v49, 4  ;;  %v5435_v20 = vcombine.low %v7173_v15, %v7701_v17  ;;  %v7716_v35 = vld [vmem:[%s7349_s27 + $0x1c] sm:$0xf]  ;;  %v7082_v42 = vld [vmem:[%s9615_s1 + $0x210] sm:$0xff]  }
  0x5e   : > { %6753 = vmatprep.mubr.bf16.mxu1 %v7671_v27  ;;  %v913_v1 = vrot.slane %v911_v57, 5  ;;  %v917_v2 = vrot.slane %v915_v59, 4  ;;  %v923_v11 = vrot.slane %v921_v63, 5  ;;  %v7181_v45 = vld [vmem:[%s7349_s27 + $0x30] sm:$0xf] }
  0x5f   : > { %1271 = vmatmul.mubr.bf16.gmra.mxu0 %v7495_v18  ;;  %v891_v18 = vshrl.u32 %v7651_v6, 16  ;;  %v908_v28 = vor.u32 %v907_v56, %v904_v55  ;;  %v890_v4 = vsel %vm7380_vm2, %v885_v60, %v889_v38  ;;  %v5438_v54 = vcombine.low %v7181_v45, %v7405_v30  ;;  %v7182_v47 = vld [vmem:[%s7349_s27 + $0x3c] sm:$0xf]  ;;  %v7754_v49 = vld [vmem:[%s7349_s27 + $0x40] sm:$0xf]  ;;  %v7091_v15 = vld [vmem:[%s9615_s1 + $0x1d0] sm:$0xff]  }
  0x60   : > { %1278 = vmatprep.mubr.bf16.mxu0 %v7535_v3  ;;  %v918_v10 = vor.u32 %v917_v2, %v913_v1  ;;  %v5439_v30 = vcombine.low %v7182_v47, %v7754_v49  ;;  %v7771_v56 = vld [vmem:[%s7349_s27 + $0x58] sm:$0xf]  ;;  %v7188_v59 = vld [vmem:[%s7349_s27 + $0x60] sm:$0xf]  ;;  %v7196_v45 = vld [vmem:[%s7349_s27 + $0x8] sm:$0x1] }
  0x61   : > { %v893_v40 = vrot.slane %v891_v18, 4  ;;  %v909_v46 = vrot.slane %v908_v28, 4  ;;  %v7708_v18 = vld [vmem:[%s7349_s27 + $0x4] sm:$0xf]  ;;  %v7074_v60 = vld [vmem:[%s9615_s1 + $0x1b8] sm:$0xff]   ;;  %v7080_v28 = vld [vmem:[%s9615_s1 + $0x1e8] sm:$0xff]  }
  0x62   : > { %v919_v8 = vrot.slane %v918_v10, 4  ;;  %v5434_v29 = vcombine.low %v7175_v24, %v7708_v18  ;;  %v7084_v2 = vld [vmem:[%s9615_s1 + $0x1e0] sm:$0xff]   ;;  %v7087_v10 = vld [vmem:[%s9615_s1 + $0x1d8] sm:$0xff]   ;;  %v5446_v24 = vcombine.low %v7553_v25, %v7561_v32  ;;  %v5447_v32 = vcombine.low %v7578_v44, %v7586_v50 }
  0x63   : > { %v894_v51 = vor.u32 %v893_v40, %v889_v38  ;;  %v7179_v38 = vld [vmem:[%s7349_s27 + $0x24] sm:$0xf]  ;;  %v7730_v40 = vld [vmem:[%s7349_s27 + $0x28] sm:$0xf]  ;;  %v5450_v44 = vcombine.low %v7648_v0, %v7651_v6  ;;  %v1978_v6 = vld [vmem:[%s7349_s27] sm:$0xe] }
  0x64   : > { %v924_v14 = vsel %vm7380_vm2, %v919_v8, %v923_v11  ;;  %v5437_v41 = vcombine.low %v7179_v38, %v7730_v40  ;;  %v7193_v11 = vld [vmem:[%s7349_s27 + $0x84] sm:$0xf]  ;;  %v5449_v38 = vcombine.low %v7617_v23, %v7625_v21  ;;  %v2033_v23 = vrot.slane %v7708_v18, 5 }
  0x65   : > { %6754 = vmatmul.mubr.bf16.gmra.mxu1 %v7681_v9  ;;  %v895_v62 = vrot.slane %v894_v51, 4  ;;  %v7184_v51 = vld [vmem:[%s7349_s27 + $0x48] sm:$0xf]  ;;  %v7100_v25 = vld [vmem:[%s9615_s1 + $0x180] sm:$0xff]   ;;  %v5566_v47 = vrot.slane %v1978_v6, 9 }
  0x66   : > { %v2035_v18 = vrot.slane %v2033_v23, 4 }
  0x67   : > { %1279 = vmatmul.mubr.bf16.gmra.mxu0 %v7512_v36  ;;  %v900_v5 = vsel %vm7380_vm2, %v895_v62, %v899_v53  ;;  %v914_v36 = vsel %vm7380_vm2, %v909_v46, %v913_v1  ;;  %v7764_v53 = vld [vmem:[%s7349_s27 + $0x4c] sm:$0xf]  ;;  %v7085_v46 = vld [vmem:[%s9615_s1 + $0x1a0] sm:$0xff]  }
  0x68   : > { %1286 = vmatprep.mubr.bf16.mxu0 %v7563_v33  ;;  %v7692_v7 = vcombine.low %v890_v4, %v900_v5  ;;  %v5469_v22 = vcombine.low %v914_v36, %v924_v14  ;;  %v5440_v55 = vcombine.low %v7184_v51, %v7764_v53  ;;  %v7189_v62 = vld [vmem:[%s7349_s27 + $0x6c] sm:$0xf]  ;;  %v7191_v4 = vld [vmem:[%s7349_s27 + $0x78] sm:$0xf]  ;;  %v7805_v5 = vld [vmem:[%s7349_s27 + $0x7c] sm:$0xf] }
  0x69   : > { %v7081_v1 = vld [vmem:[%s9615_s1 + $0x1a8] sm:$0xff]   ;;  %v7088_v14 = vld [vmem:[%s9615_s1 + $0x198] sm:$0xff]   ;;  %v7197_v51 = vld [vmem:[%s7349_s27 + $0x20] sm:$0x1] }
  0x6a   : > { %6757 = vmatprep.mubr.bf16.mxu1 %v7692_v7  ;;  %v7816_v36 = vld [vmem:[%s7349_s27 + $0x88] sm:$0xf] }
  0x6b   : > { %v5445_v8 = vcombine.low %v7193_v11, %v7816_v36 }
  0x6d   : > { %6758 = vmatmul.mubr.bf16.gmra.mxu1 %v5469_v22  ;;  %v7094_v22 = vld [vmem:[%s9615_s1 + $0x1c8] sm:$0xff]  }
  0x6e   : > { %1688 = vmatprep.mubr.bf16.mxu1 %v5435_v20 }
  0x6f   : > { %1287 = vmatmul.mubr.bf16.gmra.mxu0 %v7535_v3  ;;  %v7719_v3 = vcombine.low %v7177_v34, %v7716_v35  ;;  %v5448_v34 = vcombine.low %v7608_v12, %v7613_v16  ;;  %v7195_v16 = vld [vmem:[%s7349_s27 + $0x14] sm:$0x1] }
  0x70   : > { %1294 = vmatprep.mubr.bf16.mxu0 %v7591_v52 }
  0x75   : > { %1689 = vmatmul.mubr.bf16.vlgmr.msra.gmra.mxu1 %v5434_v29  ;;  %v7095_v29 = vld [vmem:[%s9615_s1 + $0x188] sm:$0xff]  }
  0x76   : > { %6810 = vmatpush3.bf16.msra.mxu1 %v7573_v39  ;;  %1696 = vmatprep.mubr.bf16.mxu1 %v7719_v3  ;;  %v7075_v39 = vld [vmem:[%s9615_s1 + $0x218] sm:$0xff]  }
  0x77   : > { %1295 = vmatmul.mubr.bf16.gmra.mxu0 %v7563_v33  ;;  %6811 = vmatprep.subr.bf16.mxu1 %v7062_v31  ;;  %v7070_v33 = vld [vmem:[%s9615_s1 + $0x220] sm:$0xff]  }
  0x78   : > { %1302 = vmatprep.mubr.bf16.mxu0 %v7610_v13 }
  0x7a   : > { %6812 = vmatpush3.bf16.msra.mxu1 %v7062_v31  ;;  %v7099_v31 = vld [vmem:[%s9615_s1 + $0x1c0] sm:$0xff]  }
  0x7b   : > { %6813 = vmatprep.subr.bf16.mxu1 %v7066_v37 }
  0x7d   : > { %1697 = vmatmul.mubr.bf16.gmra.mxu1 %v5435_v20  ;;  %v7092_v20 = vld [vmem:[%s9615_s1 + $0x190] sm:$0xff]  }
  0x7e   : > { %1704 = vmatprep.mubr.bf16.mxu1 %v5437_v41  ;;  %6814 = vmatpush3.bf16.msra.mxu1 %v7066_v37  ;;  %v1979_v37 = vld [vmem:[%s7349_s27 + $0xc] sm:$0xe] }
  0x7f   : > { %1303 = vmatmul.mubr.bf16.gmra.mxu0 %v7591_v52  ;;  %6815 = vmatprep.subr.bf16.mxu1 %v7070_v33  ;;  %v7089_v52 = vld [vmem:[%s9615_s1 + $0x208] sm:$0xff]   ;;  %v5567_v50 = vrot.slane %v1979_v37, 9 }
  0x80   : > { %1310 = vmatprep.mubr.bf16.mxu0 %v7633_v43 }
  0x82   : > { %6816 = vmatpush3.bf16.msra.mxu1 %v7070_v33  ;;  %v7109_v33 = vld [vmem:[%s9616_s2 + $0x120] sm:$0xff]  }
  0x83   : > { %6817 = vmatprep.subr.bf16.mxu1 %v7075_v39 }
  0x85   : > { %1705 = vmatmul.mubr.bf16.gmra.mxu1 %v7719_v3 }
  0x86   : > { %1712 = vmatprep.mubr.bf16.mxu1 %v5438_v54  ;;  %6818 = vmatpush3.bf16.msra.mxu1 %v7075_v39  ;;  %v5451_v39 = vcombine.low %v7661_v19, %v7669_v26  ;;  %v2034_v19 = vsel %vm7853_vm5, %v5566_v47, %v2033_v23  ;;  %v2082_v47 = vrot.slane %v7771_v56, 5 }
  0x87   : > { %1311 = vmatmul.mubr.bf16.gmra.mxu0 %v7610_v13  ;;  %6819 = vmatprep.subr.bf16.mxu1 %v7082_v42  ;;  %v7096_v13 = vld [vmem:[%s9615_s1 + $0x200] sm:$0xff]  }
  0x88   : > { %1318 = vmatprep.mubr.bf16.mxu0 %v7645_v61 }
  0x8a   : > { %6820 = vmatpush3.bf16.msra.mxu1 %v7082_v42  ;;  %v1980_v42 = vld [vmem:[%s7349_s27 + $0x18] sm:$0xe] }
  0x8b   : > { %6821 = vmatprep.subr.bf16.mxu1 %v7089_v52 }
  0x8d   : > { %1713 = vmatmul.mubr.bf16.gmra.mxu1 %v5437_v41 }
  0x8e   : > { %1720 = vmatprep.mubr.bf16.mxu1 %v5439_v30  ;;  %6822 = vmatpush3.bf16.msra.mxu1 %v7089_v52 }
  0x8f   : > { %1319 = vmatmul.mubr.bf16.gmra.mxu0 %v7633_v43  ;;  %6823 = vmatprep.subr.bf16.mxu1 %v7096_v13  ;;  %v7186_v43 = vld [vmem:[%s7349_s27 + $0x54] sm:$0xf] }
  0x90   : > { %1326 = vmatprep.mubr.bf16.mxu0 %v7671_v27  ;;  %v5441_v57 = vcombine.low %v7186_v43, %v7771_v56 }
  0x92   : > { %6824 = vmatpush3.bf16.msra.mxu1 %v7096_v13 }
  0x95   : > { %1721 = vmatmul.mubr.bf16.gmra.mxu1 %v5438_v54 }
  0x96   : > { %1728 = vmatprep.mubr.bf16.mxu1 %v5440_v55 }
  0x97   : > { %1327 = vmatmul.mubr.bf16.gmra.mxu0 %v7645_v61  ;;  %v5442_v61 = vcombine.low %v7188_v59, %v7474_v58  ;;  %v7077_v58 = vld [vmem:[%s9615_s1 + $0x1f0] sm:$0xff]   ;;  %v1981_v59 = vld [vmem:[%s7349_s27 + $0x24] sm:$0xe] }
  0x98   : > { %1334 = vmatprep.mubr.bf16.mxu0 %v7681_v9 }
  0x9d   : > { %1729 = vmatmul.mubr.bf16.gmra.mxu1 %v5439_v30 }
  0x9e   : > { %1736 = vmatprep.mubr.bf16.mxu1 %v5441_v57 }
  0x9f   : > { %1335 = vmatmul.mubr.bf16.gmra.mxu0 %v7671_v27  ;;  %v7785_v27 = vld [vmem:[%s7349_s27 + $0x70] sm:$0xf] }
  0xa0   : > { %1342 = vmatprep.mubr.bf16.mxu0 %v7692_v7  ;;  %v5443_v63 = vcombine.low %v7189_v62, %v7785_v27  ;;  %v5444_v7 = vcombine.low %v7191_v4, %v7805_v5 }
  0xa5   : > { %1737 = vmatmul.mubr.bf16.gmra.mxu1 %v5440_v55 }
  0xa6   : > { %1744 = vmatprep.mubr.bf16.mxu1 %v5442_v61 }
  0xa7   : > { %1343 = vmatmul.mubr.bf16.gmra.mxu0 %v7681_v9  ;;  %v7078_v9 = vld [vmem:[%s9615_s1 + $0x1b0] sm:$0xff]  }
  0xa8   : > { %6777 = vmatprep.mubr.bf16.mxu0 %v7719_v3  ;;  %v2040_v3 = vrot.slane %v7701_v17, 5  ;;  %v2047_v17 = vrot.slane %v7716_v35, 5  ;;  %v2054_v35 = vrot.slane %v7730_v40, 5 }
  0xaa   : > { %v2042_v12 = vrot.slane %v2040_v3, 4  ;;  %v2041_v21 = vsel %vm7853_vm5, %v5567_v50, %v2040_v3  ;;  %v2049_v13 = vrot.slane %v2047_v17, 4  ;;  %v7201_v50 = vld [vmem:[%s7349_s27 + $0x44] sm:$0x1] }
  0xad   : > { %1745 = vmatmul.mubr.bf16.gmra.mxu1 %v5441_v57 }
  0xae   : > { %1752 = vmatprep.mubr.bf16.mxu1 %v5443_v63 }
  0xaf   : > { %6778 = vmatmul.mubr.bf16.vlgmr.msra.gmra.mxu0 %v5437_v41  ;;  %v2043_v41 = vrot.slane %v7195_v16, 5 }
  0xb0   : > { %6170 = vmatpush3.bf16.msra.mxu0 %v7074_v60  ;;  %6781 = vmatprep.mubr.bf16.mxu0 %v5438_v54  ;;  %v2036_v54 = vrot.slane %v7196_v45, 5 }
  0xb1   : > { %6171 = vmatprep.subr.bf16.mxu0 %v7077_v58  ;;  %v2044_v0 = vsel %vm7853_vm5, %v2042_v12, %v2043_v41  ;;  %v7199_v58 = vld [vmem:[%s7349_s27 + $0x2c] sm:$0x1]  ;;  %v2071_v12 = vrot.slane %v7201_v50, 5 }
  0xb2   : > { %v5585_v52 = vcombine.low %v2041_v21, %v2044_v0  ;;  %v2037_v26 = vsel %vm7853_vm5, %v2035_v18, %v2036_v54  ;;  %v7202_v0 = vld [vmem:[%s7349_s27 + $0x50] sm:$0x1] }
  0xb3   : > { %v5584_v62 = vcombine.low %v2034_v19, %v2037_v26  ;;  %v2078_v6 = vrot.slane %v7202_v0, 5 }
  0xb4   : > { %6172 = vmatpush3.bf16.msra.mxu0 %v7078_v9  ;;  %v2057_v9 = vrot.slane %v7199_v58, 5  ;;  %v7204_v58 = vld [vmem:[%s7349_s27 + $0x5c] sm:$0x1] }
  0xb5   : > { %6173 = vmatprep.subr.bf16.mxu0 %v7080_v28  ;;  %1753 = vmatmul.mubr.bf16.gmra.mxu1 %v5442_v61 }
  0xb6   : > { %1760 = vmatprep.mubr.bf16.mxu1 %v5444_v7 }
  0xb7   : > { %6782 = vmatmul.mubr.bf16.gmra.mxu0 %v5439_v30  ;;  %v5568_v30 = vrot.slane %v1980_v42, 9 }
  0xb8   : > { %6785 = vmatprep.mubr.bf16.mxu0 %v5440_v55  ;;  %6174 = vmatpush3.bf16.msra.mxu0 %v7081_v1  ;;  %v2050_v55 = vrot.slane %v7197_v51, 5  ;;  %v5569_v1 = vrot.slane %v1981_v59, 9  ;;  %v1985_v51 = vld [vmem:[%s7349_s27 + $0x54] sm:$0xe] }
  0xb9   : > { %6175 = vmatprep.subr.bf16.mxu0 %v7084_v2  ;;  %v2048_v43 = vsel %vm7853_vm5, %v5568_v30, %v2047_v17  ;;  %v2056_v2 = vrot.slane %v2054_v35, 4 }
  0xba   : > { %v2055_v11 = vsel %vm7853_vm5, %v5569_v1, %v2054_v35 }
  0xbc   : > { %6176 = vmatpush3.bf16.msra.mxu0 %v7085_v46 }
  0xbd   : > { %6177 = vmatprep.subr.bf16.mxu0 %v7087_v10  ;;  %1761 = vmatmul.mubr.bf16.gmra.mxu1 %v5443_v63 }
  0xbe   : > { %1768 = vmatprep.mubr.bf16.mxu1 %v5445_v8 }
  0xbf   : > { %6786 = vmatmul.mubr.bf16.gmra.mxu0 %v5441_v57  ;;  %v2051_v57 = vsel %vm7853_vm5, %v2049_v13, %v2050_v55  ;;  %v7203_v55 = vld [vmem:[%s7349_s27 + $0x64] sm:$0xf] }
  0xc0   : > { %6789 = vmatprep.mubr.bf16.mxu0 %v5442_v61  ;;  %6178 = vmatpush3.bf16.msra.mxu0 %v7088_v14  ;;  %v7198_v61 = vld [vmem:[%s7349_s27 + $0x34] sm:$0xf]  ;;  %v7882_v28 = vcombine.low %v2048_v43, %v2051_v57  ;;  %v2089_v19 = vrot.slane %v7203_v55, 5  ;;  %v1986_v43 = vld [vmem:[%s7349_s27 + $0x60] sm:$0xe] }
  0xc1   : > { %6179 = vmatprep.subr.bf16.mxu0 %v7091_v15  ;;  %v2061_v60 = vrot.slane %v7198_v61, 5  ;;  %v2068_v15 = vrot.slane %v7754_v49, 5 }
  0xc3   : > { %v2063_v40 = vrot.slane %v2061_v60, 4 }
  0xc4   : > { %6180 = vmatpush3.bf16.msra.mxu0 %v7092_v20 }
  0xc5   : > { %6181 = vmatprep.subr.bf16.mxu0 %v7094_v22  ;;  %1769 = vmatmul.mubr.bf16.gmra.mxu1 %v5444_v7 }
  0xc6   : > { %1776 = vmatprep.mubr.bf16.mxu1 %v5446_v24 }
  0xc7   : > { %6790 = vmatmul.mubr.bf16.gmra.mxu0 %v5443_v63  ;;  %v1982_v63 = vld [vmem:[%s7349_s27 + $0x30] sm:$0xe] }
  0xc8   : > { %6793 = vmatprep.mubr.bf16.mxu0 %v5444_v7  ;;  %6182 = vmatpush3.bf16.msra.mxu0 %v7095_v29  ;;  %v5570_v4 = vrot.slane %v1982_v63, 9  ;;  %v7200_v7 = vld [vmem:[%s7349_s27 + $0x38] sm:$0x1]  ;;  %v1983_v29 = vld [vmem:[%s7349_s27 + $0x3c] sm:$0xe]  ;;  %v2084_v63 = vrot.slane %v2082_v47, 4 }
  0xc9   : > { %6183 = vmatprep.subr.bf16.mxu0 %v7099_v31  ;;  %v2064_v46 = vrot.slane %v7200_v7, 5  ;;  %v2075_v31 = vrot.slane %v7764_v53, 5  ;;  %v5571_v49 = vrot.slane %v1983_v29, 9  ;;  %v7205_v7 = vld [vmem:[%s7349_s27 + $0x68] sm:$0x1] }
  0xca   : > { %v2062_v22 = vsel %vm7853_vm5, %v5570_v4, %v2061_v60  ;;  %v5574_v4 = vrot.slane %v1986_v43, 9  ;;  %v7208_v43 = vld [vmem:[%s7349_s27 + $0x94] sm:$0xf] }
  0xcb   : > { %v2077_v21 = vrot.slane %v2075_v31, 4  ;;  %v2069_v45 = vsel %vm7853_vm5, %v5571_v49, %v2068_v15 }
  0xcc   : > { %6184 = vmatpush3.bf16.msra.mxu0 %v7100_v25  ;;  %v2090_v29 = vsel %vm7853_vm5, %v5574_v4, %v2089_v19 }
  0xcd   : > { %1777 = vmatmul.mubr.bf16.gmra.mxu1 %v5445_v8  ;;  %v2079_v13 = vsel %vm7853_vm5, %v2077_v21, %v2078_v6 }
  0xce   : > { %1784 = vmatprep.mubr.bf16.mxu1 %v5447_v32 }
  0xcf   : > { %6794 = vmatmul.mubr.bf16.gmra.mxu0 %v5445_v8  ;;  %v2058_v8 = vsel %vm7853_vm5, %v2056_v2, %v2057_v9  ;;  %v2085_v9 = vrot.slane %v7204_v58, 5 }
  0xd0   : > { %6797 = vmatprep.mubr.bf16.mxu0 %v5446_v24  ;;  %v7899_v3 = vcombine.low %v2055_v11, %v2058_v8 }
  0xd5   : > { %1785 = vmatmul.mubr.bf16.gmra.mxu1 %v5446_v24  ;;  %v2065_v24 = vsel %vm7853_vm5, %v2063_v40, %v2064_v46  ;;  %v2091_v40 = vrot.slane %v2089_v19, 4  ;;  %v2092_v46 = vrot.slane %v7205_v7, 5 }
  0xd6   : > { %1792 = vmatprep.mubr.bf16.mxu1 %v5448_v34 }
  0xd7   : > { %6798 = vmatmul.mubr.bf16.gmra.mxu0 %v5447_v32 }
  0xd8   : > { %6801 = vmatprep.mubr.bf16.mxu0 %v5448_v34 }
  0xdd   : > { %1793 = vmatmul.mubr.bf16.gmra.mxu1 %v5447_v32  ;;  %v1984_v32 = vld [vmem:[%s7349_s27 + $0x48] sm:$0xe] }
  0xde   : > { %1800 = vmatprep.mubr.bf16.mxu1 %v5449_v38  ;;  %v5572_v23 = vrot.slane %v1984_v32, 9  ;;  %v2103_v32 = vrot.slane %v7805_v5, 5 }
  0xdf   : > { %6802 = vmatmul.mubr.bf16.gmra.mxu0 %v5449_v38 }
  0xe0   : > { %6805 = vmatprep.mubr.bf16.mxu0 %v5450_v44  ;;  %v2105_v5 = vrot.slane %v2103_v32, 4 }
  0xe5   : > { %1801 = vmatmul.mubr.bf16.gmra.mxu1 %v5448_v34 }
  0xe6   : > { %1808 = vmatprep.mubr.bf16.mxu1 %v5450_v44  ;;  %v2070_v44 = vrot.slane %v2068_v15, 4 }
  0xe7   : > { %6806 = vmatmul.mubr.bf16.gmra.mxu0 %v5451_v39 }
  0xe8   : > { %2458 = vmatprep.mubr.bf16.mxu0 %v5585_v52  ;;  %v2072_v54 = vsel %vm7853_vm5, %v2070_v44, %v2071_v12 }
  0xe9   : > { %v7928_v59 = vcombine.low %v2069_v45, %v2072_v54 }
  0xed   : > { %1809 = vmatmul.mubr.bf16.gmra.mxu1 %v5449_v38  ;;  %v7901_v38 = vcombine.low %v2062_v22, %v2065_v24 }
  0xee   : > { %6825 = vmatprep.mubr.bf16.mxu1 %v7882_v28 }
  0xef   : > { %v5913_v10 = vpop.f32.mrf.mxu0  ;;  %2459 = vmatmul.mubr.bf16.vlgmr.msra.gmra.mxu0 %v5584_v62  ;;  %v5573_v62 = vrot.slane %v1985_v51, 9 }
  0xf0   : > { %2466 = vmatprep.mubr.bf16.mxu0 %v7882_v28 }
  0xf1   : > { %v5914_v14 = vpop.f32.mrf.mxu0  ;;  %v2083_v15 = vsel %vm7853_vm5, %v5573_v62, %v2082_v47 }
  0xf2   : > { %v5915_v20 = vadd.f32 %v5914_v14, %v5913_v10 }
  0xf3   : > { %v5916_v25 = vpop.f32.mrf.mxu0 }
  0xf5   : > { %v6731_v34 = vpop.f32.mrf.mxu1  ;;  %v5917_v37 = vpop.f32.mrf.mxu0  ;;  %6826 = vmatmul.mubr.bf16.vlgmr.msra.gmra.mxu1 %v7899_v3 }
  0xf6   : > { %v5918_v41 = vadd.f32 %v5917_v37, %v5916_v25  ;;  %6829 = vmatprep.mubr.bf16.mxu1 %v7901_v38  ;;  %v1987_v25 = vld [vmem:[%s7349_s27 + $0x6c] sm:$0xe]  ;;  %v1988_v37 = vld [vmem:[%s7349_s27 + $0x78] sm:$0xe] }
  0xf7   : > { %v1385_v16 = vpop.f32.mrf.mxu1  ;;  %v5919_v17 = vpop.f32.mrf.mxu0  ;;  %2467 = vmatmul.mubr.bf16.gmra.mxu0 %v5585_v52  ;;  %v2076_v52 = vsel %vm7853_vm5, %v5572_v23, %v2075_v31  ;;  %v2093_v31 = vsel %vm7853_vm5, %v2091_v40, %v2092_v46  ;;  %v7206_v23 = vld [vmem:[%s7349_s27 + $0x74] sm:$0x1] }
  0xf8   : > { %v7905_v53 = vadd.f32 %v5915_v20, %v1385_v16  ;;  %2474 = vmatprep.mubr.bf16.mxu0 %v7899_v3  ;;  %v7930_v60 = vcombine.low %v2076_v52, %v2079_v13  ;;  %v2086_v20 = vsel %vm7853_vm5, %v2084_v63, %v2085_v9  ;;  %v7960_v12 = vcombine.low %v2090_v29, %v2093_v31  ;;  %v1990_v63 = vld [vmem:[%s7349_s27 + $0x90] sm:$0xe] }
  0xf9   : > { %v6732_v39 = vpop.f32.mrf.mxu1  ;;  %v5920_v42 = vpop.f32.mrf.mxu0  ;;  %v5575_v16 = vrot.slane %v1987_v25, 9  ;;  %v2099_v21 = vrot.slane %v7206_v23, 5  ;;  %v7211_v25 = vld [vmem:[%s7349_s27 + $0xa0] sm:$0xf] }
  0xfa   : > { %v5921_v30 = vadd.f32 %v5920_v42, %v5919_v17  ;;  %v5576_v17 = vrot.slane %v1988_v37, 9 }
  0xfb   : > { %v1388_v18 = vpop.f32.mrf.mxu1  ;;  %v5922_v35 = vpop.f32.mrf.mxu0 }
  0xfc   : > { %v7921_v26 = vadd.f32 %v5918_v41, %v1388_v18  ;;  %v7926_v56 = vadd.f32 %v6731_v34, %v5921_v30  ;;  %v2104_v55 = vsel %vm7853_vm5, %v5576_v17, %v2103_v32  ;;  %v2124_v32 = vrot.slane %v7211_v25, 5  ;;  %v1994_v25 = vld [vmem:[%s7349_s27 + $0xc0] sm:$0xe] }
  0xfd   : > { %v7924_v57 = vpop.f32.mrf.mxu1  ;;  %v5923_v61 = vpop.f32.mrf.mxu0  ;;  %6830 = vmatmul.mubr.bf16.gmra.mxu1 %v7928_v59 }
  0xfe   : > { %v5924_v2 = vadd.f32 %v5923_v61, %v5922_v35  ;;  %6833 = vmatprep.mubr.bf16.mxu1 %v7930_v60  ;;  %v1989_v35 = vld [vmem:[%s7349_s27 + $0x84] sm:$0xe]  ;;  %v2117_v61 = vrot.slane %v7208_v43, 5  ;;  %v7214_v43 = vld [vmem:[%s7349_s27 + $0xb0] sm:$0x1] }
  0xff   : > { %v1401_v1 = vpop.f32.mrf.mxu1  ;;  %v5925_v10 = vpop.f32.mrf.mxu0  ;;  %2475 = vmatmul.mubr.bf16.gmra.mxu0 %v7882_v28  ;;  %v2096_v28 = vrot.slane %v7785_v27, 5  ;;  %v7958_v27 = vcombine.low %v2083_v15, %v2086_v20  ;;  %v5577_v40 = vrot.slane %v1989_v35, 9  ;;  %v7210_v20 = vld [vmem:[%s7349_s27 + $0x98] sm:$0x1] }
 0x100   : > { %v7938_v8 = vadd.f32 %v6732_v39, %v5924_v2  ;;  %2482 = vmatprep.mubr.bf16.mxu0 %v7901_v38  ;;  %v7207_v39 = vld [vmem:[%s7349_s27 + $0x80] sm:$0x1]  ;;  %v2119_v15 = vrot.slane %v2117_v61, 4 }
 0x101   : > { %v7935_v11 = vpop.f32.mrf.mxu1  ;;  %v5926_v14 = vpop.f32.mrf.mxu0  ;;  %v2098_v41 = vrot.slane %v2096_v28, 4  ;;  %v2106_v42 = vrot.slane %v7207_v39, 5  ;;  %v2097_v30 = vsel %vm7853_vm5, %v5575_v16, %v2096_v28  ;;  %v2120_v28 = vrot.slane %v7210_v20, 5  ;;  %v1991_v16 = vld [vmem:[%s7349_s27 + $0x9c] sm:$0xe] }
 0x102   : > { %v5927_v24 = vadd.f32 %v5926_v14, %v5925_v10  ;;  %v5578_v14 = vrot.slane %v1990_v63, 9  ;;  %v7102_v63 = vld [vmem:[%s9616_s2 + $0xf8] sm:$0xff]  }
 0x103   : > { %v1404_v22 = vpop.f32.mrf.mxu1  ;;  %v5928_v34 = vpop.f32.mrf.mxu0  ;;  %v2100_v52 = vsel %vm7853_vm5, %v2098_v41, %v2099_v21  ;;  %v2107_v19 = vsel %vm7853_vm5, %v2105_v5, %v2106_v42  ;;  %v7212_v41 = vld [vmem:[%s7349_s27 + $0xac] sm:$0xf]  ;;  %v7213_v42 = vld [vmem:[%s7349_s27 + $0xa4] sm:$0x1] }
 0x104   : > { %v7956_v44 = vadd.f32 %v5927_v24, %v1401_v1  ;;  %v7989_v9 = vcombine.low %v2097_v30, %v2100_v52  ;;  %v7992_v4 = vcombine.low %v2104_v55, %v2107_v19  ;;  %v2118_v37 = vsel %vm7853_vm5, %v5578_v14, %v2117_v61 }
 0x105   : > { %v7954_v49 = vpop.f32.mrf.mxu1  ;;  %v5929_v50 = vpop.f32.mrf.mxu0  ;;  %6834 = vmatmul.mubr.bf16.gmra.mxu1 %v7958_v27  ;;  %v2131_v23 = vrot.slane %v7212_v41, 5  ;;  %v5579_v52 = vrot.slane %v1991_v16, 9  ;;  %v2134_v61 = vrot.slane %v7214_v43, 5 }
 0x106   : > { %v5930_v6 = vadd.f32 %v5929_v50, %v5928_v34  ;;  %6837 = vmatprep.mubr.bf16.mxu1 %v7960_v12  ;;  %v2121_v50 = vsel %vm7853_vm5, %v2119_v15, %v2120_v28 }
 0x107   : > { %v1417_v0 = vpop.f32.mrf.mxu1  ;;  %v5931_v45 = vpop.f32.mrf.mxu0  ;;  %2483 = vmatmul.mubr.bf16.gmra.mxu0 %v7899_v3  ;;  %v2110_v3 = vrot.slane %v7816_v36, 5  ;;  %v7209_v36 = vld [vmem:[%s7349_s27 + $0x8c] sm:$0x1]  ;;  %v8027_v30 = vcombine.low %v2118_v37, %v2121_v50  ;;  %v2133_v35 = vrot.slane %v2131_v23, 4  ;;  %v7217_v50 = vld [vmem:[%s7349_s27 + $0xbc] sm:$0x1] }
 0x108   : > { %v7967_v47 = vadd.f32 %v5930_v6, %v1404_v22  ;;  %2490 = vmatprep.mubr.bf16.mxu0 %v7928_v59  ;;  %v2113_v1 = vrot.slane %v7209_v36, 5  ;;  %v1992_v6 = vld [vmem:[%s7349_s27 + $0xa8] sm:$0xe]  ;;  %v2141_v16 = vrot.slane %v7217_v50, 5 }
 0x109   : > { %v7965_v54 = vpop.f32.mrf.mxu1  ;;  %v5932_v18 = vpop.f32.mrf.mxu0  ;;  %v2112_v7 = vrot.slane %v2110_v3, 4  ;;  %v2111_v31 = vsel %vm7853_vm5, %v5577_v40, %v2110_v3  ;;  %v2126_v3 = vrot.slane %v2124_v32, 4  ;;  %v5580_v19 = vrot.slane %v1992_v6, 9 }
 0x10a   : > { %v5933_v51 = vadd.f32 %v5932_v18, %v5931_v45  ;;  %v2127_v45 = vrot.slane %v7213_v42, 5  ;;  %v2125_v40 = vsel %vm7853_vm5, %v5579_v52, %v2124_v32  ;;  %v2135_v28 = vsel %vm7853_vm5, %v2133_v35, %v2134_v61  ;;  %v7105_v35 = vld [vmem:[%s9616_s2 + $0xf0] sm:$0xff]  }
 0x10b   : > { %v7977_v13 = vpop.f32.mrf.mxu1  ;;  %v5934_v62 = vpop.f32.mrf.mxu0  ;;  %v2132_v20 = vsel %vm7853_vm5, %v5580_v19, %v2131_v23 }
 0x10c   : > { %v7987_v58 = vadd.f32 %v7924_v57, %v5933_v51  ;;  %v8072_v23 = vcombine.low %v2132_v20, %v2135_v28 }
 0x10d   : > { %v5935_v2 = vpop.f32.mrf.mxu0  ;;  %v7994_v46 = vpop.f32.mrf.mxu1  ;;  %6838 = vmatmul.mubr.bf16.gmra.mxu1 %v7989_v9 }
 0x10e   : > { %v5936_v10 = vadd.f32 %v5935_v2, %v5934_v62  ;;  %6841 = vmatprep.mubr.bf16.mxu1 %v7992_v4 }
 0x10f   : > { %v5937_v22 = vpop.f32.mrf.mxu0  ;;  %2491 = vmatmul.mubr.bf16.gmra.mxu0 %v7901_v38  ;;  %v7998_v57 = vpop.f32.mrf.mxu1  ;;  %v2114_v38 = vsel %vm7853_vm5, %v2112_v7, %v2113_v1  ;;  %v7215_v7 = vld [vmem:[%s7349_s27 + $0xb8] sm:$0xf] }
 0x110   : > { %v8001_v24 = vadd.f32 %v7935_v11, %v5936_v10  ;;  %2498 = vmatprep.mubr.bf16.mxu0 %v7930_v60  ;;  %v8024_v39 = vcombine.low %v2111_v31, %v2114_v38  ;;  %v2138_v10 = vrot.slane %v7215_v7, 5  ;;  %v1995_v7 = vld [vmem:[%s7349_s27 + $0xcc] sm:$0xe] }
 0x111   : > { %v5938_v29 = vpop.f32.mrf.mxu0  ;;  %v8011_v34 = vpop.f32.mrf.mxu1  ;;  %v5583_v50 = vrot.slane %v1995_v7, 9 }
 0x112   : > { %v5939_v11 = vadd.f32 %v5938_v29, %v5937_v22  ;;  %v1993_v22 = vld [vmem:[%s7349_s27 + $0xb4] sm:$0xe]  ;;  %v7216_v29 = vld [vmem:[%s7349_s27 + $0xc4] sm:$0xf]  ;;  %v2140_v6 = vrot.slane %v2138_v10, 4 }
 0x113   : > { %v5940_v21 = vpop.f32.mrf.mxu0  ;;  %v8020_v17 = vpop.f32.mrf.mxu1  ;;  %v2147_v31 = vrot.slane %v7216_v29, 5 }
 0x114   : > { %v8022_v5 = vadd.f32 %v5939_v11, %v1417_v0  ;;  %v7101_v0 = vld [vmem:[%s9616_s2 + $0x138] sm:$0xff]  }
 0x115   : > { %v5941_v18 = vpop.f32.mrf.mxu0  ;;  %v8029_v51 = vpop.f32.mrf.mxu1  ;;  %6842 = vmatmul.mubr.bf16.gmra.mxu1 %v8024_v39  ;;  %6305 = vmatprep.subr.bf16.mxu1 %v7101_v0  ;;  %v2149_v52 = vrot.slane %v2147_v31, 4  ;;  %v2142_v0 = vsel %vm7853_vm5, %v2140_v6, %v2141_v16  ;;  %v7107_v6 = vld [vmem:[%s9616_s2 + $0xe8] sm:$0xff]  }
 0x116   : > { %v5942_v55 = vadd.f32 %v5941_v18, %v5940_v21  ;;  %6845 = vmatprep.mubr.bf16.mxu1 %v8027_v30  ;;  %6306 = vmatpush3.bf16.msra.mxu1 %v7102_v63  ;;  %v5581_v21 = vrot.slane %v1993_v22, 9  ;;  %v5582_v18 = vrot.slane %v1994_v25, 9  ;;  %v7219_v63 = vld [vmem:[%s7349_s27 + $0xd0] sm:$0xf]  ;;  %v7220_v22 = vld [vmem:[%s7349_s27 + $0xd4] sm:$0x1] }
 0x117   : > { %v5943_v62 = vpop.f32.mrf.mxu0  ;;  %2499 = vmatmul.mubr.bf16.gmra.mxu0 %v7928_v59  ;;  %v8039_v36 = vpop.f32.mrf.mxu1  ;;  %v7103_v59 = vld [vmem:[%s9616_s2 + $0x178] sm:$0xff]   ;;  %v2159_v29 = vrot.slane %v7220_v22, 5 }
 0x118   : > { %v8042_v1 = vadd.f32 %v5942_v55, %v7977_v13  ;;  %2506 = vmatprep.mubr.bf16.mxu0 %v7958_v27  ;;  %v2128_v13 = vsel %vm7853_vm5, %v2126_v3, %v2127_v45  ;;  %6857 = vmatprep.subr.bf16.mxu0 %v7103_v59  ;;  %v7218_v3 = vld [vmem:[%s7349_s27 + $0xc8] sm:$0x1] }
 0x119   : > { %v5944_v2 = vpop.f32.mrf.mxu0  ;;  %v8055_v14 = vpop.f32.mrf.mxu1  ;;  %6858 = vmatpush3.bf16.msra.mxu0 %v7103_v59  ;;  %v8069_v37 = vcombine.low %v2125_v40, %v2128_v13  ;;  %v2150_v55 = vrot.slane %v7218_v3, 5  ;;  %v2156_v59 = vrot.slane %v7219_v63, 5  ;;  %v2148_v40 = vsel %vm7853_vm5, %v5582_v18, %v2147_v31 }
 0x11a   : > { %v5945_v15 = vadd.f32 %v5944_v2, %v5943_v62 }
 0x11b   : > { %v5946_v38 = vpop.f32.mrf.mxu0  ;;  %v8064_v32 = vpop.f32.mrf.mxu1  ;;  %v2151_v13 = vsel %vm7853_vm5, %v2149_v52, %v2150_v55  ;;  %v2158_v31 = vrot.slane %v2156_v59, 4  ;;  %v2157_v3 = vsel %vm7853_vm5, %v5583_v50, %v2156_v59 }
 0x11c   : > { %v8067_v11 = vadd.f32 %v7954_v49, %v5945_v15  ;;  %v7104_v49 = vld [vmem:[%s9616_s2 + $0x130] sm:$0xff]   ;;  %v8112_v25 = vcombine.low %v2148_v40, %v2151_v13 }
 0x11d   : > { %v5947_v41 = vpop.f32.mrf.mxu0  ;;  %v8074_v42 = vpop.f32.mrf.mxu1  ;;  %6846 = vmatmul.mubr.bf16.gmra.mxu1 %v8069_v37  ;;  %6307 = vmatprep.subr.bf16.mxu1 %v7104_v49  ;;  %v2160_v55 = vsel %vm7853_vm5, %v2158_v31, %v2159_v29 }
 0x11e   : > { %v5948_v45 = vadd.f32 %v5947_v41, %v5946_v38  ;;  %6849 = vmatprep.mubr.bf16.mxu1 %v8072_v23  ;;  %6308 = vmatpush3.bf16.msra.mxu1 %v7105_v35 }
 0x11f   : > { %v5949_v19 = vpop.f32.mrf.mxu0  ;;  %2507 = vmatmul.mubr.bf16.gmra.mxu0 %v7930_v60  ;;  %v8084_v43 = vpop.f32.mrf.mxu1  ;;  %v2139_v60 = vsel %vm7853_vm5, %v5581_v21, %v2138_v10 }
 0x120   : > { %v8087_v61 = vadd.f32 %v7965_v54, %v5948_v45  ;;  %2514 = vmatprep.mubr.bf16.mxu0 %v7960_v12  ;;  %v8109_v28 = vcombine.low %v2139_v60, %v2142_v0  ;;  %v5601_v60 = vcombine.low %v2157_v3, %v2160_v55  ;;  %v7112_v3 = vld [vmem:[%s9616_s2 + $0xd8] sm:$0xff]  }
 0x121   : > { %v5950_v62 = vpop.f32.mrf.mxu0  ;;  %v8097_v2 = vpop.f32.mrf.mxu1 }
 0x122   : > { %v5951_v54 = vadd.f32 %v5950_v62, %v5949_v19 }
 0x123   : > { %v5952_v15 = vpop.f32.mrf.mxu0  ;;  %v8104_v20 = vpop.f32.mrf.mxu1 }
 0x124   : > { %v8107_v10 = vadd.f32 %v5951_v54, %v7998_v57  ;;  %v7106_v57 = vld [vmem:[%s9616_s2 + $0x128] sm:$0xff]   ;;  %v7110_v54 = vld [vmem:[%s9616_s2 + $0xe0] sm:$0xff]  }
 0x125   : > { %v5953_v38 = vpop.f32.mrf.mxu0  ;;  %v8114_v16 = vpop.f32.mrf.mxu1  ;;  %6850 = vmatmul.mubr.bf16.gmra.mxu1 %v8109_v28  ;;  %6309 = vmatprep.subr.bf16.mxu1 %v7106_v57 }
 0x126   : > { %v5954_v41 = vadd.f32 %v5953_v38, %v5952_v15  ;;  %6853 = vmatprep.mubr.bf16.mxu1 %v8112_v25  ;;  %6310 = vmatpush3.bf16.msra.mxu1 %v7107_v6 }
 0x127   : > { %v5955_v21 = vpop.f32.mrf.mxu0  ;;  %2515 = vmatmul.mubr.bf16.gmra.mxu0 %v7958_v27  ;;  %v8123_v45 = vpop.f32.mrf.mxu1  ;;  %v7108_v27 = vld [vmem:[%s9616_s2 + $0x170] sm:$0xff]   ;;  %6311 = vmatprep.subr.bf16.mxu1 %v7109_v33 }
 0x128   : > { %v8126_v18 = vadd.f32 %v5954_v41, %v8020_v17  ;;  %2522 = vmatprep.mubr.bf16.mxu0 %v7989_v9  ;;  %6859 = vmatprep.subr.bf16.mxu0 %v7108_v27 }
 0x129   : > { %v5956_v52 = vpop.f32.mrf.mxu0  ;;  %v8138_v17 = vpop.f32.mrf.mxu1  ;;  %6860 = vmatpush3.bf16.msra.mxu0 %v7108_v27 }
 0x12a   : > { %v5957_v19 = vadd.f32 %v5956_v52, %v5955_v21  ;;  %6312 = vmatpush3.bf16.msra.mxu1 %v7110_v54 }
 0x12b   : > { %v5958_v49 = vpop.f32.mrf.mxu0  ;;  %v8140_v35 = vpop.f32.mrf.mxu1 }
 0x12c   : > { %v8143_v62 = vadd.f32 %v7994_v46, %v5957_v19 }
 0x12d   : > { %v5959_v0 = vpop.f32.mrf.mxu0  ;;  %v8152_v40 = vpop.f32.mrf.mxu1  ;;  %6854 = vmatmul.mubr.bf16.gmra.mxu1 %v5601_v60 }
 0x12e   : > { %v5960_v63 = vadd.f32 %v5959_v0, %v5958_v49 }
 0x12f   : > { %v5961_v59 = vpop.f32.mrf.mxu0  ;;  %2523 = vmatmul.mubr.bf16.gmra.mxu0 %v7960_v12  ;;  %v8158_v7 = vpop.f32.mrf.mxu1 }
 0x130   : > { %v8155_v13 = vadd.f32 %v8011_v34, %v5960_v63  ;;  %2530 = vmatprep.mubr.bf16.mxu0 %v7992_v4 }
 0x131   : > { %v5962_v46 = vpop.f32.mrf.mxu0  ;;  %v8160_v22 = vpop.f32.mrf.mxu1 }
 0x132   : > { %v5963_v12 = vadd.f32 %v5962_v46, %v5961_v59 }
 0x133   : > { %v5964_v15 = vpop.f32.mrf.mxu0  ;;  %v8165_v50 = vpop.f32.mrf.mxu1 }
 0x134   : > { %v8163_v29 = vadd.f32 %v5963_v12, %v8039_v36  ;;  %v7111_v36 = vld [vmem:[%s9616_s2 + $0x118] sm:$0xff]  }
 0x135   : > { %v5965_v38 = vpop.f32.mrf.mxu0  ;;  %v6049_v41 = vpop.f32.mrf.mxu1  ;;  %6313 = vmatprep.subr.bf16.mxu1 %v7111_v36 }
 0x136   : > { %v8167_v34 = vadd.f32 %v5965_v38, %v5964_v15  ;;  %6314 = vmatpush3.bf16.msra.mxu1 %v7112_v3  ;;  %v7115_v15 = vld [vmem:[%s9616_s2 + $0xd0] sm:$0xff]  }
 0x137   : > { %v5967_v31 = vpop.f32.mrf.mxu0  ;;  %2531 = vmatmul.mubr.bf16.gmra.mxu0 %v7989_v9  ;;  %v6050_v57 = vpop.f32.mrf.mxu1  ;;  %v7113_v9 = vld [vmem:[%s9616_s2 + $0x168] sm:$0xff]  }
 0x138   : > { %2538 = vmatprep.mubr.bf16.mxu0 %v8024_v39  ;;  %v6051_v27 = vadd.f32 %v6050_v57, %v6049_v41  ;;  %6861 = vmatprep.subr.bf16.mxu0 %v7113_v9  ;;  %v7116_v57 = vld [vmem:[%s9616_s2 + $0x108] sm:$0xff]  }
 0x139   : > { %v5968_v21 = vpop.f32.mrf.mxu0  ;;  %v6052_v55 = vpop.f32.mrf.mxu1  ;;  %6862 = vmatpush3.bf16.msra.mxu0 %v7113_v9 }
 0x13a   : > { %v5969_v6 = vadd.f32 %v5968_v21, %v5967_v31  ;;  %v8184_v60 = vadd.f32 %v6051_v27, %v7905_v53  ;;  %v7114_v53 = vld [vmem:[%s9616_s2 + $0x110] sm:$0xff]   ;;  %v7117_v27 = vld [vmem:[%s9616_s2 + $0xc8] sm:$0xff]  }
 0x13b   : > { %v5970_v52 = vpop.f32.mrf.mxu0  ;;  %v6053_v0 = vpop.f32.mrf.mxu1  ;;  %6315 = vmatprep.subr.bf16.mxu1 %v7114_v53 }
 0x13c   : > { %v8181_v19 = vadd.f32 %v8029_v51, %v5969_v6  ;;  %v6054_v59 = vadd.f32 %v6053_v0, %v6052_v55  ;;  %6316 = vmatpush3.bf16.msra.mxu1 %v7115_v15  ;;  %v7118_v55 = vld [vmem:[%s9616_s2 + $0x160] sm:$0xff]  }
 0x13d   : > { %v5971_v49 = vpop.f32.mrf.mxu0  ;;  %v6055_v54 = vpop.f32.mrf.mxu1  ;;  %6317 = vmatprep.subr.bf16.mxu1 %v7116_v57  ;;  %6863 = vmatprep.subr.bf16.mxu0 %v7118_v55 }
 0x13e   : > { %v5972_v63 = vadd.f32 %v5971_v49, %v5970_v52  ;;  %v8195_v12 = vadd.f32 %v6054_v59, %v7921_v26  ;;  %v7230_v26 = vmov 0.0   ;;  %6864 = vmatpush3.bf16.msra.mxu0 %v7118_v55  ;;  %v7124_v55 = vld [vmem:[%s9616_s2 + $0x148] sm:$0xff]  }
 0x13f   : > { %v5973_v33 = vpop.f32.mrf.mxu0  ;;  %2539 = vmatmul.mubr.bf16.gmra.mxu0 %v7992_v4  ;;  %v6056_v38 = vpop.f32.mrf.mxu1  ;;  %2890 = vst [vmem:[#allocation2 + $0x7] sm:$0xff] %v7230_v26  ;;  %2891 = vst [vmem:[#allocation2 + $0xf] sm:$0xff] %v7230_v26 }
 0x140   : > { %v8188_v46 = vadd.f32 %v8055_v14, %v5972_v63  ;;  %2546 = vmatprep.mubr.bf16.mxu0 %v8027_v30  ;;  %v6057_v31 = vadd.f32 %v6056_v38, %v6055_v54  ;;  %2892 = vst [vmem:[#allocation2 + $0x17] sm:$0x3] %v7230_v26  ;;  %2894 = vst [vmem:[#allocation2 + $0x227] sm:$0xff] %v7230_v26  ;;  %6318 = vmatpush3.bf16.msra.mxu1 %v7117_v27 }
 0x141   : > { %v5974_v51 = vpop.f32.mrf.mxu0  ;;  %v6058_v41 = vpop.f32.mrf.mxu1  ;;  %2895 = vst [vmem:[#allocation2 + $0x22f] sm:$0xff] %v7230_v26  ;;  %2896 = vst [vmem:[#allocation2 + $0x237] sm:$0x3] %v7230_v26 }
 0x142   : > { %v5975_v4 = vadd.f32 %v5974_v51, %v5973_v33  ;;  %2898 = vst [vmem:[#allocation2 + $0x27] sm:$0x1] %v7230_v26  ;;  %2899 = vst [vmem:[#allocation2 + $0x47] sm:$0x1] %v7230_v26  ;;  %v8207_v6 = vadd.f32 %v6057_v31, %v7926_v56  ;;  %v7119_v56 = vld [vmem:[%s9616_s2 + $0x100] sm:$0xff]   ;;  %v7121_v51 = vld [vmem:[%s9616_s2 + $0x158] sm:$0xff]  }
 0x143   : > { %v5976_v14 = vpop.f32.mrf.mxu0  ;;  %2900 = vst [vmem:[#allocation2 + $0x67] sm:$0x1] %v7230_v26  ;;  %2901 = vst [vmem:[#allocation2 + $0x87] sm:$0x1] %v7230_v26  ;;  %v6059_v52 = vpop.f32.mrf.mxu1  ;;  %6319 = vmatprep.subr.bf16.mxu1 %v7119_v56  ;;  %6865 = vmatprep.subr.bf16.mxu0 %v7121_v51 }
 0x144   : > { %v8201_v21 = vadd.f32 %v5975_v4, %v8084_v43  ;;  %2902 = vst [vmem:[#allocation2 + $0xa7] sm:$0x1] %v7230_v26  ;;  %2903 = vst [vmem:[#allocation2 + $0xc7] sm:$0x1] %v7230_v26  ;;  %v6060_v3 = vadd.f32 %v6059_v52, %v6058_v41  ;;  %6866 = vmatpush3.bf16.msra.mxu0 %v7121_v51 }
 0x145   : > { %2904 = vst [vmem:[#allocation2 + $0xe7] sm:$0x1] %v7230_v26  ;;  %2905 = vst [vmem:[#allocation2 + $0x107] sm:$0x1] %v7230_v26  ;;  %v5977_v43 = vpop.f32.mrf.mxu0  ;;  %v6061_v49 = vpop.f32.mrf.mxu1 }
 0x146   : > { %2906 = vst [vmem:[#allocation2 + $0x127] sm:$0x1] %v7230_v26  ;;  %2907 = vst [vmem:[#allocation2 + $0x147] sm:$0x1] %v7230_v26  ;;  %v8212_v36 = vadd.f32 %v5977_v43, %v5976_v14  ;;  %v8223_v63 = vadd.f32 %v6060_v3, %v7938_v8 }
 0x147   : > { %2908 = vst [vmem:[#allocation2 + $0x167] sm:$0x1] %v7230_v26  ;;  %2909 = vst [vmem:[#allocation2 + $0x187] sm:$0x1] %v7230_v26  ;;  %v5979_v9 = vpop.f32.mrf.mxu0  ;;  %2547 = vmatmul.mubr.bf16.gmra.mxu0 %v8024_v39  ;;  %v7120_v39 = vld [vmem:[%s9616_s2 + $0xc0] sm:$0xff]   ;;  %v6062_v59 = vpop.f32.mrf.mxu1 }
 0x148   : > { %2910 = vst [vmem:[#allocation2 + $0x1a7] sm:$0x1] %v7230_v26  ;;  %2911 = vst [vmem:[#allocation2 + $0x1c7] sm:$0x1] %v7230_v26  ;;  %2554 = vmatprep.mubr.bf16.mxu0 %v8069_v37  ;;  %v6063_v54 = vadd.f32 %v6062_v59, %v6061_v49  ;;  %6320 = vmatpush3.bf16.msra.mxu1 %v7120_v39 }
 0x149   : > { %2912 = vst [vmem:[#allocation2 + $0x1e7] sm:$0x1] %v7230_v26  ;;  %2913 = vst [vmem:[#allocation2 + $0x207] sm:$0x1] %v7230_v26  ;;  %v5980_v0 = vpop.f32.mrf.mxu0  ;;  %v6064_v15 = vpop.f32.mrf.mxu1 }
 0x14a   : > { %2946 = vst [vmem:[#allocation2 + $0x38] sm:$0x1] %v7230_v26  ;;  %2947 = vst [vmem:[#allocation2 + $0x58] sm:$0x1] %v7230_v26  ;;  %v5981_v33 = vadd.f32 %v5980_v0, %v5979_v9  ;;  %v8235_v4 = vadd.f32 %v6063_v54, %v7956_v44 }
 0x14b   : > { %2948 = vst [vmem:[#allocation2 + $0x78] sm:$0x1] %v7230_v26  ;;  %2949 = vst [vmem:[#allocation2 + $0x98] sm:$0x1] %v7230_v26  ;;  %v5982_v53 = vpop.f32.mrf.mxu0  ;;  %v6065_v31 = vpop.f32.mrf.mxu1 }
 0x14c   : > { %2950 = vst [vmem:[#allocation2 + $0xb8] sm:$0x1] %v7230_v26  ;;  %2951 = vst [vmem:[#allocation2 + $0xd8] sm:$0x1] %v7230_v26  ;;  %v8232_v8 = vadd.f32 %v8074_v42, %v5981_v33  ;;  %v6066_v41 = vadd.f32 %v6065_v31, %v6064_v15  ;;  %v7125_v33 = vld [vmem:[%s9616_s2 + $0x140] sm:$0xff]   ;;  %v8272_v15 = vld [vmem:[%s9616_s2 + $0xb8] sm:$0xff]  }
 0x14d   : > { %2952 = vst [vmem:[#allocation2 + $0xf8] sm:$0x1] %v7230_v26  ;;  %2953 = vst [vmem:[#allocation2 + $0x118] sm:$0x1] %v7230_v26  ;;  %v5983_v38 = vpop.f32.mrf.mxu0  ;;  %v6067_v43 = vpop.f32.mrf.mxu1  ;;  %6905 = vmatprep.subr.bf16.mxu1 %v8272_v15 }
 0x14e   : > { %2954 = vst [vmem:[#allocation2 + $0x138] sm:$0x1] %v7230_v26  ;;  %2955 = vst [vmem:[#allocation2 + $0x158] sm:$0x1] %v7230_v26  ;;  %v5984_v14 = vadd.f32 %v5983_v38, %v5982_v53  ;;  %v8246_v27 = vadd.f32 %v6066_v41, %v7967_v47 }
 0x14f   : > { %2956 = vst [vmem:[#allocation2 + $0x178] sm:$0x1] %v7230_v26  ;;  %2957 = vst [vmem:[#allocation2 + $0x198] sm:$0x1] %v7230_v26  ;;  %v5985_v57 = vpop.f32.mrf.mxu0  ;;  %2555 = vmatmul.mubr.bf16.gmra.mxu0 %v8027_v30  ;;  %v6068_v52 = vpop.f32.mrf.mxu1 }
 0x150   : > { %2958 = vst [vmem:[#allocation2 + $0x1b8] sm:$0x1] %v7230_v26  ;;  %2959 = vst [vmem:[#allocation2 + $0x1d8] sm:$0x1] %v7230_v26  ;;  %v8242_v42 = vadd.f32 %v8097_v2, %v5984_v14  ;;  %2562 = vmatprep.mubr.bf16.mxu0 %v8072_v23  ;;  %v6069_v9 = vadd.f32 %v6068_v52, %v6067_v43 }
 0x151   : > { %2960 = vst [vmem:[#allocation2 + $0x1f8] sm:$0x1] %v7230_v26  ;;  %2961 = vst [vmem:[#allocation2 + $0x218] sm:$0x1] %v7230_v26  ;;  %v7123_v26 = vld [vmem:[%s9616_s2 + $0x150] sm:$0xff]   ;;  %v5986_v44 = vpop.f32.mrf.mxu0  ;;  %v6070_v49 = vpop.f32.mrf.mxu1 }
 0x152   : > { %6867 = vmatprep.subr.bf16.mxu0 %v7123_v26  ;;  %v5987_v3 = vadd.f32 %v5986_v44, %v5985_v57  ;;  %v8259_v47 = vadd.f32 %v6069_v9, %v7987_v58 }
 0x153   : > { %6868 = vmatpush3.bf16.msra.mxu0 %v7123_v26  ;;  %v8248_v30 = vpop.f32.mrf.mxu0  ;;  %v6071_v0 = vpop.f32.mrf.mxu1 }
 0x154   : > { %v8254_v2 = vadd.f32 %v5987_v3, %v8123_v45  ;;  %6869 = vmatprep.subr.bf16.mxu0 %v7124_v55  ;;  %v6072_v39 = vadd.f32 %v6071_v0, %v6070_v49 }
 0x155   : > { %v8256_v56 = vpop.f32.mrf.mxu0  ;;  %v6073_v54 = vpop.f32.mrf.mxu1 }
 0x156   : > { %v8267_v53 = vadd.f32 %v6072_v39, %v8001_v24 }
 0x157   : > { %6870 = vmatpush3.bf16.msra.mxu0 %v7124_v55  ;;  %v5991_v59 = vpop.f32.mrf.mxu0  ;;  %v6074_v58 = vpop.f32.mrf.mxu1 }
 0x158   : > { %2563 = vmatmul.mubr.bf16.gmra.mxu0 %v8069_v37  ;;  %6871 = vmatprep.subr.bf16.mxu0 %v7125_v33  ;;  %v6075_v37 = vadd.f32 %v6074_v58, %v6073_v54 }
 0x159   : > { %2570 = vmatprep.mubr.bf16.mxu0 %v8109_v28  ;;  %v5992_v45 = vpop.f32.mrf.mxu0  ;;  %v6076_v31 = vpop.f32.mrf.mxu1 }
 0x15a   : > { %v5993_v51 = vadd.f32 %v5992_v45, %v5991_v59  ;;  %v8279_v24 = vadd.f32 %v6075_v37, %v8022_v5 }
 0x15b   : > { %6872 = vmatpush3.bf16.msra.mxu0 %v7125_v33  ;;  %v5994_v38 = vpop.f32.mrf.mxu0  ;;  %v6077_v57 = vpop.f32.mrf.mxu1 }
 0x15c   : > { %v8275_v14 = vadd.f32 %v8114_v16, %v5993_v51  ;;  %v6078_v43 = vadd.f32 %v6077_v57, %v6076_v31 }
 0x15d   : > { %v5995_v41 = vpop.f32.mrf.mxu0  ;;  %v6079_v52 = vpop.f32.mrf.mxu1 }
 0x15e   : > { %v5996_v26 = vadd.f32 %v5995_v41, %v5994_v38  ;;  %v8287_v9 = vadd.f32 %v6078_v43, %v8042_v1 }
 0x15f   : > { %v5997_v44 = vpop.f32.mrf.mxu0  ;;  %v6080_v55 = vpop.f32.mrf.mxu1 }
 0x160   : > { %2571 = vmatmul.mubr.bf16.gmra.mxu0 %v8072_v23  ;;  %v8283_v3 = vadd.f32 %v8138_v17, %v5996_v26  ;;  %v6081_v5 = vadd.f32 %v6080_v55, %v6079_v52 }
 0x161   : > { %2578 = vmatprep.mubr.bf16.mxu0 %v8112_v25  ;;  %v5998_v16 = vpop.f32.mrf.mxu0  ;;  %v6082_v39 = vpop.f32.mrf.mxu1 }
 0x162   : > { %v5999_v49 = vadd.f32 %v5998_v16, %v5997_v44  ;;  %v1731_v17 = vadd.f32 %v6081_v5, %v8067_v11 }
 0x163   : > { %v8289_v0 = vpop.f32.mrf.mxu0  ;;  %v6083_v33 = vpop.f32.mrf.mxu1 }
 0x164   : > { %v8292_v59 = vadd.f32 %v5999_v49, %v8158_v7  ;;  %v6084_v54 = vadd.f32 %v6083_v33, %v6082_v39 }
 0x165   : > { %v8294_v23 = vpop.f32.mrf.mxu0  ;;  %v6085_v1 = vpop.f32.mrf.mxu1 }
 0x166   : > { %v1734_v58 = vadd.f32 %v6084_v54, %v8087_v61 }
 0x167   : > { %v6003_v25 = vpop.f32.mrf.mxu0  ;;  %v6086_v51 = vpop.f32.mrf.mxu1 }
 0x168   : > { %2579 = vmatmul.mubr.bf16.gmra.mxu0 %v8109_v28  ;;  %v6087_v38 = vadd.f32 %v6086_v51, %v6085_v1 }
 0x169   : > { %v6004_v45 = vpop.f32.mrf.mxu0  ;;  %v6088_v41 = vpop.f32.mrf.mxu1 }
 0x16a   : > { %v6005_v37 = vadd.f32 %v6004_v45, %v6003_v25  ;;  %v1739_v11 = vadd.f32 %v6087_v38, %v8107_v10 }
 0x16b   : > { %v6006_v31 = vpop.f32.mrf.mxu0  ;;  %v6089_v26 = vpop.f32.mrf.mxu1 }
 0x16c   : > { %v8300_v7 = vadd.f32 %v8152_v40, %v6005_v37  ;;  %v6090_v44 = vadd.f32 %v6089_v26, %v6088_v41 }
 0x16d   : > { %v6007_v57 = vpop.f32.mrf.mxu0  ;;  %v6091_v28 = vpop.f32.mrf.mxu1 }
 0x16e   : > { %v6008_v43 = vadd.f32 %v6007_v57, %v6006_v31  ;;  %v8310_v49 = vadd.f32 %v6090_v44, %v8126_v18 }
 0x16f   : > { %v6779_v52 = vpop.f32.mrf.mxu0  ;;  %v6092_v40 = vpop.f32.mrf.mxu1 }
 0x170   : > { %v8304_v16 = vadd.f32 %v8160_v22, %v6008_v43  ;;  %v8307_v61 = vadd.f32 %v6779_v52, %v8207_v6  ;;  %v6093_v10 = vadd.f32 %v6092_v40, %v6091_v28 }
 0x171   : > { %v1851_v55 = vpop.f32.mrf.mxu0  ;;  %v6094_v33 = vpop.f32.mrf.mxu1 }
 0x172   : > { %v8313_v5 = vadd.f32 %v1851_v55, %v8184_v60  ;;  %v1747_v22 = vadd.f32 %v6093_v10, %v8143_v62 }
 0x173   : > { %v6780_v39 = vpop.f32.mrf.mxu0  ;;  %v6095_v6 = vpop.f32.mrf.mxu1 }
 0x174   : > { %v8316_v54 = vadd.f32 %v6780_v39, %v8223_v63  ;;  %v6096_v1 = vadd.f32 %v6095_v6, %v6094_v33 }
 0x175   : > { %v8318_v25 = vpop.f32.mrf.mxu0  ;;  %v6097_v51 = vpop.f32.mrf.mxu1 }
 0x176   : > { %v1750_v60 = vadd.f32 %v6096_v1, %v8155_v13 }
 0x177   : > { %v6783_v45 = vpop.f32.mrf.mxu0  ;;  %v6098_v38 = vpop.f32.mrf.mxu1 }
 0x178   : > { %v8322_v18 = vadd.f32 %v6783_v45, %v8259_v47  ;;  %v6099_v63 = vadd.f32 %v6098_v38, %v6097_v51  ;;  %v1453_v47 = vadd.f32 %v8167_v34, %v8064_v32 }
 0x179   : > { %v1867_v37 = vpop.f32.mrf.mxu0  ;;  %v6100_v57 = vpop.f32.mrf.mxu1 }
 0x17a   : > { %v8326_v31 = vadd.f32 %v1867_v37, %v8235_v4  ;;  %v1755_v43 = vadd.f32 %v6099_v63, %v8163_v29 }
 0x17b   : > { %v6784_v41 = vpop.f32.mrf.mxu0  ;;  %v6101_v44 = vpop.f32.mrf.mxu1 }
 0x17c   : > { %v8329_v26 = vadd.f32 %v6784_v41, %v8267_v53  ;;  %v6102_v52 = vadd.f32 %v6101_v44, %v6100_v57 }
 0x17d   : > { %v8331_v62 = vpop.f32.mrf.mxu0  ;;  %v6103_v28 = vpop.f32.mrf.mxu1 }
 0x17e   : > { %v8338_v40 = vadd.f32 %v6102_v52, %v1453_v47 }
 0x17f   : > { %v6787_v13 = vpop.f32.mrf.mxu0  ;;  %v6104_v10 = vpop.f32.mrf.mxu1 }
 0x180   : > { %v8336_v55 = vadd.f32 %v6787_v13, %v1731_v17  ;;  %v6105_v39 = vadd.f32 %v6104_v10, %v6103_v28 }
 0x181   : > { %v1883_v4 = vpop.f32.mrf.mxu0  ;;  %v6106_v6 = vpop.f32.mrf.mxu1 }
 0x182   : > { %v8341_v53 = vadd.f32 %v1883_v4, %v8279_v24  ;;  %v1763_v32 = vadd.f32 %v6105_v39, %v8181_v19 }
 0x183   : > { %v6788_v33 = vpop.f32.mrf.mxu0  ;;  %v6107_v34 = vpop.f32.mrf.mxu1 }
 0x184   : > { %v8343_v29 = vadd.f32 %v6788_v33, %v1734_v58  ;;  %v6108_v45 = vadd.f32 %v6107_v34, %v6106_v6 }
 0x185   : > { %v8345_v1 = vpop.f32.mrf.mxu0  ;;  %v6109_v51 = vpop.f32.mrf.mxu1 }
 0x186   : > { %v1766_v63 = vadd.f32 %v6108_v45, %v8188_v46 }
 0x187   : > { %v6791_v17 = vpop.f32.mrf.mxu0  ;;  %v6110_v24 = vpop.f32.mrf.mxu1 }
 0x188   : > { %v8348_v37 = vadd.f32 %v6791_v17, %v1747_v22  ;;  %v6111_v57 = vadd.f32 %v6110_v24, %v6109_v51  ;;  %v1469_v22 = vadd.f32 %v8212_v36, %v8104_v20 }
 0x189   : > { %v1899_v38 = vpop.f32.mrf.mxu0  ;;  %v6112_v58 = vpop.f32.mrf.mxu1 }
 0x18a   : > { %v8351_v41 = vadd.f32 %v1899_v38, %v1739_v11  ;;  %v1771_v19 = vadd.f32 %v6111_v57, %v8201_v21 }
 0x18b   : > { %v6792_v44 = vpop.f32.mrf.mxu0  ;;  %v6113_v13 = vpop.f32.mrf.mxu1 }
 0x18c   : > { %v8353_v47 = vadd.f32 %v6792_v44, %v1750_v60  ;;  %v6114_v28 = vadd.f32 %v6113_v13, %v6112_v58  ;;  %v5990_v13 = vadd.f32 %v8256_v56, %v8248_v30 }
 0x18d   : > { %v8355_v52 = vpop.f32.mrf.mxu0  ;;  %v6115_v10 = vpop.f32.mrf.mxu1 }
 0x18e   : > { %v8362_v39 = vadd.f32 %v6114_v28, %v1469_v22 }
 0x18f   : > { %v6795_v4 = vpop.f32.mrf.mxu0  ;;  %v6116_v33 = vpop.f32.mrf.mxu1 }
 0x190   : > { %v8360_v46 = vadd.f32 %v6795_v4, %v1763_v32  ;;  %v6117_v60 = vadd.f32 %v6116_v33, %v6115_v10 }
 0x191   : > { %v1915_v11 = vpop.f32.mrf.mxu0  ;;  %v6118_v45 = vpop.f32.mrf.mxu1 }
 0x192   : > { %v8364_v6 = vadd.f32 %v1915_v11, %v1755_v43  ;;  %v1779_v20 = vadd.f32 %v6117_v60, %v8232_v8 }
 0x193   : > { %v6796_v34 = vpop.f32.mrf.mxu0  ;;  %v6119_v36 = vpop.f32.mrf.mxu1 }
 0x194   : > { %v8366_v17 = vadd.f32 %v6796_v34, %v1766_v63  ;;  %v6120_v51 = vadd.f32 %v6119_v36, %v6118_v45  ;;  %v7130_v63 = vld [vmem:[%s9616_s2 + $0x78] sm:$0xff]  }
 0x195   : > { %v8368_v21 = vpop.f32.mrf.mxu0  ;;  %v6121_v32 = vpop.f32.mrf.mxu1  ;;  %6441 = vmatprep.subr.bf16.mxu0 %v7130_v63 }
 0x196   : > { %v1782_v44 = vadd.f32 %v6120_v51, %v8242_v42 }
 0x197   : > { %v6799_v38 = vpop.f32.mrf.mxu0  ;;  %v6122_v43 = vpop.f32.mrf.mxu1 }
 0x198   : > { %v8371_v24 = vadd.f32 %v6799_v38, %v1779_v20  ;;  %v6123_v8 = vadd.f32 %v6122_v43, %v6121_v32 }
 0x199   : > { %v1931_v57 = vpop.f32.mrf.mxu0  ;;  %v6124_v28 = vpop.f32.mrf.mxu1 }
 0x19a   : > { %v8374_v58 = vadd.f32 %v1931_v57, %v1771_v19  ;;  %v1787_v42 = vadd.f32 %v6123_v8, %v8254_v2  ;;  %v1485_v19 = vadd.f32 %v5990_v13, %v8140_v35 }
 0x19b   : > { %v6800_v22 = vpop.f32.mrf.mxu0  ;;  %v6125_v11 = vpop.f32.mrf.mxu1 }
 0x19c   : > { %v8381_v4 = vadd.f32 %v6800_v22, %v1782_v44  ;;  %v6126_v33 = vadd.f32 %v6125_v11, %v6124_v28  ;;  %v6002_v28 = vadd.f32 %v8294_v23, %v8289_v0 }
 0x19d   : > { %v8383_v10 = vpop.f32.mrf.mxu0  ;;  %v6127_v34 = vpop.f32.mrf.mxu1 }
 0x19e   : > { %v8387_v20 = vadd.f32 %v6126_v33, %v1485_v19 }
 0x19f   : > { %v6803_v60 = vpop.f32.mrf.mxu0  ;;  %v6128_v30 = vpop.f32.mrf.mxu1 }
 0x1a0   : > { %v6129_v36 = vadd.f32 %v6128_v30, %v6127_v34 }
 0x1a1   : > { %v1947_v45 = vpop.f32.mrf.mxu0  ;;  %v6130_v38 = vpop.f32.mrf.mxu1 }
 0x1a2   : > { %v8389_v56 = vadd.f32 %v1947_v45, %v1787_v42  ;;  %v1795_v32 = vadd.f32 %v6129_v36, %v8275_v14  ;;  %v1501_v45 = vadd.f32 %v6002_v28, %v8165_v50 }
 0x1a3   : > { %v6804_v51 = vpop.f32.mrf.mxu0  ;;  %v6131_v2 = vpop.f32.mrf.mxu1 }
 0x1a4   : > { %v6132_v44 = vadd.f32 %v6131_v2, %v6130_v38  ;;  %v8394_v43 = vadd.f32 %v6803_v60, %v1795_v32 }
 0x1a5   : > { %v8392_v57 = vpop.f32.mrf.mxu0  ;;  %v6133_v63 = vpop.f32.mrf.mxu1 }
 0x1a6   : > { %v1798_v13 = vadd.f32 %v6132_v44, %v8283_v3 }
 0x1a7   : > { %v6807_v35 = vpop.f32.mrf.mxu0  ;;  %v6134_v22 = vpop.f32.mrf.mxu1 }
 0x1a8   : > { %v6135_v42 = vadd.f32 %v6134_v22, %v6133_v63  ;;  %v8399_v11 = vadd.f32 %v6804_v51, %v1798_v13 }
 0x1a9   : > { %v1963_v8 = vpop.f32.mrf.mxu0  ;;  %v6136_v14 = vpop.f32.mrf.mxu1 }
 0x1aa   : > { %v1803_v33 = vadd.f32 %v6135_v42, %v8292_v59 }
 0x1ab   : > { %v6808_v19 = vpop.f32.mrf.mxu0  ;;  %v6137_v60 = vpop.f32.mrf.mxu1 }
 0x1ac   : > { %v6138_v30 = vadd.f32 %v6137_v60, %v6136_v14  ;;  %v8405_v36 = vadd.f32 %v1963_v8, %v1803_v33 }
 0x1ad   : > { %v8402_v34 = vpop.f32.mrf.mxu0  ;;  %v6139_v38 = vpop.f32.mrf.mxu1 }
 0x1ae   : > { %v8407_v32 = vadd.f32 %v6138_v30, %v1501_v45 }
 0x1af   : > { %v6185_v3 = vpop.f32.mrf.mxu0  ;;  %v6140_v23 = vpop.f32.mrf.mxu1 }
 0x1b0   : > { %v6141_v51 = vadd.f32 %v6140_v23, %v6139_v38 }
 0x1b1   : > { %v6186_v0 = vpop.f32.mrf.mxu0  ;;  %v6142_v44 = vpop.f32.mrf.mxu1 }
 0x1b2   : > { %v1811_v63 = vadd.f32 %v6141_v51, %v8300_v7  ;;  %v6187_v50 = vadd.f32 %v6186_v0, %v6185_v3  ;;  %v8418_v7 = vld [vmem:[%s9617_s3] ss:$0 sm:$0xff] }
 0x1b3   : > { %v6188_v2 = vpop.f32.mrf.mxu0  ;;  %v6143_v13 = vpop.f32.mrf.mxu1 }
 0x1b4   : > { %v8410_v22 = vadd.f32 %v6807_v35, %v1811_v63  ;;  %v6144_v42 = vadd.f32 %v6143_v13, %v6142_v44  ;;  %v1855_v63 = vadd.f32 %v8318_v25, %v8195_v12 }
 0x1b5   : > { %v6189_v59 = vpop.f32.mrf.mxu0  ;;  %v6827_v8 = vpop.f32.mrf.mxu1 }
 0x1b6   : > { %v1814_v14 = vadd.f32 %v6144_v42, %v8304_v16  ;;  %v6190_v23 = vadd.f32 %v6189_v59, %v6188_v2  ;;  %v8424_v16 = vld [vmem:[%s9618_s4] ss:$0 sm:$0xff] }
 0x1b7   : > { %v6191_v28 = vpop.f32.mrf.mxu0  ;;  %v2621_v60 = vpop.f32.mrf.mxu1 }
 0x1b8   : > { %v8413_v30 = vadd.f32 %v6808_v19, %v1814_v14  ;;  %v2622_v38 = vadd.f32 %v6187_v50, %v2621_v60 }
 0x1b9   : > { %v6192_v33 = vpop.f32.mrf.mxu0  ;;  %v6828_v35 = vpop.f32.mrf.mxu1 }
 0x1ba   : > { %v6193_v45 = vadd.f32 %v6192_v33, %v6191_v28  ;;  %v2748_v3 = vadd.f32 %v2622_v38, %v8313_v5 }
 0x1bb   : > { %v6194_v48 = vpop.f32.mrf.mxu0  ;;  %v2624_v19 = vpop.f32.mrf.mxu1 }
 0x1bc   : > { %v2630_v51 = vadd.f32 %v6827_v8, %v6193_v45  ;;  %v2787_v59 = vmul.f32 %v8418_v7, %v2748_v3  ;;  %v2625_v13 = vadd.f32 %v6190_v23, %v2624_v19  ;;  %v3065_v19 = vld [vmem:[#allocation2 + $0x10] sm:$0xff] }
 0x1bd   : > { %v6195_v0 = vpop.f32.mrf.mxu0  ;;  %v6831_v5 = vpop.f32.mrf.mxu1 }
 0x1be   : > { %v2750_v44 = vadd.f32 %v2630_v51, %v8307_v61  ;;  %v6196_v2 = vadd.f32 %v6195_v0, %v6194_v48  ;;  %v2826_v8 = vadd.f32 %v8424_v16, %v2787_v59  ;;  %v2749_v14 = vadd.f32 %v2625_v13, %v1855_v63 }
 0x1bf   : > { %v6197_v42 = vpop.f32.mrf.mxu0  ;;  %v2637_v48 = vpop.f32.mrf.mxu1 }
 0x1c0   : > { %v2789_v50 = vmul.f32 %v8418_v7, %v2750_v44  ;;  %v2633_v28 = vadd.f32 %v6828_v35, %v6196_v2  ;;  %v2858_v38 = vmax.f32 %v2826_v8, 0.0  ;;  %v2788_v12 = vmul.f32 %v8418_v7, %v2749_v14  ;;  %v3064_v35 = vld [vmem:[#allocation2 + $0x8] sm:$0xff] }
 0x1c1   : > { %v6198_v33 = vpop.f32.mrf.mxu0  ;;  %v6832_v3 = vpop.f32.mrf.mxu1  ;;  %v1871_v8 = vadd.f32 %v8331_v62, %v8246_v27 }
 0x1c2   : > { %v2828_v60 = vadd.f32 %v8424_v16, %v2789_v50  ;;  %v2751_v61 = vadd.f32 %v2633_v28, %v8316_v54  ;;  %v6199_v45 = vadd.f32 %v6198_v33, %v6197_v42  ;;  %2914 = vst [vmem:[#allocation2 + $0x28] sm:$0xff] %v2858_v38  ;;  %v2827_v44 = vadd.f32 %v8424_v16, %v2788_v12 }
 0x1c3   : > { %v6200_v25 = vpop.f32.mrf.mxu0  ;;  %v2640_v42 = vpop.f32.mrf.mxu1  ;;  %v3100_v28 = vpack.c.bf16 %v3065_v19, %v3064_v35 }
 0x1c4   : > { %v2860_v23 = vmax.f32 %v2828_v60, 0.0  ;;  %v2790_v51 = vmul.f32 %v8418_v7, %v2751_v61  ;;  %v2638_v0 = vadd.f32 %v6199_v45, %v2637_v48  ;;  %v2859_v13 = vmax.f32 %v2827_v44, 0.0 }
 0x1c5   : > { %v6201_v2 = vpop.f32.mrf.mxu0  ;;  %v8448_v27 = vpop.f32.mrf.mxu1 }
 0x1c6   : > { %2916 = vst [vmem:[#allocation2 + $0x48] sm:$0xff] %v2860_v23  ;;  %v2829_v54 = vadd.f32 %v8424_v16, %v2790_v51  ;;  %v2752_v63 = vadd.f32 %v2638_v0, %v8326_v31  ;;  %v6202_v59 = vadd.f32 %v6201_v2, %v6200_v25  ;;  %2915 = vst [vmem:[#allocation2 + $0x30] sm:$0xff] %v2859_v13  ;;  %v7126_v51 = vld [vmem:[%s9616_s2 + $0xb0] sm:$0xff]  }
 0x1c7   : > { %v6203_v50 = vpop.f32.mrf.mxu0  ;;  %v3101_v48 = vpack.c.bf16 %v2859_v13, %v2858_v38 }
 0x1c8   : > { %v2861_v14 = vmax.f32 %v2829_v54, 0.0  ;;  %v2791_v33 = vmul.f32 %v8418_v7, %v2752_v63  ;;  %v2641_v60 = vadd.f32 %v6202_v59, %v2640_v42  ;;  %v7127_v54 = vld [vmem:[%s9616_s2 + $0xa8] sm:$0xff]  }
 0x1c9   : > { %v6204_v61 = vpop.f32.mrf.mxu0  ;;  %3343 = vmatprep.mubr.bf16.mxu1 %v3101_v48 }
 0x1ca   : > { %2917 = vst [vmem:[#allocation2 + $0x50] sm:$0xff] %v2861_v14  ;;  %v2830_v45 = vadd.f32 %v8424_v16, %v2791_v33  ;;  %v2753_v12 = vadd.f32 %v2641_v60, %v1871_v8  ;;  %v6205_v31 = vadd.f32 %v6204_v61, %v6203_v50  ;;  %v8443_v25 = vpack.c.bf16 %v2861_v14, %v2860_v23  ;;  %v7128_v14 = vld [vmem:[%s9616_s2 + $0xa0] sm:$0xff]   ;;  %v7131_v33 = vld [vmem:[%s9616_s2 + $0x38] sm:$0xff]   ;;  %v7132_v61 = vld [vmem:[%s9616_s2 + $0x70] sm:$0xff]  }
 0x1cb   : > { %v6206_v0 = vpop.f32.mrf.mxu0  ;;  %3344 = vmatmul.mubr.bf16.vlgmr.msra.gmra.mxu1 %v3100_v28 }
 0x1cc   : > { %v2862_v62 = vmax.f32 %v2830_v45, 0.0  ;;  %v2792_v35 = vmul.f32 %v8418_v7, %v2753_v12  ;;  %v2646_v19 = vadd.f32 %v6831_v5, %v6205_v31  ;;  %6873 = vmatprep.mubr.bf16.mxu0 %v8443_v25  ;;  %6906 = vmatpush3.bf16.msra.mxu1 %v8272_v15  ;;  %v2653_v5 = vpop.f32.mrf.mxu1 }
 0x1cd   : > { %v6207_v38 = vpop.f32.mrf.mxu0  ;;  %3351 = vmatprep.mubr.bf16.mxu1 %v8443_v25  ;;  %6907 = vmatprep.subr.bf16.mxu1 %v7126_v51 }
 0x1ce   : > { %2918 = vst [vmem:[#allocation2 + $0x68] sm:$0xff] %v2862_v62  ;;  %v2831_v23 = vadd.f32 %v8424_v16, %v2792_v35  ;;  %v2754_v44 = vadd.f32 %v2646_v19, %v8322_v18  ;;  %v6208_v2 = vadd.f32 %v6207_v38, %v6206_v0  ;;  %v7129_v35 = vld [vmem:[%s9616_s2 + $0x98] sm:$0xff]   ;;  %v7133_v38 = vld [vmem:[%s9616_s2 + $0x30] sm:$0xff]  }
 0x1cf   : > { %v6209_v63 = vpop.f32.mrf.mxu0 }
 0x1d0   : > { %v2863_v59 = vmax.f32 %v2831_v23, 0.0  ;;  %v2793_v13 = vmul.f32 %v8418_v7, %v2754_v44  ;;  %v2649_v42 = vadd.f32 %v6832_v3, %v6208_v2  ;;  %6908 = vmatpush3.bf16.msra.mxu1 %v7126_v51  ;;  %v6836_v3 = vpop.f32.mrf.mxu1  ;;  %v1887_v23 = vadd.f32 %v8345_v1, %v8287_v9  ;;  %v7135_v9 = vld [vmem:[%s9616_s2 + $0x68] sm:$0xff]  }
 0x1d1   : > { %v6210_v15 = vpop.f32.mrf.mxu0  ;;  %6909 = vmatprep.subr.bf16.mxu1 %v7127_v54 }
 0x1d2   : > { %2919 = vst [vmem:[#allocation2 + $0x70] sm:$0xff] %v2863_v59  ;;  %v2832_v50 = vadd.f32 %v8424_v16, %v2793_v13  ;;  %v2755_v28 = vadd.f32 %v2649_v42, %v8329_v26  ;;  %v6211_v18 = vadd.f32 %v6210_v15, %v6209_v63  ;;  %v8462_v8 = vpack.c.bf16 %v2863_v59, %v2862_v62  ;;  %v2656_v19 = vpop.f32.mrf.mxu1  ;;  %v7134_v42 = vld [vmem:[%s9616_s2 + $0x90] sm:$0xff]  }
 0x1d3   : > { %v6212_v60 = vpop.f32.mrf.mxu0  ;;  %3352 = vmatmul.mubr.bf16.gmra.mxu1 %v3101_v48 }
 0x1d4   : > { %v2864_v45 = vmax.f32 %v2832_v50, 0.0  ;;  %v2794_v26 = vmul.f32 %v8418_v7, %v2755_v28  ;;  %v2654_v12 = vadd.f32 %v6211_v18, %v2653_v5  ;;  %6874 = vmatmul.mubr.bf16.vlgmr.msra.gmra.mxu0 %v8462_v8  ;;  %3359 = vmatprep.mubr.bf16.mxu1 %v8462_v8  ;;  %v8496_v15 = vpop.f32.mrf.mxu1  ;;  %v7136_v50 = vld [vmem:[%s9616_s2 + $0x28] sm:$0xff]  }
 0x1d5   : > { %v6213_v31 = vpop.f32.mrf.mxu0  ;;  %6910 = vmatpush3.bf16.msra.mxu1 %v7127_v54  ;;  %6442 = vmatpush3.bf16.msra.mxu0 %v7131_v33  ;;  %v7137_v33 = vld [vmem:[%s9616_s2 + $0x60] sm:$0xff]  }
 0x1d6   : > { %2920 = vst [vmem:[#allocation2 + $0x88] sm:$0xff] %v2864_v45  ;;  %v2833_v51 = vadd.f32 %v8424_v16, %v2794_v26  ;;  %v2756_v0 = vadd.f32 %v2654_v12, %v8341_v53  ;;  %v6214_v62 = vadd.f32 %v6213_v31, %v6212_v60  ;;  %6911 = vmatprep.subr.bf16.mxu1 %v7128_v14  ;;  %v7138_v31 = vld [vmem:[%s9616_s2 + $0x20] sm:$0xff]  }
 0x1d7   : > { %v6215_v48 = vpop.f32.mrf.mxu0  ;;  %6443 = vmatprep.subr.bf16.mxu0 %v7132_v61 }
 0x1d8   : > { %v2865_v44 = vmax.f32 %v2833_v51, 0.0  ;;  %v2795_v53 = vmul.f32 %v8418_v7, %v2756_v0  ;;  %v2657_v2 = vadd.f32 %v6214_v62, %v2656_v19 }
 0x1d9   : > { %v6216_v54 = vpop.f32.mrf.mxu0  ;;  %6912 = vmatpush3.bf16.msra.mxu1 %v7128_v14  ;;  %6444 = vmatpush3.bf16.msra.mxu0 %v7133_v38 }
 0x1da   : > { %2921 = vst [vmem:[#allocation2 + $0x90] sm:$0xff] %v2865_v44  ;;  %v2834_v5 = vadd.f32 %v8424_v16, %v2795_v53  ;;  %v2757_v63 = vadd.f32 %v2657_v2, %v1887_v23  ;;  %v6217_v59 = vadd.f32 %v6216_v54, %v6215_v48  ;;  %v8488_v13 = vpack.c.bf16 %v2865_v44, %v2864_v45  ;;  %v7140_v23 = vld [vmem:[%s9616_s2 + $0x58] sm:$0xff]  }
 0x1db   : > { %6913 = vmatprep.subr.bf16.mxu1 %v7129_v35  ;;  %v6218_v1 = vpop.f32.mrf.mxu0  ;;  %3360 = vmatmul.mubr.bf16.gmra.mxu1 %v8443_v25  ;;  %v7139_v25 = vld [vmem:[%s9616_s2 + $0x88] sm:$0xff]   ;;  %v7141_v2 = vld [vmem:[%s9616_s2 + $0x18] sm:$0xff]  }
 0x1dc   : > { %v2866_v28 = vmax.f32 %v2834_v5, 0.0  ;;  %v2796_v18 = vmul.f32 %v8418_v7, %v2757_v63  ;;  %v2662_v14 = vadd.f32 %v8448_v27, %v6217_v59  ;;  %6877 = vmatprep.mubr.bf16.mxu0 %v8488_v13  ;;  %3367 = vmatprep.mubr.bf16.mxu1 %v8488_v13  ;;  %v2669_v27 = vpop.f32.mrf.mxu1  ;;  %v7142_v63 = vld [vmem:[%s9616_s2 + $0x50] sm:$0xff]  }
 0x1dd   : > { %v6219_v60 = vpop.f32.mrf.mxu0  ;;  %6914 = vmatpush3.bf16.msra.mxu1 %v7129_v35  ;;  %6445 = vmatprep.subr.bf16.mxu0 %v7135_v9 }
 0x1de   : > { %2922 = vst [vmem:[#allocation2 + $0xa8] sm:$0xff] %v2866_v28  ;;  %v2835_v61 = vadd.f32 %v8424_v16, %v2796_v18  ;;  %v2758_v45 = vadd.f32 %v2662_v14, %v8336_v55  ;;  %v6220_v26 = vadd.f32 %v6219_v60, %v6218_v1  ;;  %6915 = vmatprep.subr.bf16.mxu1 %v7134_v42  ;;  %v6840_v44 = vpop.f32.mrf.mxu1  ;;  %v7143_v18 = vld [vmem:[%s9616_s2 + $0x10] sm:$0xff]  }
 0x1df   : > { %v6221_v12 = vpop.f32.mrf.mxu0  ;;  %6446 = vmatpush3.bf16.msra.mxu0 %v7136_v50  ;;  %v1903_v14 = vadd.f32 %v8355_v52, %v8310_v49 }
 0x1e0   : > { %v2867_v51 = vmax.f32 %v2835_v61, 0.0  ;;  %v2797_v0 = vmul.f32 %v8418_v7, %v2758_v45  ;;  %v2665_v62 = vadd.f32 %v6836_v3, %v6220_v26  ;;  %6447 = vmatprep.subr.bf16.mxu0 %v7137_v33  ;;  %v7144_v3 = vld [vmem:[%s9616_s2 + $0x80] sm:$0xff]   ;;  %v2672_v50 = vpop.f32.mrf.mxu1  ;;  %v7145_v45 = vld [vmem:[%s9616_s2 + $0x48] sm:$0xff]  }
 0x1e1   : > { %v6222_v55 = vpop.f32.mrf.mxu0  ;;  %6916 = vmatpush3.bf16.msra.mxu1 %v7134_v42 }
 0x1e2   : > { %2923 = vst [vmem:[#allocation2 + $0xb0] sm:$0xff] %v2867_v51  ;;  %v2836_v35 = vadd.f32 %v8424_v16, %v2797_v0  ;;  %v2759_v19 = vadd.f32 %v2665_v62, %v8343_v29  ;;  %v6223_v48 = vadd.f32 %v6222_v55, %v6221_v12  ;;  %v8520_v38 = vpack.c.bf16 %v2867_v51, %v2866_v28  ;;  %v6843_v52 = vpop.f32.mrf.mxu1  ;;  %v7147_v55 = vld [vmem:[%s9616_s2 + $0x40] sm:$0xff]  }
 0x1e3   : > { %6917 = vmatprep.subr.bf16.mxu1 %v7139_v25  ;;  %v6224_v53 = vpop.f32.mrf.mxu0  ;;  %6448 = vmatpush3.bf16.msra.mxu0 %v7138_v31  ;;  %v7146_v31 = vld [vmem:[%s9616_s2 + $0x8] sm:$0xff]  }
 0x1e4   : > { %v2868_v29 = vmax.f32 %v2836_v35, 0.0  ;;  %v2798_v54 = vmul.f32 %v8418_v7, %v2759_v19  ;;  %v2670_v5 = vadd.f32 %v6223_v48, %v2669_v27  ;;  %3368 = vmatmul.mubr.bf16.gmra.mxu1 %v8462_v8  ;;  %6878 = vmatmul.mubr.bf16.gmra.mxu0 %v8520_v38  ;;  %v7149_v8 = vld [vmem:[%s9616_s2 + $0x1f8] sm:$0xff]  }
 0x1e5   : > { %v6225_v59 = vpop.f32.mrf.mxu0  ;;  %3375 = vmatprep.mubr.bf16.mxu1 %v8520_v38  ;;  %6918 = vmatpush3.bf16.msra.mxu1 %v7139_v25 }
 0x1e6   : > { %2924 = vst [vmem:[#allocation2 + $0xc8] sm:$0xff] %v2868_v29  ;;  %v2837_v42 = vadd.f32 %v8424_v16, %v2798_v54  ;;  %v2760_v9 = vadd.f32 %v2670_v5, %v8351_v41  ;;  %v6226_v1 = vadd.f32 %v6225_v59, %v6224_v53  ;;  %6449 = vmatprep.subr.bf16.mxu0 %v7140_v23  ;;  %v8575_v5 = vld [vmem:[%s9616_s2 + $0x238] sm:$0xff]  }
 0x1e7   : > { %6919 = vmatprep.subr.bf16.mxu1 %v7144_v3  ;;  %v6227_v28 = vpop.f32.mrf.mxu0  ;;  %6450 = vmatpush3.bf16.msra.mxu0 %v7141_v2 }
 0x1e8   : > { %v2869_v33 = vmax.f32 %v2837_v42, 0.0  ;;  %v2799_v41 = vmul.f32 %v8418_v7, %v2760_v9  ;;  %v2673_v60 = vadd.f32 %v6226_v1, %v2672_v50  ;;  %6451 = vmatprep.subr.bf16.mxu0 %v7142_v63 }
 0x1e9   : > { %v6228_v61 = vpop.f32.mrf.mxu0  ;;  %6920 = vmatpush3.bf16.msra.mxu1 %v7144_v3  ;;  %v2685_v3 = vpop.f32.mrf.mxu1 }
 0x1ea   : > { %2925 = vst [vmem:[#allocation2 + $0xd0] sm:$0xff] %v2869_v33  ;;  %v2838_v26 = vadd.f32 %v8424_v16, %v2799_v41  ;;  %v2761_v25 = vadd.f32 %v2673_v60, %v1903_v14  ;;  %v6229_v27 = vadd.f32 %v6228_v61, %v6227_v28  ;;  %v8553_v12 = vpack.c.bf16 %v2869_v33, %v2868_v29 }
 0x1eb   : > { %6577 = vmatprep.subr.bf16.mxu1 %v7149_v8  ;;  %v6230_v49 = vpop.f32.mrf.mxu0  ;;  %6452 = vmatpush3.bf16.msra.mxu0 %v7143_v18  ;;  %v6844_v9 = vpop.f32.mrf.mxu1  ;;  %v1919_v60 = vadd.f32 %v8368_v21, %v8338_v40 }
 0x1ec   : > { %v2870_v51 = vmax.f32 %v2838_v26, 0.0  ;;  %v2800_v0 = vmul.f32 %v8418_v7, %v2761_v25  ;;  %v2678_v62 = vadd.f32 %v8496_v15, %v6229_v27  ;;  %3376 = vmatmul.mubr.bf16.gmra.mxu1 %v8488_v13  ;;  %6881 = vmatprep.mubr.bf16.mxu0 %v8553_v12  ;;  %v7148_v13 = vld [vmem:[%s9616_s2] sm:$0xff]  }
 0x1ed   : > { %v6231_v35 = vpop.f32.mrf.mxu0  ;;  %3383 = vmatprep.mubr.bf16.mxu1 %v8553_v12  ;;  %6453 = vmatprep.subr.bf16.mxu0 %v7145_v45  ;;  %v2688_v33 = vpop.f32.mrf.mxu1 }
 0x1ee   : > { %2926 = vst [vmem:[#allocation2 + $0xe8] sm:$0xff] %v2870_v51  ;;  %v2839_v19 = vadd.f32 %v8424_v16, %v2800_v0  ;;  %v2762_v48 = vadd.f32 %v2678_v62, %v8348_v37  ;;  %v6232_v23 = vadd.f32 %v6231_v35, %v6230_v49 }
 0x1ef   : > { %v6233_v15 = vpop.f32.mrf.mxu0  ;;  %6454 = vmatpush3.bf16.msra.mxu0 %v7146_v31  ;;  %v6847_v0 = vpop.f32.mrf.mxu1 }
 0x1f0   : > { %v2871_v53 = vmax.f32 %v2839_v19, 0.0  ;;  %v2801_v2 = vmul.f32 %v8418_v7, %v2762_v48  ;;  %v2681_v29 = vadd.f32 %v6840_v44, %v6232_v23  ;;  %6455 = vmatprep.subr.bf16.mxu0 %v7147_v55 }
 0x1f1   : > { %v6234_v54 = vpop.f32.mrf.mxu0  ;;  %v2701_v48 = vpop.f32.mrf.mxu1 }
 0x1f2   : > { %2927 = vst [vmem:[#allocation2 + $0xf0] sm:$0xff] %v2871_v53  ;;  %v2840_v37 = vadd.f32 %v8424_v16, %v2801_v2  ;;  %v2763_v63 = vadd.f32 %v2681_v29, %v8353_v47  ;;  %v6235_v59 = vadd.f32 %v6234_v54, %v6233_v15  ;;  %v3107_v42 = vpack.c.bf16 %v2871_v53, %v2870_v51 }
 0x1f3   : > { %v6236_v1 = vpop.f32.mrf.mxu0  ;;  %6456 = vmatpush3.bf16.msra.mxu0 %v7148_v13  ;;  %v6848_v54 = vpop.f32.mrf.mxu1 }
 0x1f4   : > { %v2872_v8 = vmax.f32 %v2840_v37, 0.0  ;;  %v2802_v44 = vmul.f32 %v8418_v7, %v2763_v63  ;;  %v2686_v50 = vadd.f32 %v6235_v59, %v2685_v3  ;;  %3384 = vmatmul.mubr.bf16.gmra.mxu1 %v8520_v38  ;;  %6882 = vmatmul.mubr.bf16.gmra.mxu0 %v3107_v42 }
 0x1f5   : > { %v6237_v28 = vpop.f32.mrf.mxu0  ;;  %3391 = vmatprep.mubr.bf16.mxu1 %v3107_v42  ;;  %6953 = vmatprep.subr.bf16.mxu0 %v8575_v5 }
 0x1f6   : > { %2928 = vst [vmem:[#allocation2 + $0x108] sm:$0xff] %v2872_v8  ;;  %v2841_v18 = vadd.f32 %v8424_v16, %v2802_v44  ;;  %v2764_v47 = vadd.f32 %v2686_v50, %v8364_v6  ;;  %v6238_v14 = vadd.f32 %v6237_v28, %v6236_v1  ;;  %v2704_v50 = vpop.f32.mrf.mxu1  ;;  %v1935_v28 = vadd.f32 %v8383_v10, %v8362_v39 }
 0x1f7   : > { %v6239_v41 = vpop.f32.mrf.mxu0 }
 0x1f8   : > { %v2873_v61 = vmax.f32 %v2841_v18, 0.0  ;;  %v2803_v45 = vmul.f32 %v8418_v7, %v2764_v47  ;;  %v2689_v38 = vadd.f32 %v6238_v14, %v2688_v33 }
 0x1f9   : > { %v6240_v26 = vpop.f32.mrf.mxu0 }
 0x1fa   : > { %2929 = vst [vmem:[#allocation2 + $0x110] sm:$0xff] %v2873_v61  ;;  %v2842_v25 = vadd.f32 %v8424_v16, %v2803_v45  ;;  %v2765_v27 = vadd.f32 %v2689_v38, %v1919_v60  ;;  %v6241_v49 = vadd.f32 %v6240_v26, %v6239_v41  ;;  %v3108_v31 = vpack.c.bf16 %v2873_v61, %v2872_v8  ;;  %v6851_v38 = vpop.f32.mrf.mxu1 }
 0x1fb   : > { %v6242_v51 = vpop.f32.mrf.mxu0 }
 0x1fc   : > { %v2874_v6 = vmax.f32 %v2842_v25, 0.0  ;;  %v2804_v62 = vmul.f32 %v8418_v7, %v2765_v27  ;;  %v2694_v55 = vadd.f32 %v6843_v52, %v6241_v49  ;;  %3392 = vmatmul.mubr.bf16.gmra.mxu1 %v8553_v12  ;;  %6885 = vmatprep.mubr.bf16.mxu0 %v3108_v31 }
 0x1fd   : > { %v6243_v40 = vpop.f32.mrf.mxu0  ;;  %3399 = vmatprep.mubr.bf16.mxu1 %v3108_v31 }
 0x1fe   : > { %2930 = vst [vmem:[#allocation2 + $0x128] sm:$0xff] %v2874_v6  ;;  %v2843_v21 = vadd.f32 %v8424_v16, %v2804_v62  ;;  %v2766_v35 = vadd.f32 %v2694_v55, %v8360_v46  ;;  %v6244_v19 = vadd.f32 %v6243_v40, %v6242_v51  ;;  %v2717_v51 = vpop.f32.mrf.mxu1 }
 0x1ff   : > { %v6245_v23 = vpop.f32.mrf.mxu0 }
 0x200   : > { %v2875_v3 = vmax.f32 %v2843_v21, 0.0  ;;  %v2805_v15 = vmul.f32 %v8418_v7, %v2766_v35  ;;  %v2697_v13 = vadd.f32 %v6844_v9, %v6244_v19 }
 0x201   : > { %v6246_v53 = vpop.f32.mrf.mxu0 }
 0x202   : > { %2931 = vst [vmem:[#allocation2 + $0x130] sm:$0xff] %v2875_v3  ;;  %v2844_v52 = vadd.f32 %v8424_v16, %v2805_v15  ;;  %v2767_v12 = vadd.f32 %v2697_v13, %v8366_v17  ;;  %v6247_v2 = vadd.f32 %v6246_v53, %v6245_v23  ;;  %v3109_v29 = vpack.c.bf16 %v2875_v3, %v2874_v6 }
 0x203   : > { %v6248_v37 = vpop.f32.mrf.mxu0 }
 0x204   : > { %v2876_v63 = vmax.f32 %v2844_v52, 0.0  ;;  %v2806_v46 = vmul.f32 %v8418_v7, %v2767_v12  ;;  %v2702_v59 = vadd.f32 %v6247_v2, %v2701_v48  ;;  %3400 = vmatmul.mubr.bf16.gmra.mxu1 %v3107_v42  ;;  %6886 = vmatmul.mubr.bf16.gmra.mxu0 %v3109_v29  ;;  %v6852_v48 = vpop.f32.mrf.mxu1 }
 0x205   : > { %v6249_v1 = vpop.f32.mrf.mxu0  ;;  %3407 = vmatprep.mubr.bf16.mxu1 %v3109_v29 }
 0x206   : > { %2932 = vst [vmem:[#allocation2 + $0x148] sm:$0xff] %v2876_v63  ;;  %v2845_v9 = vadd.f32 %v8424_v16, %v2806_v46  ;;  %v2768_v8 = vadd.f32 %v2702_v59, %v8374_v58  ;;  %v6250_v44 = vadd.f32 %v6249_v1, %v6248_v37  ;;  %v2720_v2 = vpop.f32.mrf.mxu1 }
 0x207   : > { %v6251_v17 = vpop.f32.mrf.mxu0 }
 0x208   : > { %v2877_v18 = vmax.f32 %v2845_v9, 0.0  ;;  %v2807_v47 = vmul.f32 %v8418_v7, %v2768_v8  ;;  %v2705_v14 = vadd.f32 %v6250_v44, %v2704_v50  ;;  %v6855_v50 = vpop.f32.mrf.mxu1 }
 0x209   : > { %v6252_v33 = vpop.f32.mrf.mxu0 }
 0x20a   : > { %2933 = vst [vmem:[#allocation2 + $0x150] sm:$0xff] %v2877_v18  ;;  %v2846_v42 = vadd.f32 %v8424_v16, %v2807_v47  ;;  %v2769_v41 = vadd.f32 %v2705_v14, %v1935_v28  ;;  %v6253_v60 = vadd.f32 %v6252_v33, %v6251_v17  ;;  %v3110_v61 = vpack.c.bf16 %v2877_v18, %v2876_v63  ;;  %v2733_v14 = vpop.f32.mrf.mxu1 }
 0x20b   : > { %v6254_v45 = vpop.f32.mrf.mxu0 }
 0x20c   : > { %v2878_v58 = vmax.f32 %v2846_v42, 0.0  ;;  %v2808_v26 = vmul.f32 %v8418_v7, %v2769_v41  ;;  %v2710_v25 = vadd.f32 %v6847_v0, %v6253_v60  ;;  %3408 = vmatmul.mubr.bf16.gmra.mxu1 %v3108_v31  ;;  %6889 = vmatprep.mubr.bf16.mxu0 %v3110_v61 }
 0x20d   : > { %v6255_v39 = vpop.f32.mrf.mxu0  ;;  %3415 = vmatprep.mubr.bf16.mxu1 %v3110_v61 }
 0x20e   : > { %2934 = vst [vmem:[#allocation2 + $0x168] sm:$0xff] %v2878_v58  ;;  %v2847_v10 = vadd.f32 %v8424_v16, %v2808_v26  ;;  %v2770_v27 = vadd.f32 %v2710_v25, %v8371_v24  ;;  %v6256_v49 = vadd.f32 %v6255_v39, %v6254_v45  ;;  %v6856_v25 = vpop.f32.mrf.mxu1 }
 0x20f   : > { %v6257_v6 = vpop.f32.mrf.mxu0 }
 0x210   : > { %v2879_v62 = vmax.f32 %v2847_v10, 0.0  ;;  %v2809_v55 = vmul.f32 %v8418_v7, %v2770_v27  ;;  %v2713_v40 = vadd.f32 %v6848_v54, %v6256_v49  ;;  %v1951_v54 = vadd.f32 %v8392_v57, %v8387_v20 }
 0x211   : > { %v6258_v21 = vpop.f32.mrf.mxu0 }
 0x212   : > { %2935 = vst [vmem:[#allocation2 + $0x170] sm:$0xff] %v2879_v62  ;;  %v2848_v0 = vadd.f32 %v8424_v16, %v2809_v55  ;;  %v2771_v31 = vadd.f32 %v2713_v40, %v8381_v4  ;;  %v6259_v35 = vadd.f32 %v6258_v21, %v6257_v6  ;;  %v3111_v19 = vpack.c.bf16 %v2879_v62, %v2878_v58  ;;  %v2736_v55 = vpop.f32.mrf.mxu1 }
 0x213   : > { %v6260_v23 = vpop.f32.mrf.mxu0  ;;  %v1967_v40 = vadd.f32 %v8402_v34, %v8407_v32 }
 0x214   : > { %v2880_v3 = vmax.f32 %v2848_v0, 0.0  ;;  %v2810_v24 = vmul.f32 %v8418_v7, %v2771_v31  ;;  %v2718_v15 = vadd.f32 %v6259_v35, %v2717_v51  ;;  %3416 = vmatmul.mubr.bf16.gmra.mxu1 %v3109_v29  ;;  %6890 = vmatmul.mubr.bf16.gmra.mxu0 %v3111_v19 }
 0x215   : > { %v6261_v13 = vpop.f32.mrf.mxu0  ;;  %3423 = vmatprep.mubr.bf16.mxu1 %v3111_v19 }
 0x216   : > { %2936 = vst [vmem:[#allocation2 + $0x188] sm:$0xff] %v2880_v3  ;;  %v2849_v53 = vadd.f32 %v8424_v16, %v2810_v24  ;;  %v2772_v52 = vadd.f32 %v2718_v15, %v8389_v56  ;;  %v6262_v12 = vadd.f32 %v6261_v13, %v6260_v23 }
 0x218   : > { %v6263_v4 = vpop.f32.mrf.mxu0  ;;  %v2881_v37 = vmax.f32 %v2849_v53, 0.0  ;;  %v2811_v63 = vmul.f32 %v8418_v7, %v2772_v52  ;;  %v2721_v46 = vadd.f32 %v6262_v12, %v2720_v2 }
 0x21a   : > { %v6264_v59 = vpop.f32.mrf.mxu0  ;;  %2937 = vst [vmem:[#allocation2 + $0x190] sm:$0xff] %v2881_v37  ;;  %v2850_v29 = vadd.f32 %v8424_v16, %v2811_v63  ;;  %v2773_v1 = vadd.f32 %v2721_v46, %v1951_v54  ;;  %v3112_v8 = vpack.c.bf16 %v2881_v37, %v2880_v3 }
 0x21b   : > { %v6265_v9 = vadd.f32 %v6264_v59, %v6263_v4 }
 0x21c   : > { %v6266_v44 = vpop.f32.mrf.mxu0  ;;  %v2882_v56 = vmax.f32 %v2850_v29, 0.0  ;;  %v2812_v17 = vmul.f32 %v8418_v7, %v2773_v1  ;;  %3424 = vmatmul.mubr.bf16.gmra.mxu1 %v3110_v61  ;;  %6893 = vmatprep.mubr.bf16.mxu0 %v3112_v8  ;;  %v3098_v29 = vld [vmem:[#allocation2 + $0x228] sm:$0xff]  ;;  %v3099_v1 = vld [vmem:[#allocation2 + $0x230] sm:$0xff] }
 0x21d   : > { %v2726_v28 = vadd.f32 %v6851_v38, %v6265_v9  ;;  %3431 = vmatprep.mubr.bf16.mxu1 %v3112_v8 }
 0x21e   : > { %v6267_v20 = vpop.f32.mrf.mxu0  ;;  %2938 = vst [vmem:[#allocation2 + $0x1a8] sm:$0xff] %v2882_v56  ;;  %v2851_v57 = vadd.f32 %v8424_v16, %v2812_v17  ;;  %v7221_v17 = vld [vmem:[#allocation2 + $0x7] sm:$0xff] }
 0x21f   : > { %v2774_v18 = vadd.f32 %v2726_v28, %v8394_v43  ;;  %v6268_v47 = vadd.f32 %v6267_v20, %v6266_v44  ;;  %v2965_v44 = vld [vmem:[#allocation2 + $0x2f] sm:$0xff]  ;;  %v8636_v28 = vpack.c.bf16 %v7221_v17, %v7221_v17  ;;  %v2966_v20 = vld [vmem:[#allocation2 + $0x47] sm:$0xff] }
 0x220   : > { %v6269_v33 = vpop.f32.mrf.mxu0  ;;  %v2883_v42 = vmax.f32 %v2851_v57, 0.0  ;;  %v7156_v57 = vld [vmem:[%s9616_s2 + $0x230] sm:$0xff]  }
 0x221   : > { %v2813_v41 = vmul.f32 %v8418_v7, %v2774_v18  ;;  %v2729_v60 = vadd.f32 %v6852_v48, %v6268_v47  ;;  %v2969_v18 = vld [vmem:[#allocation2 + $0x6f] sm:$0xff] }
 0x222   : > { %v6270_v45 = vpop.f32.mrf.mxu0  ;;  %2939 = vst [vmem:[#allocation2 + $0x1b0] sm:$0xff] %v2883_v42  ;;  %v3113_v26 = vpack.c.bf16 %v2883_v42, %v2882_v56  ;;  %v2964_v56 = vld [vmem:[#allocation2 + $0x27] sm:$0xff]  ;;  %v7150_v42 = vld [vmem:[%s9616_s2 + $0x1b8] sm:$0xff]  }
 0x223   : > { %v2852_v38 = vadd.f32 %v8424_v16, %v2813_v41  ;;  %v2775_v61 = vadd.f32 %v2729_v60, %v8399_v11  ;;  %v6271_v58 = vadd.f32 %v6270_v45, %v6269_v33  ;;  %v7161_v47 = vld [vmem:[%s9616_s2 + $0x228] sm:$0xff]   ;;  %v7152_v45 = vld [vmem:[%s9616_s2 + $0x1f0] sm:$0xff]  }
 0x224   : > { %v6272_v39 = vpop.f32.mrf.mxu0  ;;  %3432 = vmatmul.mubr.bf16.gmra.mxu1 %v3111_v19  ;;  %6894 = vmatmul.mubr.bf16.gmra.mxu0 %v3113_v26  ;;  %v2968_v33 = vld [vmem:[#allocation2 + $0x67] sm:$0xff] }
 0x225   : > { %v2884_v10 = vmax.f32 %v2852_v38, 0.0  ;;  %v2814_v43 = vmul.f32 %v8418_v7, %v2775_v61  ;;  %v2734_v27 = vadd.f32 %v6271_v58, %v2733_v14  ;;  %3439 = vmatprep.mubr.bf16.mxu1 %v3113_v26  ;;  %v2971_v14 = vld [vmem:[#allocation2 + $0x8f] sm:$0xff]  ;;  %v3001_v41 = vpack.c.bf16 %v2969_v18, %v2968_v33  ;;  %v2970_v60 = vld [vmem:[#allocation2 + $0x87] sm:$0xff] }
 0x226   : > { %v6273_v49 = vpop.f32.mrf.mxu0  ;;  %v7166_v38 = vld [vmem:[%s9616_s2 + $0x220] sm:$0xff]   ;;  %v7153_v61 = vld [vmem:[%s9616_s2 + $0x1b0] sm:$0xff]   ;;  %v7154_v58 = vld [vmem:[%s9616_s2 + $0x1e8] sm:$0xff]  }
 0x227   : > { %2940 = vst [vmem:[#allocation2 + $0x1c8] sm:$0xff] %v2884_v10  ;;  %v2853_v51 = vadd.f32 %v8424_v16, %v2814_v43  ;;  %v2776_v6 = vadd.f32 %v2734_v27, %v8405_v36  ;;  %v6274_v62 = vadd.f32 %v6273_v49, %v6272_v39  ;;  %v7169_v39 = vld [vmem:[%s9616_s2 + $0x218] sm:$0xff]   ;;  %v7155_v43 = vld [vmem:[%s9616_s2 + $0x1a8] sm:$0xff]  }
 0x228   : > { %v6275_v11 = vpop.f32.mrf.mxu0  ;;  %v2974_v49 = vld [vmem:[#allocation2 + $0xc7] sm:$0xff] }
 0x229   : > { %v2885_v21 = vmax.f32 %v2853_v51, 0.0  ;;  %v2815_v0 = vmul.f32 %v8418_v7, %v2776_v6  ;;  %v2737_v31 = vadd.f32 %v6274_v62, %v2736_v55  ;;  %v7157_v51 = vld [vmem:[%s9616_s2 + $0x1e0] sm:$0xff]   ;;  %v7170_v62 = vld [vmem:[%s9616_s2 + $0x210] sm:$0xff]  }
 0x22a   : > { %v6276_v35 = vpop.f32.mrf.mxu0  ;;  %v7158_v55 = vld [vmem:[%s9616_s2 + $0x1a0] sm:$0xff]   ;;  %v4101_v18 = vld [vmem:[#allocation2 + $0x29] sm:$0xff] }
 0x22b   : > { %2941 = vst [vmem:[#allocation2 + $0x1d0] sm:$0xff] %v2885_v21  ;;  %v2854_v19 = vadd.f32 %v8424_v16, %v2815_v0  ;;  %v2777_v48 = vadd.f32 %v2737_v31, %v1967_v40  ;;  %v6277_v23 = vadd.f32 %v6276_v35, %v6275_v11  ;;  %v3114_v3 = vpack.c.bf16 %v2885_v21, %v2884_v10  ;;  %v2972_v10 = vld [vmem:[#allocation2 + $0xa7] sm:$0xff]  ;;  %v7159_v11 = vld [vmem:[%s9616_s2 + $0x1d8] sm:$0xff]   ;;  %v2977_v40 = vld [vmem:[#allocation2 + $0xef] sm:$0xff] }
 0x22c   : > { %v6278_v24 = vpop.f32.mrf.mxu0  ;;  %3440 = vmatmul.mubr.bf16.gmra.mxu1 %v3112_v8  ;;  %v3117_v8 = vpack.c.bf16 %v3099_v1, %v3098_v29  ;;  %v2979_v21 = vld [vmem:[#allocation2 + $0x10f] sm:$0xff]  ;;  %v2976_v31 = vld [vmem:[#allocation2 + $0xe7] sm:$0xff]  ;;  %v7160_v35 = vld [vmem:[%s9616_s2 + $0x198] sm:$0xff]  }
 0x22d   : > { %v2886_v15 = vmax.f32 %v2854_v19, 0.0  ;;  %v2816_v36 = vmul.f32 %v8418_v7, %v2777_v48  ;;  %v2742_v13 = vadd.f32 %v6855_v50, %v6277_v23  ;;  %6897 = vmatprep.mubr.bf16.mxu0 %v3114_v3  ;;  %3447 = vmatprep.mubr.bf16.mxu1 %v3114_v3  ;;  %v7171_v0 = vld [vmem:[%s9616_s2 + $0x208] sm:$0xff]   ;;  %v8695_v19 = vpack.c.bf16 %v2977_v40, %v2976_v31  ;;  %v7162_v23 = vld [vmem:[%s9616_s2 + $0x1d0] sm:$0xff]  }
 0x22e   : > { %v6279_v53 = vpop.f32.mrf.mxu0  ;;  %v2978_v48 = vld [vmem:[#allocation2 + $0x107] sm:$0xff]  ;;  %v2989_v1 = vld [vmem:[#allocation2 + $0x1af] sm:$0xff] }
 0x22f   : > { %2942 = vst [vmem:[#allocation2 + $0x1e8] sm:$0xff] %v2886_v15  ;;  %v2855_v34 = vadd.f32 %v8424_v16, %v2816_v36  ;;  %v2778_v32 = vadd.f32 %v2742_v13, %v8410_v22  ;;  %v6280_v52 = vadd.f32 %v6279_v53, %v6278_v24  ;;  %v7172_v24 = vld [vmem:[%s9616_s2 + $0x200] sm:$0xff]   ;;  %v7164_v36 = vld [vmem:[%s9616_s2 + $0x1c8] sm:$0xff]  }
 0x230   : > { %v2981_v13 = vld [vmem:[#allocation2 + $0x12f] sm:$0xff] }
 0x231   : > { %v2887_v12 = vmax.f32 %v2855_v34, 0.0  ;;  %v2817_v2 = vmul.f32 %v8418_v7, %v2778_v32  ;;  %v2745_v4 = vadd.f32 %v6856_v25, %v6280_v52  ;;  %v2975_v25 = vld [vmem:[#allocation2 + $0xcf] sm:$0xff]  ;;  %v2980_v34 = vld [vmem:[#allocation2 + $0x127] sm:$0xff] }
 0x232   : > { %v8675_v6 = vpack.c.bf16 %v2975_v25, %v2974_v49  ;;  %v2983_v53 = vld [vmem:[#allocation2 + $0x14f] sm:$0xff]  ;;  %v3007_v52 = vpack.c.bf16 %v2981_v13, %v2980_v34 }
 0x233   : > { %2943 = vst [vmem:[#allocation2 + $0x1f0] sm:$0xff] %v2887_v12  ;;  %v2856_v54 = vadd.f32 %v8424_v16, %v2817_v2  ;;  %v2779_v37 = vadd.f32 %v2745_v4, %v8413_v30  ;;  %v3115_v63 = vpack.c.bf16 %v2887_v12, %v2886_v15  ;;  %v2999_v30 = vpack.c.bf16 %v2965_v44, %v2964_v56  ;;  %v7163_v15 = vld [vmem:[%s9616_s2 + $0x190] sm:$0xff]   ;;  %v7165_v32 = vld [vmem:[%s9616_s2 + $0x188] sm:$0xff]   ;;  %v7167_v2 = vld [vmem:[%s9616_s2 + $0x1c0] sm:$0xff]  }
 0x234   : > { %3448 = vmatmul.mubr.bf16.gmra.mxu1 %v3113_v26  ;;  %v2973_v26 = vld [vmem:[#allocation2 + $0xaf] sm:$0xff]  ;;  %v2982_v12 = vld [vmem:[#allocation2 + $0x147] sm:$0xff] }
 0x235   : > { %v2888_v46 = vmax.f32 %v2856_v54, 0.0  ;;  %v2818_v59 = vmul.f32 %v8418_v7, %v2779_v37  ;;  %6898 = vmatmul.mubr.bf16.gmra.mxu0 %v3115_v63  ;;  %3455 = vmatprep.mubr.bf16.mxu1 %v3115_v63  ;;  %v2967_v7 = vld [vmem:[#allocation2 + $0x4f] sm:$0xff]  ;;  %v8670_v27 = vpack.c.bf16 %v2973_v26, %v2972_v10  ;;  %v8720_v4 = vpack.c.bf16 %v2983_v53, %v2982_v12  ;;  %v7168_v54 = vld [vmem:[%s9616_s2 + $0x180] sm:$0xff]  }
 0x236   : > { %v2985_v37 = vld [vmem:[#allocation2 + $0x16f] sm:$0xff]  ;;  %v2992_v17 = vld [vmem:[#allocation2 + $0x1e7] sm:$0xff] }
 0x237   : > { %2944 = vst [vmem:[#allocation2 + $0x208] sm:$0xff] %v2888_v46  ;;  %v2857_v22 = vadd.f32 %v8424_v16, %v2818_v59  ;;  %v3000_v16 = vpack.c.bf16 %v2967_v7, %v2966_v20  ;;  %v4099_v33 = vld [vmem:[#allocation2 + $0x9] sm:$0xff]  ;;  %v4106_v25 = vld [vmem:[#allocation2 + $0x71] sm:$0xff] }
 0x238   : > { %v4105_v26 = vld [vmem:[#allocation2 + $0x69] sm:$0xff]  ;;  %v4110_v53 = vld [vmem:[#allocation2 + $0xb1] sm:$0xff] }
 0x239   : > { %v2889_v9 = vmax.f32 %v2857_v22, 0.0  ;;  %v2986_v22 = vld [vmem:[#allocation2 + $0x187] sm:$0xff] }
 0x23a   : > { %v4107_v40 = vld [vmem:[#allocation2 + $0x89] sm:$0xff] }
 0x23b   : > { %2945 = vst [vmem:[#allocation2 + $0x210] sm:$0xff] %v2889_v9  ;;  %v3116_v50 = vpack.c.bf16 %v2889_v9, %v2888_v46  ;;  %v2984_v46 = vld [vmem:[#allocation2 + $0x167] sm:$0xff]  ;;  %v2991_v9 = vld [vmem:[#allocation2 + $0x1cf] sm:$0xff] }
 0x23c   : > { %3456 = vmatmul.mubr.bf16.gmra.mxu1 %v3114_v3  ;;  %v8700_v3 = vpack.c.bf16 %v2979_v21, %v2978_v48  ;;  %v8728_v59 = vpack.c.bf16 %v2985_v37, %v2984_v46  ;;  %v4108_v21 = vld [vmem:[#allocation2 + $0x91] sm:$0xff]  ;;  %v4109_v13 = vld [vmem:[#allocation2 + $0xa9] sm:$0xff] }
 0x23d   : > { %6901 = vmatprep.mubr.bf16.mxu0 %v3116_v50  ;;  %3463 = vmatprep.mubr.bf16.mxu1 %v3116_v50  ;;  %v2990_v50 = vld [vmem:[#allocation2 + $0x1c7] sm:$0xff]  ;;  %v8769_v48 = vpack.c.bf16 %v4108_v21, %v4107_v40  ;;  %v8781_v12 = vpack.c.bf16 %v4110_v53, %v4109_v13 }
 0x23e   : > { %6902 = vmatmul.mubr.bf16.gmra.mxu0 %v3117_v8  ;;  %v2988_v8 = vld [vmem:[#allocation2 + $0x1a7] sm:$0xff]  ;;  %v8738_v56 = vpack.c.bf16 %v2991_v9, %v2990_v50 }
 0x23f   : > { %3809 = vmatprep.mubr.bf16.mxu0 %v2999_v30  ;;  %v8736_v44 = vpack.c.bf16 %v2989_v1, %v2988_v8  ;;  %v4112_v1 = vld [vmem:[#allocation2 + $0xd1] sm:$0xff] }
 0x242   : > { %v2995_v7 = vld [vmem:[#allocation2 + $0x20f] sm:$0xff] }
 0x244   : > { %3464 = vmatmul.mubr.bf16.gmra.mxu1 %v3115_v63  ;;  %v2987_v63 = vld [vmem:[#allocation2 + $0x18f] sm:$0xff] }
 0x245   : > { %6921 = vmatprep.mubr.bf16.mxu1 %v3000_v16  ;;  %v8730_v29 = vpack.c.bf16 %v2987_v63, %v2986_v22  ;;  %v4111_v22 = vld [vmem:[#allocation2 + $0xc9] sm:$0xff] }
 0x246   : > { %3810 = vmatmul.mubr.bf16.vlgmr.msra.gmra.mxu0 %v8636_v28 }
 0x247   : > { %3817 = vmatprep.mubr.bf16.mxu0 %v3000_v16  ;;  %6954 = vmatpush3.bf16.msra.mxu0 %v8575_v5  ;;  %v8652_v5 = vpack.c.bf16 %v2971_v14, %v2970_v60  ;;  %v4103_v60 = vld [vmem:[#allocation2 + $0x49] sm:$0xff] }
 0x248   : > { %6955 = vmatprep.subr.bf16.mxu0 %v7156_v57 }
 0x24b   : > { %6956 = vmatpush3.bf16.msra.mxu0 %v7156_v57 }
 0x24c   : > { %6957 = vmatprep.subr.bf16.mxu0 %v7161_v47  ;;  %6922 = vmatmul.mubr.bf16.vlgmr.msra.gmra.mxu1 %v3001_v41 }
 0x24d   : > { %6925 = vmatprep.mubr.bf16.mxu1 %v8652_v5  ;;  %6578 = vmatpush3.bf16.msra.mxu1 %v7150_v42  ;;  %v4100_v42 = vld [vmem:[#allocation2 + $0x11] sm:$0xff] }
 0x24e   : > { %3818 = vmatmul.mubr.bf16.gmra.mxu0 %v2999_v30  ;;  %6579 = vmatprep.subr.bf16.mxu1 %v7152_v45  ;;  %v2993_v30 = vld [vmem:[#allocation2 + $0x1ef] sm:$0xff] }
 0x24f   : > { %3825 = vmatprep.mubr.bf16.mxu0 %v3001_v41  ;;  %6958 = vmatpush3.bf16.msra.mxu0 %v7161_v47  ;;  %v8744_v20 = vpack.c.bf16 %v2993_v30, %v2992_v17  ;;  %v4102_v47 = vld [vmem:[#allocation2 + $0x31] sm:$0xff] }
 0x250   : > { %6959 = vmatprep.subr.bf16.mxu0 %v7166_v38  ;;  %v4136_v14 = vpack.c.bf16 %v4102_v47, %v4101_v18  ;;  %v4104_v45 = vld [vmem:[#allocation2 + $0x51] sm:$0xff] }
 0x251   : > { %6580 = vmatpush3.bf16.msra.mxu1 %v7153_v61 }
 0x252   : > { %6581 = vmatprep.subr.bf16.mxu1 %v7154_v58 }
 0x253   : > { %6960 = vmatpush3.bf16.msra.mxu0 %v7166_v38 }
 0x254   : > { %6926 = vmatmul.mubr.bf16.gmra.mxu1 %v8670_v27  ;;  %6961 = vmatprep.subr.bf16.mxu0 %v7169_v39 }
 0x255   : > { %6929 = vmatprep.mubr.bf16.mxu1 %v8675_v6  ;;  %6582 = vmatpush3.bf16.msra.mxu1 %v7155_v43  ;;  %v8760_v43 = vpack.c.bf16 %v4106_v25, %v4105_v26 }
 0x256   : > { %3826 = vmatmul.mubr.bf16.gmra.mxu0 %v3000_v16  ;;  %6583 = vmatprep.subr.bf16.mxu1 %v7157_v51  ;;  %v2994_v16 = vld [vmem:[#allocation2 + $0x207] sm:$0xff] }
 0x257   : > { %3833 = vmatprep.mubr.bf16.mxu0 %v8652_v5  ;;  %6962 = vmatpush3.bf16.msra.mxu0 %v7169_v39  ;;  %v8746_v57 = vpack.c.bf16 %v2995_v7, %v2994_v16  ;;  %v8791_v7 = vpack.c.bf16 %v4112_v1, %v4111_v22 }
 0x258   : > { %6963 = vmatprep.subr.bf16.mxu0 %v7170_v62 }
 0x259   : > { %6584 = vmatpush3.bf16.msra.mxu1 %v7158_v55 }
 0x25a   : > { %6585 = vmatprep.subr.bf16.mxu1 %v7159_v11 }
 0x25b   : > { %6964 = vmatpush3.bf16.msra.mxu0 %v7170_v62 }
 0x25c   : > { %6930 = vmatmul.mubr.bf16.gmra.mxu1 %v8695_v19  ;;  %6965 = vmatprep.subr.bf16.mxu0 %v7171_v0 }
 0x25d   : > { %6933 = vmatprep.mubr.bf16.mxu1 %v8700_v3  ;;  %6586 = vmatpush3.bf16.msra.mxu1 %v7160_v35 }
 0x25e   : > { %3834 = vmatmul.mubr.bf16.gmra.mxu0 %v3001_v41  ;;  %6587 = vmatprep.subr.bf16.mxu1 %v7162_v23  ;;  %v4135_v41 = vpack.c.bf16 %v4100_v42, %v4099_v33  ;;  %v4114_v33 = vld [vmem:[#allocation2 + $0xf1] sm:$0xff] }
 0x25f   : > { %3841 = vmatprep.mubr.bf16.mxu0 %v8670_v27  ;;  %6966 = vmatpush3.bf16.msra.mxu0 %v7171_v0 }
 0x260   : > { %6967 = vmatprep.subr.bf16.mxu0 %v7172_v24 }
 0x261   : > { %6588 = vmatpush3.bf16.msra.mxu1 %v7163_v15 }
 0x262   : > { %6589 = vmatprep.subr.bf16.mxu1 %v7164_v36 }
 0x263   : > { %6968 = vmatpush3.bf16.msra.mxu0 %v7172_v24 }
 0x264   : > { %6934 = vmatmul.mubr.bf16.gmra.mxu1 %v3007_v52 }
 0x265   : > { %6937 = vmatprep.mubr.bf16.mxu1 %v8720_v4  ;;  %6590 = vmatpush3.bf16.msra.mxu1 %v7165_v32 }
 0x266   : > { %3842 = vmatmul.mubr.bf16.gmra.mxu0 %v8652_v5  ;;  %6591 = vmatprep.subr.bf16.mxu1 %v7167_v2  ;;  %v8754_v5 = vpack.c.bf16 %v4104_v45, %v4103_v60 }
 0x267   : > { %3849 = vmatprep.mubr.bf16.mxu0 %v8675_v6 }
 0x269   : > { %6592 = vmatpush3.bf16.msra.mxu1 %v7168_v54 }
 0x26c   : > { %6938 = vmatmul.mubr.bf16.gmra.mxu1 %v8728_v59 }
 0x26d   : > { %6941 = vmatprep.mubr.bf16.mxu1 %v8730_v29 }
 0x26e   : > { %3850 = vmatmul.mubr.bf16.gmra.mxu0 %v8670_v27 }
 0x26f   : > { %3857 = vmatprep.mubr.bf16.mxu0 %v8695_v19 }
 0x274   : > { %6942 = vmatmul.mubr.bf16.gmra.mxu1 %v8736_v44 }
 0x275   : > { %6945 = vmatprep.mubr.bf16.mxu1 %v8738_v56 }
 0x276   : > { %3858 = vmatmul.mubr.bf16.gmra.mxu0 %v8675_v6 }
 0x277   : > { %3865 = vmatprep.mubr.bf16.mxu0 %v8700_v3 }
 0x27c   : > { %6946 = vmatmul.mubr.bf16.gmra.mxu1 %v8744_v20 }
 0x27d   : > { %6949 = vmatprep.mubr.bf16.mxu1 %v8746_v57 }
 0x27e   : > { %3866 = vmatmul.mubr.bf16.gmra.mxu0 %v8695_v19 }
 0x27f   : > { %3873 = vmatprep.mubr.bf16.mxu0 %v3007_v52 }
 0x284   : > { %6950 = vmatmul.mubr.bf16.gmra.mxu1 %v8636_v28 }
 0x285   : > { %4378 = vmatprep.mubr.bf16.mxu1 %v4136_v14 }
 0x286   : > { %3874 = vmatmul.mubr.bf16.gmra.mxu0 %v8700_v3 }
 0x287   : > { %3881 = vmatprep.mubr.bf16.mxu0 %v8720_v4 }
 0x28b   : > { %v6321_v38 = vpop.f32.mrf.mxu1 }
 0x28c   : > { %4379 = vmatmul.mubr.bf16.vlgmr.msra.gmra.mxu1 %v4135_v41 }
 0x28d   : > { %4386 = vmatprep.mubr.bf16.mxu1 %v8754_v5  ;;  %v6322_v61 = vpop.f32.mrf.mxu1 }
 0x28e   : > { %3882 = vmatmul.mubr.bf16.gmra.mxu0 %v3007_v52  ;;  %v6323_v58 = vadd.f32 %v6322_v61, %v6321_v38 }
 0x28f   : > { %3889 = vmatprep.mubr.bf16.mxu0 %v8728_v59  ;;  %v6324_v28 = vpop.f32.mrf.mxu1 }
 0x291   : > { %v6325_v39 = vpop.f32.mrf.mxu1 }
 0x292   : > { %v8758_v10 = vadd.f32 %v6325_v39, %v6324_v28  ;;  %v4115_v39 = vld [vmem:[#allocation2 + $0x109] sm:$0xff] }
 0x293   : > { %v6327_v27 = vpop.f32.mrf.mxu1 }
 0x294   : > { %4387 = vmatmul.mubr.bf16.gmra.mxu1 %v4136_v14  ;;  %v6875_v49 = vpop.f32.mrf.mxu0  ;;  %v4113_v14 = vld [vmem:[#allocation2 + $0xe9] sm:$0xff] }
 0x295   : > { %4394 = vmatprep.mubr.bf16.mxu1 %v8760_v43  ;;  %v6328_v51 = vpop.f32.mrf.mxu1  ;;  %v8801_v45 = vpack.c.bf16 %v4114_v33, %v4113_v14  ;;  %v4121_v14 = vld [vmem:[#allocation2 + $0x169] sm:$0xff]  ;;  %v4122_v33 = vld [vmem:[#allocation2 + $0x171] sm:$0xff] }
 0x296   : > { %3890 = vmatmul.mubr.bf16.gmra.mxu0 %v8720_v4  ;;  %v3506_v6 = vpop.f32.mrf.mxu0  ;;  %v6329_v62 = vadd.f32 %v6328_v51, %v6327_v27  ;;  %v4116_v27 = vld [vmem:[#allocation2 + $0x111] sm:$0xff] }
 0x297   : > { %v8764_v55 = vadd.f32 %v6323_v58, %v3506_v6  ;;  %3897 = vmatprep.mubr.bf16.mxu0 %v8730_v29  ;;  %v6330_v11 = vpop.f32.mrf.mxu1  ;;  %v4143_v40 = vpack.c.bf16 %v4116_v27, %v4115_v39  ;;  %v4124_v27 = vld [vmem:[#allocation2 + $0x191] sm:$0xff] }
 0x298   : > { %v8767_v0 = vadd.f32 %v6875_v49, %v6329_v62  ;;  %v6876_v35 = vpop.f32.mrf.mxu0 }
 0x299   : > { %v6331_v31 = vpop.f32.mrf.mxu1 }
 0x29a   : > { %v6332_v19 = vadd.f32 %v6331_v31, %v6330_v11  ;;  %v8777_v34 = vpop.f32.mrf.mxu0 }
 0x29b   : > { %v6333_v23 = vpop.f32.mrf.mxu1 }
 0x29c   : > { %4395 = vmatmul.mubr.bf16.gmra.mxu1 %v8754_v5  ;;  %v8773_v3 = vadd.f32 %v6876_v35, %v6332_v19 }
 0x29d   : > { %4402 = vmatprep.mubr.bf16.mxu1 %v8769_v48  ;;  %v6334_v24 = vpop.f32.mrf.mxu1 }
 0x29e   : > { %3898 = vmatmul.mubr.bf16.gmra.mxu0 %v8728_v59  ;;  %v6335_v15 = vadd.f32 %v6334_v24, %v6333_v23  ;;  %v4117_v23 = vld [vmem:[#allocation2 + $0x129] sm:$0xff]  ;;  %v4118_v24 = vld [vmem:[#allocation2 + $0x131] sm:$0xff] }
 0x29f   : > { %3905 = vmatprep.mubr.bf16.mxu0 %v8736_v44  ;;  %v6336_v36 = vpop.f32.mrf.mxu1  ;;  %v4144_v13 = vpack.c.bf16 %v4118_v24, %v4117_v23 }
 0x2a1   : > { %v6337_v32 = vpop.f32.mrf.mxu1 }
 0x2a2   : > { %v8779_v52 = vadd.f32 %v6337_v32, %v6336_v36 }
 0x2a4   : > { %v6339_v2 = vpop.f32.mrf.mxu1  ;;  %4403 = vmatmul.mubr.bf16.gmra.mxu1 %v8760_v43  ;;  %v6879_v4 = vpop.f32.mrf.mxu0 }
 0x2a5   : > { %4410 = vmatprep.mubr.bf16.mxu1 %v8781_v12 }
 0x2a6   : > { %v6340_v54 = vpop.f32.mrf.mxu1  ;;  %3906 = vmatmul.mubr.bf16.gmra.mxu0 %v8730_v29  ;;  %v3522_v37 = vpop.f32.mrf.mxu0 }
 0x2a7   : > { %v6341_v63 = vadd.f32 %v6340_v54, %v6339_v2  ;;  %v8786_v46 = vadd.f32 %v6335_v15, %v3522_v37  ;;  %3913 = vmatprep.mubr.bf16.mxu0 %v8738_v56  ;;  %v4119_v37 = vld [vmem:[#allocation2 + $0x149] sm:$0xff] }
 0x2a8   : > { %v6342_v59 = vpop.f32.mrf.mxu1  ;;  %v6880_v50 = vpop.f32.mrf.mxu0 }
 0x2a9   : > { %v8789_v9 = vadd.f32 %v6879_v4, %v6341_v63  ;;  %v4120_v63 = vld [vmem:[#allocation2 + $0x151] sm:$0xff] }
 0x2aa   : > { %v6343_v8 = vpop.f32.mrf.mxu1  ;;  %v8799_v42 = vpop.f32.mrf.mxu0 }
 0x2ab   : > { %v6344_v30 = vadd.f32 %v6343_v8, %v6342_v59 }
 0x2ac   : > { %v6345_v17 = vpop.f32.mrf.mxu1  ;;  %4411 = vmatmul.mubr.bf16.gmra.mxu1 %v8769_v48 }
 0x2ad   : > { %4418 = vmatprep.mubr.bf16.mxu1 %v8791_v7  ;;  %v8795_v29 = vadd.f32 %v6880_v50, %v6344_v30  ;;  %v4145_v30 = vpack.c.bf16 %v4120_v63, %v4119_v37 }
 0x2ae   : > { %v6346_v16 = vpop.f32.mrf.mxu1  ;;  %3914 = vmatmul.mubr.bf16.gmra.mxu0 %v8736_v44 }
 0x2af   : > { %v6347_v18 = vadd.f32 %v6346_v16, %v6345_v17  ;;  %3921 = vmatprep.mubr.bf16.mxu0 %v8744_v20 }
 0x2b0   : > { %v6348_v47 = vpop.f32.mrf.mxu1 }
 0x2b2   : > { %v6349_v41 = vpop.f32.mrf.mxu1 }
 0x2b3   : > { %v6350_v60 = vadd.f32 %v6349_v41, %v6348_v47 }
 0x2b4   : > { %v6351_v38 = vpop.f32.mrf.mxu1  ;;  %4419 = vmatmul.mubr.bf16.gmra.mxu1 %v8781_v12  ;;  %v6883_v61 = vpop.f32.mrf.mxu0 }
 0x2b5   : > { %4426 = vmatprep.mubr.bf16.mxu1 %v8801_v45 }
 0x2b6   : > { %v6352_v58 = vpop.f32.mrf.mxu1  ;;  %3922 = vmatmul.mubr.bf16.gmra.mxu0 %v8738_v56  ;;  %v3538_v44 = vpop.f32.mrf.mxu0 }
 0x2b7   : > { %v6353_v28 = vadd.f32 %v6352_v58, %v6351_v38  ;;  %v8806_v26 = vadd.f32 %v6347_v18, %v3538_v44  ;;  %3929 = vmatprep.mubr.bf16.mxu0 %v8746_v57  ;;  %v4146_v38 = vpack.c.bf16 %v4122_v33, %v4121_v14 }
 0x2b8   : > { %v6354_v25 = vpop.f32.mrf.mxu1  ;;  %v6884_v49 = vpop.f32.mrf.mxu0 }
 0x2b9   : > { %v8809_v51 = vadd.f32 %v6883_v61, %v6353_v28 }
 0x2ba   : > { %v6355_v6 = vpop.f32.mrf.mxu1  ;;  %v3541_v62 = vpop.f32.mrf.mxu0 }
 0x2bb   : > { %v6356_v11 = vadd.f32 %v6355_v6, %v6354_v25  ;;  %v8811_v21 = vadd.f32 %v6350_v60, %v3541_v62 }
 0x2bc   : > { %v6357_v31 = vpop.f32.mrf.mxu1  ;;  %4427 = vmatmul.mubr.bf16.gmra.mxu1 %v8791_v7 }
 0x2bd   : > { %4434 = vmatprep.mubr.bf16.mxu1 %v4143_v40  ;;  %v8814_v56 = vadd.f32 %v6884_v49, %v6356_v11 }
 0x2be   : > { %v6358_v35 = vpop.f32.mrf.mxu1  ;;  %3930 = vmatmul.mubr.bf16.gmra.mxu0 %v8744_v20 }
 0x2bf   : > { %v6359_v57 = vadd.f32 %v6358_v35, %v6357_v31  ;;  %6969 = vmatprep.mubr.bf16.mxu0 %v8754_v5 }
 0x2c0   : > { %v6360_v19 = vpop.f32.mrf.mxu1 }
 0x2c2   : > { %v6361_v15 = vpop.f32.mrf.mxu1 }
 0x2c3   : > { %v6362_v36 = vadd.f32 %v6361_v15, %v6360_v19  ;;  %v4125_v15 = vld [vmem:[#allocation2 + $0x1a9] sm:$0xff] }
 0x2c4   : > { %v6363_v53 = vpop.f32.mrf.mxu1  ;;  %4435 = vmatmul.mubr.bf16.gmra.mxu1 %v8801_v45  ;;  %v6887_v32 = vpop.f32.mrf.mxu0 }
 0x2c5   : > { %4442 = vmatprep.mubr.bf16.mxu1 %v4144_v13 }
 0x2c6   : > { %v6364_v2 = vpop.f32.mrf.mxu1  ;;  %6970 = vmatmul.mubr.bf16.vlgmr.msra.gmra.mxu0 %v8760_v43  ;;  %v3554_v4 = vpop.f32.mrf.mxu0 }
 0x2c7   : > { %v6365_v54 = vadd.f32 %v6364_v2, %v6363_v53  ;;  %v8820_v20 = vadd.f32 %v6359_v57, %v3554_v4  ;;  %6973 = vmatprep.mubr.bf16.mxu0 %v8769_v48 }
 0x2c8   : > { %v6366_v5 = vpop.f32.mrf.mxu1  ;;  %v6888_v59 = vpop.f32.mrf.mxu0 }
 0x2c9   : > { %v8823_v22 = vadd.f32 %v6887_v32, %v6365_v54 }
 0x2ca   : > { %v6367_v1 = vpop.f32.mrf.mxu1  ;;  %v3557_v8 = vpop.f32.mrf.mxu0 }
 0x2cb   : > { %v6368_v50 = vadd.f32 %v6367_v1, %v6366_v5  ;;  %v8825_v17 = vadd.f32 %v6362_v36, %v3557_v8  ;;  %v4126_v36 = vld [vmem:[#allocation2 + $0x1b1] sm:$0xff]  ;;  %v4127_v1 = vld [vmem:[#allocation2 + $0x1c9] sm:$0xff] }
 0x2cc   : > { %v6369_v16 = vpop.f32.mrf.mxu1  ;;  %4443 = vmatmul.mubr.bf16.gmra.mxu1 %v4143_v40  ;;  %v4148_v2 = vpack.c.bf16 %v4126_v36, %v4125_v15  ;;  %v4128_v8 = vld [vmem:[#allocation2 + $0x1d1] sm:$0xff] }
 0x2cd   : > { %4450 = vmatprep.mubr.bf16.mxu1 %v4145_v30  ;;  %v8827_v43 = vadd.f32 %v6888_v59, %v6368_v50 }
 0x2ce   : > { %v6370_v18 = vpop.f32.mrf.mxu1  ;;  %6974 = vmatmul.mubr.bf16.gmra.mxu0 %v8781_v12 }
 0x2cf   : > { %v6371_v48 = vadd.f32 %v6370_v18, %v6369_v16  ;;  %6977 = vmatprep.mubr.bf16.mxu0 %v8791_v7  ;;  %v4123_v7 = vld [vmem:[#allocation2 + $0x189] sm:$0xff] }
 0x2d0   : > { %v6372_v47 = vpop.f32.mrf.mxu1  ;;  %v4147_v35 = vpack.c.bf16 %v4124_v27, %v4123_v7 }
 0x2d2   : > { %v6373_v41 = vpop.f32.mrf.mxu1 }
 0x2d3   : > { %v6374_v60 = vadd.f32 %v6373_v41, %v6372_v47  ;;  %v4149_v47 = vpack.c.bf16 %v4128_v8, %v4127_v1 }
 0x2d4   : > { %v6375_v61 = vpop.f32.mrf.mxu1  ;;  %4451 = vmatmul.mubr.bf16.gmra.mxu1 %v4144_v13  ;;  %v6891_v58 = vpop.f32.mrf.mxu0 }
 0x2d5   : > { %4458 = vmatprep.mubr.bf16.mxu1 %v4146_v38 }
 0x2d6   : > { %v6376_v44 = vpop.f32.mrf.mxu1  ;;  %6978 = vmatmul.mubr.bf16.gmra.mxu0 %v8801_v45  ;;  %v3570_v28 = vpop.f32.mrf.mxu0 }
 0x2d7   : > { %v6377_v25 = vadd.f32 %v6376_v44, %v6375_v61  ;;  %v8832_v39 = vadd.f32 %v6371_v48, %v3570_v28  ;;  %6981 = vmatprep.mubr.bf16.mxu0 %v4143_v40  ;;  %v4130_v44 = vld [vmem:[#allocation2 + $0x1f1] sm:$0xff] }
 0x2d8   : > { %v6378_v12 = vpop.f32.mrf.mxu1  ;;  %v6892_v49 = vpop.f32.mrf.mxu0 }
 0x2d9   : > { %v8834_v6 = vadd.f32 %v6891_v58, %v6377_v25  ;;  %v4129_v58 = vld [vmem:[#allocation2 + $0x1e9] sm:$0xff] }
 0x2da   : > { %v6379_v62 = vpop.f32.mrf.mxu1  ;;  %v3573_v11 = vpop.f32.mrf.mxu0  ;;  %v4131_v25 = vld [vmem:[#allocation2 + $0x209] sm:$0xff]  ;;  %v4150_v27 = vpack.c.bf16 %v4130_v44, %v4129_v58 }
 0x2db   : > { %v6380_v31 = vadd.f32 %v6379_v62, %v6378_v12  ;;  %v8836_v57 = vadd.f32 %v6374_v60, %v3573_v11  ;;  %v4132_v12 = vld [vmem:[#allocation2 + $0x211] sm:$0xff] }
 0x2dc   : > { %v6381_v19 = vpop.f32.mrf.mxu1  ;;  %4459 = vmatmul.mubr.bf16.gmra.mxu1 %v4145_v30  ;;  %v4151_v11 = vpack.c.bf16 %v4132_v12, %v4131_v25 }
 0x2dd   : > { %4466 = vmatprep.mubr.bf16.mxu1 %v4147_v35  ;;  %v8838_v45 = vadd.f32 %v6892_v49, %v6380_v31 }
 0x2de   : > { %v6382_v23 = vpop.f32.mrf.mxu1  ;;  %6982 = vmatmul.mubr.bf16.gmra.mxu0 %v4144_v13 }
 0x2df   : > { %v6383_v40 = vadd.f32 %v6382_v23, %v6381_v19  ;;  %6985 = vmatprep.mubr.bf16.mxu0 %v4145_v30 }
 0x2e0   : > { %v6384_v24 = vpop.f32.mrf.mxu1 }
 0x2e2   : > { %v6385_v53 = vpop.f32.mrf.mxu1 }
 0x2e3   : > { %v6386_v32 = vadd.f32 %v6385_v53, %v6384_v24  ;;  %v4134_v24 = vld [vmem:[#allocation2 + $0x231] sm:$0xff] }
 0x2e4   : > { %v6387_v4 = vpop.f32.mrf.mxu1  ;;  %4467 = vmatmul.mubr.bf16.gmra.mxu1 %v4146_v38  ;;  %v6895_v54 = vpop.f32.mrf.mxu0 }
 0x2e5   : > { %4474 = vmatprep.mubr.bf16.mxu1 %v4148_v2 }
 0x2e6   : > { %v6388_v5 = vpop.f32.mrf.mxu1  ;;  %6986 = vmatmul.mubr.bf16.gmra.mxu0 %v4146_v38  ;;  %v3586_v37 = vpop.f32.mrf.mxu0 }
 0x2e7   : > { %v6389_v63 = vadd.f32 %v6388_v5, %v6387_v4  ;;  %v8840_v59 = vadd.f32 %v6383_v40, %v3586_v37  ;;  %6989 = vmatprep.mubr.bf16.mxu0 %v4147_v35  ;;  %v4133_v40 = vld [vmem:[#allocation2 + $0x229] sm:$0xff] }
 0x2e8   : > { %v6390_v13 = vpop.f32.mrf.mxu1  ;;  %v6896_v50 = vpop.f32.mrf.mxu0 }
 0x2e9   : > { %v8842_v30 = vadd.f32 %v6895_v54, %v6389_v63  ;;  %v4152_v54 = vpack.c.bf16 %v4134_v24, %v4133_v40  ;;  %v3510_v40 = vadd.f32 %v8758_v10, %v8777_v34 }
 0x2ea   : > { %v6391_v16 = vpop.f32.mrf.mxu1  ;;  %v3589_v18 = vpop.f32.mrf.mxu0 }
 0x2eb   : > { %v6392_v48 = vadd.f32 %v6391_v16, %v6390_v13  ;;  %v8844_v14 = vadd.f32 %v6386_v32, %v3589_v18 }
 0x2ec   : > { %v6393_v33 = vpop.f32.mrf.mxu1  ;;  %4475 = vmatmul.mubr.bf16.gmra.mxu1 %v4147_v35 }
 0x2ed   : > { %4482 = vmatprep.mubr.bf16.mxu1 %v4149_v47  ;;  %v8846_v41 = vadd.f32 %v6896_v50, %v6392_v48 }
 0x2ee   : > { %v6394_v60 = vpop.f32.mrf.mxu1  ;;  %6990 = vmatmul.mubr.bf16.gmra.mxu0 %v4148_v2 }
 0x2ef   : > { %v6395_v38 = vadd.f32 %v6394_v60, %v6393_v33  ;;  %6993 = vmatprep.mubr.bf16.mxu0 %v4149_v47 }
 0x2f0   : > { %v6396_v61 = vpop.f32.mrf.mxu1 }
 0x2f2   : > { %v6397_v28 = vpop.f32.mrf.mxu1 }
 0x2f3   : > { %v6398_v7 = vadd.f32 %v6397_v28, %v6396_v61 }
 0x2f4   : > { %v6399_v49 = vpop.f32.mrf.mxu1  ;;  %4483 = vmatmul.mubr.bf16.gmra.mxu1 %v4148_v2 }
 0x2f5   : > { %v6899_v62 = vpop.f32.mrf.mxu0  ;;  %4490 = vmatprep.mubr.bf16.mxu1 %v4150_v27 }
 0x2f6   : > { %v6400_v31 = vpop.f32.mrf.mxu1  ;;  %6994 = vmatmul.mubr.bf16.gmra.mxu0 %v4150_v27 }
 0x2f7   : > { %v3602_v35 = vpop.f32.mrf.mxu0  ;;  %v6401_v19 = vadd.f32 %v6400_v31, %v6399_v49  ;;  %6997 = vmatprep.mubr.bf16.mxu0 %v4151_v11 }
 0x2f8   : > { %v8848_v23 = vadd.f32 %v6395_v38, %v3602_v35  ;;  %v6402_v15 = vpop.f32.mrf.mxu1 }
 0x2f9   : > { %v6900_v36 = vpop.f32.mrf.mxu0  ;;  %v8850_v53 = vadd.f32 %v6899_v62, %v6401_v19 }
 0x2fa   : > { %v6403_v32 = vpop.f32.mrf.mxu1 }
 0x2fb   : > { %v3605_v4 = vpop.f32.mrf.mxu0  ;;  %v6404_v2 = vadd.f32 %v6403_v32, %v6402_v15 }
 0x2fc   : > { %v8852_v5 = vadd.f32 %v6398_v7, %v3605_v4  ;;  %v6405_v37 = vpop.f32.mrf.mxu1  ;;  %4491 = vmatmul.mubr.bf16.gmra.mxu1 %v4149_v47 }
 0x2fd   : > { %4498 = vmatprep.mubr.bf16.mxu1 %v4151_v11  ;;  %v8854_v63 = vadd.f32 %v6900_v36, %v6404_v2 }
 0x2fe   : > { %v6903_v13 = vpop.f32.mrf.mxu0  ;;  %v6406_v1 = vpop.f32.mrf.mxu1  ;;  %6998 = vmatmul.mubr.bf16.gmra.mxu0 %v4152_v54 }
 0x2ff   : > { %v6407_v8 = vadd.f32 %v6406_v1, %v6405_v37 }
 0x300   : > { %v3618_v50 = vpop.f32.mrf.mxu0  ;;  %v6408_v16 = vpop.f32.mrf.mxu1 }
 0x301   : > { %v8856_v18 = vadd.f32 %v6407_v8, %v3618_v50 }
 0x302   : > { %v6904_v48 = vpop.f32.mrf.mxu0  ;;  %v6409_v33 = vpop.f32.mrf.mxu1 }
 0x303   : > { %v6410_v60 = vadd.f32 %v6409_v33, %v6408_v16 }
 0x304   : > { %v3621_v38 = vpop.f32.mrf.mxu0  ;;  %v6411_v61 = vpop.f32.mrf.mxu1  ;;  %4499 = vmatmul.mubr.bf16.gmra.mxu1 %v4150_v27 }
 0x305   : > { %v8858_v58 = vadd.f32 %v6410_v60, %v3621_v38 }
 0x306   : > { %v6457_v47 = vpop.f32.mrf.mxu0  ;;  %v6412_v44 = vpop.f32.mrf.mxu1 }
 0x307   : > { %v6413_v28 = vadd.f32 %v6412_v44, %v6411_v61 }
 0x308   : > { %v6458_v25 = vpop.f32.mrf.mxu0  ;;  %v6414_v12 = vpop.f32.mrf.mxu1 }
 0x309   : > { %v6459_v7 = vadd.f32 %v6458_v25, %v6457_v47  ;;  %v8860_v49 = vadd.f32 %v6903_v13, %v6413_v28 }
 0x30a   : > { %v6460_v62 = vpop.f32.mrf.mxu0  ;;  %v6415_v11 = vpop.f32.mrf.mxu1 }
 0x30b   : > { %v3812_v31 = vadd.f32 %v6459_v7, %v8764_v55  ;;  %v6416_v35 = vadd.f32 %v6415_v11, %v6414_v12  ;;  %v3526_v11 = vadd.f32 %v8779_v52, %v8799_v42 }
 0x30c   : > { %v6461_v19 = vpop.f32.mrf.mxu0  ;;  %v6923_v27 = vpop.f32.mrf.mxu1 }
 0x30d   : > { %v6462_v24 = vadd.f32 %v6461_v19, %v6460_v62  ;;  %v8865_v15 = vadd.f32 %v6904_v48, %v6416_v35 }
 0x30e   : > { %v3972_v36 = vpop.f32.mrf.mxu1  ;;  %v6463_v4 = vpop.f32.mrf.mxu0 }
 0x30f   : > { %v3815_v32 = vadd.f32 %v6462_v24, %v3510_v40  ;;  %v8867_v54 = vadd.f32 %v3972_v36, %v3812_v31 }
 0x310   : > { %v6924_v2 = vpop.f32.mrf.mxu1  ;;  %v6464_v37 = vpop.f32.mrf.mxu0 }
 0x311   : > { %9629 = vst [vmem:[#allocation4_spill] sm:$0xff] %v8867_v54  ;;  %v6465_v13 = vadd.f32 %v6464_v37, %v6463_v4 }
 0x312   : > { %v3975_v1 = vpop.f32.mrf.mxu1  ;;  %v6466_v8 = vpop.f32.mrf.mxu0 }
 0x313   : > { %v8869_v55 = vadd.f32 %v3975_v1, %v3815_v32  ;;  %v3820_v50 = vadd.f32 %v6465_v13, %v8767_v0 }
 0x314   : > { %v6927_v16 = vpop.f32.mrf.mxu1  ;;  %v6467_v10 = vpop.f32.mrf.mxu0 }
 0x315   : > { %9630 = vst [vmem:[#allocation5_spill] sm:$0xff] %v8869_v55  ;;  %v6468_v34 = vadd.f32 %v6467_v10, %v6466_v8  ;;  %v8872_v33 = vadd.f32 %v6923_v27, %v3820_v50 }
 0x316   : > { %v3988_v48 = vpop.f32.mrf.mxu1  ;;  %v6469_v60 = vpop.f32.mrf.mxu0 }
 0x317   : > { %9631 = vst [vmem:[#allocation6_spill] sm:$0xff] %v8872_v33  ;;  %v3823_v38 = vadd.f32 %v6468_v34, %v8773_v3 }
 0x318   : > { %v6928_v61 = vpop.f32.mrf.mxu1  ;;  %v6470_v47 = vpop.f32.mrf.mxu0 }
 0x319   : > { %v6471_v44 = vadd.f32 %v6470_v47, %v6469_v60  ;;  %v8875_v28 = vadd.f32 %v6924_v2, %v3823_v38 }
 0x31a   : > { %v3991_v25 = vpop.f32.mrf.mxu1  ;;  %v6472_v12 = vpop.f32.mrf.mxu0 }
 0x31b   : > { %9632 = vst [vmem:[#allocation7_spill] sm:$0xff] %v8875_v28  ;;  %v3828_v7 = vadd.f32 %v6471_v44, %v8786_v46 }
 0x31c   : > { %v6931_v62 = vpop.f32.mrf.mxu1  ;;  %v6473_v0 = vpop.f32.mrf.mxu0 }
 0x31d   : > { %v6474_v31 = vadd.f32 %v6473_v0, %v6472_v12  ;;  %v8880_v35 = vadd.f32 %v3988_v48, %v3828_v7 }
 0x31e   : > { %v4004_v19 = vpop.f32.mrf.mxu1  ;;  %v6475_v40 = vpop.f32.mrf.mxu0 }
 0x31f   : > { %9633 = vst [vmem:[#allocation8_spill] sm:$0xff] %v8880_v35  ;;  %v3831_v3 = vadd.f32 %v6474_v31, %v3526_v11 }
 0x320   : > { %v6932_v27 = vpop.f32.mrf.mxu1  ;;  %v6476_v24 = vpop.f32.mrf.mxu0 }
 0x321   : > { %v6477_v36 = vadd.f32 %v6476_v24, %v6475_v40  ;;  %v8882_v2 = vadd.f32 %v3991_v25, %v3831_v3 }
 0x322   : > { %v4007_v32 = vpop.f32.mrf.mxu1  ;;  %v6478_v4 = vpop.f32.mrf.mxu0 }
 0x323   : > { %9634 = vst [vmem:[#allocation9_spill] sm:$0xff] %v8882_v2  ;;  %v3836_v46 = vadd.f32 %v6477_v36, %v8789_v9  ;;  %v5851_v2 = vld [vmem:[%s7349_s27 + $0x20] sm:$0x1] }
 0x324   : > { %v8885_v37 = vpop.f32.mrf.mxu1  ;;  %v6479_v13 = vpop.f32.mrf.mxu0 }
 0x325   : > { %v6480_v1 = vadd.f32 %v6479_v13, %v6478_v4  ;;  %v8887_v52 = vadd.f32 %v6927_v16, %v3836_v46 }
 0x326   : > { %v4020_v42 = vpop.f32.mrf.mxu1  ;;  %v6481_v8 = vpop.f32.mrf.mxu0 }
 0x327   : > { %9635 = vst [vmem:[#allocation10_spill] sm:$0xff] %v8887_v52  ;;  %v3839_v50 = vadd.f32 %v6480_v1, %v8795_v29 }
 0x328   : > { %v8890_v10 = vpop.f32.mrf.mxu1  ;;  %v6482_v34 = vpop.f32.mrf.mxu0 }
 0x329   : > { %v6483_v48 = vadd.f32 %v6482_v34, %v6481_v8  ;;  %v8892_v60 = vadd.f32 %v6928_v61, %v3839_v50  ;;  %v5849_v34 = vld [vmem:[%s7349_s27 + $0x18] sm:$0xf] }
 0x32a   : > { %v4023_v38 = vpop.f32.mrf.mxu1  ;;  %v6484_v47 = vpop.f32.mrf.mxu0 }
 0x32b   : > { %9636 = vst [vmem:[#allocation11_spill] sm:$0xff] %v8892_v60  ;;  %v3844_v9 = vadd.f32 %v6483_v48, %v8806_v26  ;;  %v5846_v48 = vld [vmem:[%s7349_s27 + $0xc] sm:$0xf] }
 0x32c   : > { %v8895_v44 = vpop.f32.mrf.mxu1  ;;  %v6485_v25 = vpop.f32.mrf.mxu0 }
 0x32d   : > { %v6486_v12 = vadd.f32 %v6485_v25, %v6484_v47  ;;  %v8897_v16 = vadd.f32 %v4004_v19, %v3844_v9  ;;  %v5850_v25 = vld [vmem:[%s7349_s27 + $0x1c] sm:$0xf] }
 0x32e   : > { %v8899_v7 = vpop.f32.mrf.mxu1  ;;  %v6487_v0 = vpop.f32.mrf.mxu0 }
 0x32f   : > { %9637 = vst [vmem:[#allocation12_spill] sm:$0xff] %v8897_v16  ;;  %v3847_v29 = vadd.f32 %v6486_v12, %v8811_v21 }
 0x330   : > { %v8902_v11 = vpop.f32.mrf.mxu1  ;;  %v6488_v31 = vpop.f32.mrf.mxu0 }
 0x331   : > { %v6489_v61 = vadd.f32 %v6488_v31, %v6487_v0  ;;  %v8904_v40 = vadd.f32 %v4007_v32, %v3847_v29  ;;  %v4855_v29 = vshll.u32 %v5849_v34, 16  ;;  %v4828_v31 = vshrl.u32 %v5846_v48, 16 }
 0x332   : > { %v8906_v26 = vpop.f32.mrf.mxu1  ;;  %v6490_v3 = vpop.f32.mrf.mxu0 }
 0x333   : > { %9638 = vst [vmem:[#allocation13_spill] sm:$0xff] %v8904_v40  ;;  %v3852_v24 = vadd.f32 %v6489_v61, %v8809_v51  ;;  %v4831_v61 = vshll.u32 %v5846_v48, 16  ;;  %v4830_v48 = vrot.slane %v4828_v31, 4 }
 0x334   : > { %v8909_v19 = vpop.f32.mrf.mxu1  ;;  %v6491_v36 = vpop.f32.mrf.mxu0 }
 0x335   : > { %v6492_v4 = vadd.f32 %v6491_v36, %v6490_v3  ;;  %v8911_v46 = vadd.f32 %v6931_v62, %v3852_v24  ;;  %v4861_v24 = vshll.u32 %v5850_v25, 16  ;;  %v4865_v36 = vshrl.u32 %v5850_v25, 16 }
 0x336   : > { %v8913_v21 = vpop.f32.mrf.mxu1  ;;  %v6493_v13 = vpop.f32.mrf.mxu0 }
 0x337   : > { %9639 = vst [vmem:[#allocation14_spill] sm:$0xff] %v8911_v46  ;;  %v3855_v1 = vadd.f32 %v6492_v4, %v8814_v56  ;;  %v4852_v56 = vshrl.u32 %v5849_v34, 16  ;;  %v8937_v25 = vrot.slane %v4861_v24, 5  ;;  %v5856_v24 = vld [vmem:[%s7349_s27 + $0x34] sm:$0xf] }
 0x338   : > { %v8916_v8 = vpop.f32.mrf.mxu1  ;;  %v6494_v32 = vpop.f32.mrf.mxu0 }
 0x339   : > { %v6495_v50 = vadd.f32 %v6494_v32, %v6493_v13  ;;  %v8920_v47 = vadd.f32 %v6932_v27, %v3855_v1  ;;  %v5847_v32 = vld [vmem:[%s7349_s27 + $0x10] sm:$0xf]  ;;  %v4854_v34 = vrot.slane %v4852_v56, 4 }
 0x33a   : > { %v8922_v51 = vpop.f32.mrf.mxu1  ;;  %v6496_v9 = vpop.f32.mrf.mxu0  ;;  %v4841_v46 = vshrl.u32 %v5847_v32, 16 }
 0x33b   : > { %9640 = vst [vmem:[#allocation15_spill] sm:$0xff] %v8920_v47  ;;  %v3860_v62 = vadd.f32 %v6495_v50, %v8820_v20  ;;  %v5855_v20 = vld [vmem:[%s7349_s27 + $0x30] sm:$0xf]  ;;  %v4857_v47 = vrot.slane %v4855_v29, 5 }
 0x33c   : > { %v8926_v12 = vpop.f32.mrf.mxu1  ;;  %v6497_v0 = vpop.f32.mrf.mxu0  ;;  %v4900_v60 = vshrl.u32 %v5855_v20, 16  ;;  %v4903_v35 = vshll.u32 %v5855_v20, 16 }
 0x33d   : > { %v6498_v3 = vadd.f32 %v6497_v0, %v6496_v9  ;;  %v8928_v27 = vadd.f32 %v4020_v42, %v3860_v62  ;;  %v4833_v9 = vrot.slane %v4831_v61, 5  ;;  %v4867_v42 = vrot.slane %v4865_v36, 4  ;;  %v5852_v62 = vld [vmem:[%s7349_s27 + $0x24] sm:$0xf] }
 0x33e   : > { %v8930_v4 = vpop.f32.mrf.mxu1  ;;  %v6499_v13 = vpop.f32.mrf.mxu0  ;;  %v4858_v31 = vor.u32 %v4857_v47, %v4854_v34  ;;  %v4876_v36 = vshrl.u32 %v5852_v62, 16  ;;  %v4902_v55 = vrot.slane %v4900_v60, 4  ;;  %v4905_v47 = vrot.slane %v4903_v35, 5 }
 0x33f   : > { %9641 = vst [vmem:[#allocation16_spill] sm:$0xff] %v8928_v27  ;;  %v3863_v1 = vadd.f32 %v6498_v3, %v8825_v17  ;;  %v4837_v3 = vshll.u32 %v5847_v32, 16  ;;  %v4834_v61 = vor.u32 %v4833_v9, %v4830_v48  ;;  %v5848_v48 = vld [vmem:[%s7349_s27 + $0x14] sm:$0x1]  ;;  %v4909_v9 = vshll.u32 %v5856_v24, 16 }
 0x340   : > { %v8935_v50 = vpop.f32.mrf.mxu1  ;;  %v6500_v40 = vpop.f32.mrf.mxu0 }
 0x341   : > { %v6501_v0 = vadd.f32 %v6500_v40, %v6499_v13  ;;  %v8940_v27 = vadd.f32 %v4023_v38, %v3863_v1  ;;  %v4879_v38 = vshll.u32 %v5852_v62, 16  ;;  %v4868_v1 = vor.u32 %v4867_v42, %v8937_v25 }
 0x342   : > { %v8942_v16 = vpop.f32.mrf.mxu1  ;;  %v6502_v17 = vpop.f32.mrf.mxu0  ;;  %v4913_v62 = vshrl.u32 %v5856_v24, 16  ;;  %v4847_v24 = vshll.u32 %v5848_v48, 16 }
 0x343   : > { %9642 = vst [vmem:[#allocation17_spill] sm:$0xff] %v8940_v27  ;;  %v3868_v56 = vadd.f32 %v6501_v0, %v8823_v22  ;;  %v4871_v27 = vshll.u32 %v5851_v2, 16  ;;  %v4839_v22 = vrot.slane %v4837_v3, 5  ;;  %v4843_v0 = vrot.slane %v4841_v46, 4  ;;  %v5853_v46 = vld [vmem:[%s7349_s27 + $0x28] sm:$0xf] }
 0x344   : > { %v8946_v29 = vpop.f32.mrf.mxu1  ;;  %v6503_v40 = vpop.f32.mrf.mxu0  ;;  %v4859_v2 = vrot.slane %v4858_v31, 4  ;;  %v4869_v28 = vrot.slane %v4868_v1, 4  ;;  %v4911_v31 = vrot.slane %v4909_v9, 5 }
 0x345   : > { %v6504_v13 = vadd.f32 %v6503_v40, %v6502_v17  ;;  %v8951_v32 = vadd.f32 %v8885_v37, %v3868_v56  ;;  %v4835_v40 = vrot.slane %v4834_v61, 4  ;;  %v4878_v37 = vrot.slane %v4876_v36, 4 }
 0x346   : > { %v8953_v52 = vpop.f32.mrf.mxu1  ;;  %v6505_v20 = vpop.f32.mrf.mxu0  ;;  %v4881_v56 = vrot.slane %v4879_v38, 5  ;;  %v4873_v54 = vrot.slane %v4871_v27, 5  ;;  %v4844_v3 = vor.u32 %v4843_v0, %v4839_v22  ;;  %v4915_v61 = vrot.slane %v4913_v62, 4 }
 0x347   : > { %9643 = vst [vmem:[#allocation18_spill] sm:$0xff] %v8951_v32  ;;  %v3871_v34 = vadd.f32 %v6504_v13, %v8827_v43  ;;  %v4906_v13 = vor.u32 %v4905_v47, %v4902_v55  ;;  %v4864_v1 = vsel %vm7380_vm2, %v4859_v2, %v8937_v25  ;;  %v4840_v0 = vsel %vm7380_vm2, %v4835_v40, %v4839_v22  ;;  %v5854_v22 = vld [vmem:[%s7349_s27 + $0x2c] sm:$0x1] }
 0x348   : > { %v8957_v17 = vpop.f32.mrf.mxu1  ;;  %v6506_v42 = vpop.f32.mrf.mxu0  ;;  %v4845_v48 = vrot.slane %v4844_v3, 4  ;;  %v4849_v25 = vrot.slane %v4847_v24, 5  ;;  %v4889_v62 = vshrl.u32 %v5853_v46, 16  ;;  %v8990_v24 = vunpack.c.l.bf16 %v4840_v0 }
 0x349   : > { %9644 = vst [vmem:[#allocation19_spill] sm:$0xff] %v8957_v17  ;;  %v6507_v32 = vadd.f32 %v6506_v42, %v6505_v20  ;;  %v8961_v60 = vadd.f32 %v8890_v10, %v3871_v34  ;;  %v4882_v20 = vor.u32 %v4881_v56, %v4878_v37  ;;  %v4885_v10 = vshll.u32 %v5853_v46, 16  ;;  %v5857_v34 = vld [vmem:[%s7349_s27 + $0x38] sm:$0x1]  ;;  %v5862_v46 = vld [vmem:[%s7349_s27 + $0x4c] sm:$0xf] }
 0x34a   : > { %v8963_v35 = vpop.f32.mrf.mxu1  ;;  %v6508_v43 = vpop.f32.mrf.mxu0  ;;  %v4907_v9 = vrot.slane %v4906_v13, 4  ;;  %v4916_v37 = vor.u32 %v4915_v61, %v4911_v31  ;;  %v4919_v56 = vshll.u32 %v5857_v34, 16  ;;  %9650 = vst [vmem:[#allocation23_spill] sm:$0xff] %v8990_v24  ;;  %v4895_v34 = vshll.u32 %v5854_v22, 16 }
 0x34b   : > { %9645 = vst [vmem:[#allocation20_spill] sm:$0xff] %v8961_v60  ;;  %v3876_v33 = vadd.f32 %v6507_v32, %v8832_v39  ;;  %v4874_v39 = vsel %vm7380_vm2, %v4869_v28, %v4873_v54  ;;  %v4883_v28 = vrot.slane %v4882_v20, 4 }
 0x34c   : > { %v8966_v36 = vpop.f32.mrf.mxu1  ;;  %v6509_v38 = vpop.f32.mrf.mxu0  ;;  %v8992_v13 = vunpack.c.l.bf16 %v4874_v39  ;;  %v4912_v20 = vsel %vm7380_vm2, %v4907_v9, %v4911_v31  ;;  %v9006_v39 = vrot.slane %v4916_v37, 4  ;;  %v4957_v31 = vshll.u32 %v5862_v46, 16 }
 0x34d   : > { %v6510_v42 = vadd.f32 %v6509_v38, %v6508_v43  ;;  %v8977_v55 = vadd.f32 %v8899_v7, %v3876_v33  ;;  %v8985_v33 = vunpack.c.l.bf16 %v4864_v1  ;;  %v8987_v7 = vrot.slane %v4885_v10, 5  ;;  %v5861_v43 = vld [vmem:[%s7349_s27 + $0x48] sm:$0xf] }
 0x34e   : > { %v8979_v32 = vpop.f32.mrf.mxu1  ;;  %v6511_v47 = vpop.f32.mrf.mxu0  ;;  %9651 = vst [vmem:[#allocation24_spill] sm:$0xff] %v8992_v13  ;;  %v4850_v1 = vsel %vm7380_vm2, %v4845_v48, %v4849_v25  ;;  %v4891_v10 = vrot.slane %v4889_v62, 4  ;;  %v4951_v25 = vshll.u32 %v5861_v43, 16  ;;  %v4961_v9 = vshrl.u32 %v5862_v46, 16  ;;  %v5863_v13 = vld [vmem:[%s7349_s27 + $0x50] sm:$0x1] }
 0x34f   : > { %9647 = vst [vmem:[#allocation3_spill] sm:$0xff] %v8977_v55  ;;  %v3879_v2 = vadd.f32 %v6510_v42, %v8836_v57  ;;  %9649 = vst [vmem:[#allocation22_spill] sm:$0xff] %v8985_v33  ;;  %v5858_v42 = vld [vmem:[%s7349_s27 + $0x3c] sm:$0xf]  ;;  %v4888_v48 = vsel %vm7380_vm2, %v4883_v28, %v8987_v7  ;;  %v9015_v22 = vunpack.c.l.bf16 %v4850_v1  ;;  %v9023_v55 = vunpack.c.l.bf16 %v4912_v20  ;;  %v5868_v20 = vld [vmem:[%s7349_s27 + $0x64] sm:$0xf] }
 0x350   : > { %v8983_v40 = vpop.f32.mrf.mxu1  ;;  %v6512_v54 = vpop.f32.mrf.mxu0  ;;  %v4924_v37 = vshrl.u32 %v5858_v42, 16  ;;  %v4892_v28 = vor.u32 %v4891_v10, %v8987_v7  ;;  %v4927_v46 = vshll.u32 %v5858_v42, 16  ;;  %v9029_v1 = vunpack.c.l.bf16 %v4888_v48 }
 0x351   : > { %9648 = vst [vmem:[#allocation21_spill] sm:$0xff] %v8983_v40  ;;  %v6513_v3 = vadd.f32 %v6512_v54, %v6511_v47  ;;  %v8996_v57 = vadd.f32 %v8906_v26, %v3879_v2  ;;  %v9008_v47 = vrot.slane %v4919_v56, 5  ;;  %v4948_v26 = vshrl.u32 %v5861_v43, 16  ;;  %9654 = vst [vmem:[#allocation27_spill] sm:$0xff] %v9015_v22 }
 0x352   : > { %v8998_v61 = vpop.f32.mrf.mxu1  ;;  %v6514_v38 = vpop.f32.mrf.mxu0  ;;  %9656 = vst [vmem:[#allocation29_spill] sm:$0xff] %v9023_v55  ;;  %v9026_v43 = vrot.slane %v4895_v34, 5  ;;  %9657 = vst [vmem:[#allocation30_spill] sm:$0xff] %v9029_v1  ;;  %v4953_v7 = vrot.slane %v4951_v25, 5  ;;  %v9039_v10 = vrot.slane %v4957_v31, 5  ;;  %v4963_v42 = vrot.slane %v4961_v9, 4 }
 0x353   : > { %9652 = vst [vmem:[#allocation25_spill] sm:$0xff] %v8996_v57  ;;  %9653 = vst [vmem:[#allocation26_spill] sm:$0xff] %v8998_v61  ;;  %v3884_v0 = vadd.f32 %v6513_v3, %v8834_v6  ;;  %v5859_v6 = vld [vmem:[%s7349_s27 + $0x40] sm:$0xf]  ;;  %v4929_v22 = vrot.slane %v4927_v46, 5  ;;  %v5005_v25 = vshll.u32 %v5868_v20, 16 }
 0x354   : > { %v9010_v2 = vpop.f32.mrf.mxu1  ;;  %v6515_v54 = vpop.f32.mrf.mxu0  ;;  %v4933_v34 = vshll.u32 %v5859_v6, 16  ;;  %v4937_v1 = vshrl.u32 %v5859_v6, 16  ;;  %v5009_v61 = vshrl.u32 %v5868_v20, 16  ;;  %v4964_v46 = vor.u32 %v4963_v42, %v9039_v10 }
 0x355   : > { %v6516_v62 = vadd.f32 %v6515_v54, %v6514_v38  ;;  %v9019_v56 = vadd.f32 %v8895_v44, %v3884_v0  ;;  %v4950_v0 = vrot.slane %v4948_v26, 4  ;;  %v5867_v54 = vld [vmem:[%s7349_s27 + $0x60] sm:$0xf] }
 0x356   : > { %v9021_v3 = vpop.f32.mrf.mxu1  ;;  %v6517_v57 = vpop.f32.mrf.mxu0  ;;  %v4996_v24 = vshrl.u32 %v5867_v54, 16  ;;  %v4999_v33 = vshll.u32 %v5867_v54, 16  ;;  %v4967_v54 = vshll.u32 %v5863_v13, 16  ;;  %v4939_v17 = vrot.slane %v4937_v1, 4  ;;  %v5869_v13 = vld [vmem:[%s7349_s27 + $0x68] sm:$0x1] }
 0x357   : > { %9655 = vst [vmem:[#allocation28_spill] sm:$0xff] %v9019_v56  ;;  %v3887_v38 = vadd.f32 %v6516_v62, %v8838_v45  ;;  %v5864_v45 = vld [vmem:[%s7349_s27 + $0x54] sm:$0xf]  ;;  %v4926_v62 = vrot.slane %v4924_v37, 4  ;;  %v4954_v6 = vor.u32 %v4953_v7, %v4950_v0  ;;  %v9053_v37 = vrot.slane %v4933_v34, 5 }
 0x358   : > { %v9037_v56 = vpop.f32.mrf.mxu1  ;;  %v6518_v60 = vpop.f32.mrf.mxu0  ;;  %v4972_v9 = vshrl.u32 %v5864_v45, 16  ;;  %v4975_v40 = vshll.u32 %v5864_v45, 16  ;;  %v5865_v0 = vld [vmem:[%s7349_s27 + $0x58] sm:$0xf] }
 0x359   : > { %v6519_v48 = vadd.f32 %v6518_v60, %v6517_v57  ;;  %v9043_v55 = vadd.f32 %v8902_v11, %v3887_v38  ;;  %v9051_v11 = vrot.slane %v4892_v28, 4  ;;  %v5001_v28 = vrot.slane %v4999_v33, 5 }
 0x35a   : > { %v9045_v44 = vpop.f32.mrf.mxu1  ;;  %v6520_v26 = vpop.f32.mrf.mxu0  ;;  %v4974_v34 = vrot.slane %v4972_v9, 4  ;;  %v4977_v42 = vrot.slane %v4975_v40, 5  ;;  %v4965_v33 = vrot.slane %v4964_v46, 4 }
 0x35b   : > { %9658 = vst [vmem:[#allocation31_spill] sm:$0xff] %v9043_v55  ;;  %9659 = vst [vmem:[#allocation32_spill] sm:$0xff] %v9045_v44  ;;  %v3892_v31 = vadd.f32 %v6519_v48, %v8840_v59  ;;  %v5860_v55 = vld [vmem:[%s7349_s27 + $0x44] sm:$0x1]  ;;  %v4930_v48 = vor.u32 %v4929_v22, %v4926_v62  ;;  %v9062_v44 = vrot.slane %v5005_v25, 5  ;;  %v4898_v22 = vsel %vm7380_vm2, %v9051_v11, %v9026_v43 }
 0x35c   : > { %v9049_v60 = vpop.f32.mrf.mxu1  ;;  %v6521_v57 = vpop.f32.mrf.mxu0  ;;  %v4943_v62 = vshll.u32 %v5860_v55, 16  ;;  %v4978_v11 = vor.u32 %v4977_v42, %v4974_v34 }
 0x35d   : > { %9660 = vst [vmem:[#allocation33_spill] sm:$0xff] %v9049_v60  ;;  %v6522_v38 = vadd.f32 %v6521_v57, %v6520_v26  ;;  %v9058_v59 = vadd.f32 %v8913_v21, %v3892_v31  ;;  %v4998_v60 = vrot.slane %v4996_v24, 4  ;;  %v5011_v26 = vrot.slane %v5009_v61, 4 }
 0x35e   : > { %v9060_v20 = vpop.f32.mrf.mxu1  ;;  %v6523_v45 = vpop.f32.mrf.mxu0  ;;  %v4955_v24 = vrot.slane %v4954_v6, 4  ;;  %v4969_v31 = vrot.slane %v4967_v54, 5  ;;  %v4940_v57 = vor.u32 %v4939_v17, %v9053_v37  ;;  %v4985_v6 = vshrl.u32 %v5865_v0, 16 }
 0x35f   : > { %9661 = vst [vmem:[#allocation34_spill] sm:$0xff] %v9058_v59  ;;  %9662 = vst [vmem:[#allocation35_spill] sm:$0xff] %v9060_v20  ;;  %v3895_v7 = vadd.f32 %v6522_v38, %v8844_v14  ;;  %v5873_v14 = vld [vmem:[%s7349_s27 + $0x78] sm:$0xf]  ;;  %v4931_v38 = vrot.slane %v4930_v48, 4  ;;  %v5002_v59 = vor.u32 %v5001_v28, %v4998_v60  ;;  %v5015_v20 = vshll.u32 %v5869_v13, 16 }
 0x360   : > { %v9067_v1 = vpop.f32.mrf.mxu1  ;;  %v6524_v21 = vpop.f32.mrf.mxu0  ;;  %v5012_v55 = vor.u32 %v5011_v26, %v9062_v44  ;;  %v4945_v54 = vrot.slane %v4943_v62, 5  ;;  %v5047_v48 = vshll.u32 %v5873_v14, 16  ;;  %v4970_v28 = vsel %vm7380_vm2, %v4965_v33, %v4969_v31  ;;  %v5866_v62 = vld [vmem:[%s7349_s27 + $0x5c] sm:$0x1] }
 0x361   : > { %9663 = vst [vmem:[#allocation36_spill] sm:$0xff] %v9067_v1  ;;  %v6525_v25 = vadd.f32 %v6524_v21, %v6523_v45  ;;  %v9076_v40 = vadd.f32 %v8922_v51, %v3895_v7  ;;  %v4981_v1 = vshll.u32 %v5865_v0, 16  ;;  %v4960_v51 = vsel %vm7380_vm2, %v4955_v24, %v9039_v10 }
 0x362   : > { %v9078_v61 = vpop.f32.mrf.mxu1  ;;  %v6526_v9 = vpop.f32.mrf.mxu0  ;;  %v5044_v45 = vshrl.u32 %v5873_v14, 16  ;;  %v4936_v42 = vsel %vm7380_vm2, %v4931_v38, %v9053_v37  ;;  %v5003_v10 = vrot.slane %v5002_v59, 4  ;;  %v5017_v26 = vrot.slane %v5015_v20, 5  ;;  %v5874_v38 = vld [vmem:[%s7349_s27 + $0x7c] sm:$0xf] }
 0x363   : > { %9664 = vst [vmem:[#allocation37_spill] sm:$0xff] %v9076_v40  ;;  %v3900_v43 = vadd.f32 %v6525_v25, %v8842_v30  ;;  %v4941_v30 = vrot.slane %v4940_v57, 4  ;;  %v4983_v13 = vrot.slane %v4981_v1, 5  ;;  %v4979_v24 = vrot.slane %v4978_v11, 4 }
 0x364   : > { %v9082_v46 = vpop.f32.mrf.mxu1  ;;  %v6527_v17 = vpop.f32.mrf.mxu0  ;;  %v5013_v33 = vrot.slane %v5012_v55, 4  ;;  %v4987_v25 = vrot.slane %v4985_v6, 4  ;;  %v9666_v57 = vsel %vm7380_vm2, %v9006_v39, %v9008_v47  ;;  %v9108_v59 = vunpack.c.l.bf16 %v4898_v22 }
 0x365   : > { %v6528_v60 = vadd.f32 %v6527_v17, %v6526_v9  ;;  %v9090_v0 = vadd.f32 %v8909_v19, %v3900_v43  ;;  %v9106_v37 = vunpack.c.l.bf16 %v9666_v57  ;;  %v5046_v20 = vrot.slane %v5044_v45, 4  ;;  %v5870_v43 = vld [vmem:[%s7349_s27 + $0x6c] sm:$0xf] }
 0x366   : > { %v9092_v7 = vpop.f32.mrf.mxu1  ;;  %v6529_v34 = vpop.f32.mrf.mxu0  ;;  %v5049_v1 = vrot.slane %v5047_v48, 5  ;;  %v9110_v14 = vunpack.c.l.bf16 %v4960_v51  ;;  %v9112_v9 = vunpack.c.l.bf16 %v4970_v28  ;;  %v9121_v47 = vunpack.c.l.bf16 %v4936_v42  ;;  %v5871_v51 = vld [vmem:[%s7349_s27 + $0x70] sm:$0xf] }
 0x367   : > { %9665 = vst [vmem:[#allocation38_spill] sm:$0xff] %v9090_v0  ;;  %v3903_v21 = vadd.f32 %v6528_v60, %v8846_v41  ;;  %v4946_v22 = vsel %vm7380_vm2, %v4941_v30, %v4945_v54  ;;  %v5008_v55 = vsel %vm7380_vm2, %v5003_v10, %v9062_v44  ;;  %v4991_v17 = vshll.u32 %v5866_v62, 16 }
 0x368   : > { %v9099_v19 = vpop.f32.mrf.mxu1  ;;  %v6530_v31 = vpop.f32.mrf.mxu0  ;;  %9667 = vst [vmem:[#allocation39_spill] sm:$0xff] %v9110_v14  ;;  %9668 = vst [vmem:[#allocation40_spill] sm:$0xff] %v9112_v9  ;;  %v5018_v48 = vsel %vm7380_vm2, %v5013_v33, %v5017_v26  ;;  %v4988_v60 = vor.u32 %v4987_v25, %v4983_v13  ;;  %v5050_v42 = vor.u32 %v5049_v1, %v5046_v20  ;;  %v5053_v54 = vshll.u32 %v5874_v38, 16 }
 0x369   : > { %v6531_v41 = vadd.f32 %v6530_v31, %v6529_v34  ;;  %v9117_v11 = vadd.f32 %v8916_v8, %v3903_v21  ;;  %9670 = vst [vmem:[#allocation42_spill] sm:$0xff] %v9121_v47  ;;  %v4984_v8 = vsel %vm7380_vm2, %v4979_v24, %v4983_v13  ;;  %v5057_v30 = vshrl.u32 %v5874_v38, 16  ;;  %v5880_v38 = vld [vmem:[%s7349_s27 + $0x94] sm:$0xf] }
 0x36a   : > { %v9119_v6 = vpop.f32.mrf.mxu1  ;;  %v6532_v39 = vpop.f32.mrf.mxu0  ;;  %v5020_v21 = vshrl.u32 %v5870_v43, 16  ;;  %v5023_v10 = vshll.u32 %v5870_v43, 16  ;;  %v5029_v62 = vshll.u32 %v5871_v51, 16  ;;  %v9141_v26 = vunpack.c.l.bf16 %v4946_v22 }
 0x36b   : > { %9669 = vst [vmem:[#allocation41_spill] sm:$0xff] %v9117_v11  ;;  %v3908_v45 = vadd.f32 %v6531_v41, %v8848_v23  ;;  %v9143_v13 = vunpack.c.l.bf16 %v5008_v55  ;;  %v9145_v33 = vrot.slane %v4991_v17, 5  ;;  %v5033_v25 = vshrl.u32 %v5871_v51, 16  ;;  %v5879_v41 = vld [vmem:[%s7349_s27 + $0x90] sm:$0xf] }
 0x36c   : > { %v9134_v28 = vpop.f32.mrf.mxu1  ;;  %v6533_v34 = vpop.f32.mrf.mxu0  ;;  %9672 = vst [vmem:[#allocation44_spill] sm:$0xff] %v9141_v26  ;;  %v9148_v20 = vunpack.c.l.bf16 %v4984_v8  ;;  %v9150_v1 = vunpack.c.l.bf16 %v5018_v48  ;;  %v9158_v22 = vrot.slane %v5050_v42, 4  ;;  %v9160_v55 = vrot.slane %v5053_v54, 5  ;;  %v5875_v48 = vld [vmem:[%s7349_s27 + $0x80] sm:$0x1] }
 0x36d   : > { %v6534_v44 = vadd.f32 %v6533_v34, %v6532_v39  ;;  %v9137_v23 = vadd.f32 %v8930_v4, %v3908_v45  ;;  %9673 = vst [vmem:[#allocation45_spill] sm:$0xff] %v9143_v13  ;;  %v9152_v4 = vrot.slane %v4988_v60, 4  ;;  %v5022_v17 = vrot.slane %v5020_v21, 4 }
 0x36e   : > { %v9139_v24 = vpop.f32.mrf.mxu1  ;;  %v6535_v31 = vpop.f32.mrf.mxu0  ;;  %9674 = vst [vmem:[#allocation46_spill] sm:$0xff] %v9148_v20  ;;  %9675 = vst [vmem:[#allocation47_spill] sm:$0xff] %v9150_v1  ;;  %v5059_v51 = vrot.slane %v5057_v30, 4  ;;  %v5025_v8 = vrot.slane %v5023_v10, 5  ;;  %v9163_v34 = vrot.slane %v5029_v62, 5  ;;  %v5035_v42 = vrot.slane %v5033_v25, 4 }
 0x36f   : > { %9671 = vst [vmem:[#allocation43_spill] sm:$0xff] %v9137_v23  ;;  %v3911_v57 = vadd.f32 %v6534_v44, %v8852_v5  ;;  %v5876_v5 = vld [vmem:[%s7349_s27 + $0x84] sm:$0xf]  ;;  %v5872_v44 = vld [vmem:[%s7349_s27 + $0x74] sm:$0x1]  ;;  %v5092_v11 = vshrl.u32 %v5879_v41, 16  ;;  %v4994_v21 = vsel %vm7380_vm2, %v9152_v4, %v9145_v33  ;;  %v5056_v25 = vsel %vm7380_vm2, %v9158_v22, %v9160_v55 }
 0x370   : > { %v9156_v43 = vpop.f32.mrf.mxu1  ;;  %v6536_v39 = vpop.f32.mrf.mxu0  ;;  %v5095_v54 = vshll.u32 %v5879_v41, 16  ;;  %v5101_v0 = vshll.u32 %v5880_v38, 16  ;;  %v5068_v10 = vshrl.u32 %v5876_v5, 16  ;;  %v5071_v62 = vshll.u32 %v5876_v5, 16  ;;  %v5885_v4 = vld [vmem:[%s7349_s27 + $0xa8] sm:$0xf] }
 0x371   : > { %v6537_v45 = vadd.f32 %v6536_v39, %v6535_v31  ;;  %v9168_v60 = vadd.f32 %v8942_v16, %v3911_v57  ;;  %v5063_v57 = vshll.u32 %v5875_v48, 16  ;;  %v5039_v41 = vshll.u32 %v5872_v44, 16  ;;  %v5881_v44 = vld [vmem:[%s7349_s27 + $0x98] sm:$0x1] }
 0x372   : > { %v9170_v23 = vpop.f32.mrf.mxu1  ;;  %v6538_v40 = vpop.f32.mrf.mxu0  ;;  %v5105_v39 = vshrl.u32 %v5880_v38, 16  ;;  %v5060_v1 = vor.u32 %v5059_v51, %v9160_v55  ;;  %v5036_v13 = vor.u32 %v5035_v42, %v9163_v34  ;;  %v5094_v26 = vrot.slane %v5092_v11, 4 }
 0x373   : > { %9676 = vst [vmem:[#allocation48_spill] sm:$0xff] %v9168_v60  ;;  %v3916_v30 = vadd.f32 %v6537_v45, %v8850_v53  ;;  %v5877_v60 = vld [vmem:[%s7349_s27 + $0x88] sm:$0xf]  ;;  %v5026_v45 = vor.u32 %v5025_v8, %v5022_v17  ;;  %v5097_v22 = vrot.slane %v5095_v54, 5  ;;  %v9192_v48 = vrot.slane %v5101_v0, 5 }
 0x374   : > { %v9177_v16 = vpop.f32.mrf.mxu1  ;;  %v6539_v31 = vpop.f32.mrf.mxu0  ;;  %v5073_v17 = vrot.slane %v5071_v62, 5  ;;  %v5077_v8 = vshll.u32 %v5877_v60, 16  ;;  %v5065_v47 = vrot.slane %v5063_v57, 5  ;;  %v5041_v11 = vrot.slane %v5039_v41, 5 }
 0x375   : > { %v6540_v53 = vadd.f32 %v6539_v31, %v6538_v40  ;;  %v9186_v33 = vadd.f32 %v8926_v12, %v3916_v30  ;;  %v5070_v40 = vrot.slane %v5068_v10, 4  ;;  %v5081_v12 = vshrl.u32 %v5877_v60, 16 }
 0x376   : > { %v9189_v5 = vpop.f32.mrf.mxu1  ;;  %v6541_v20 = vpop.f32.mrf.mxu0  ;;  %v5107_v30 = vrot.slane %v5105_v39, 4  ;;  %v5140_v31 = vshrl.u32 %v5885_v4, 16  ;;  %v5027_v54 = vrot.slane %v5026_v45, 4  ;;  %v5061_v10 = vrot.slane %v5060_v1, 4 }
 0x377   : > { %9677 = vst [vmem:[#allocation49_spill] sm:$0xff] %v9186_v33  ;;  %v3919_v38 = vadd.f32 %v6540_v53, %v8854_v63  ;;  %v5143_v33 = vshll.u32 %v5885_v4, 16  ;;  %v5037_v62 = vrot.slane %v5036_v13, 4  ;;  %v5098_v53 = vor.u32 %v5097_v22, %v5094_v26  ;;  %v5878_v4 = vld [vmem:[%s7349_s27 + $0x8c] sm:$0x1] }
 0x378   : > { %v9195_v55 = vpop.f32.mrf.mxu1  ;;  %v6542_v51 = vpop.f32.mrf.mxu0  ;;  %v5074_v39 = vor.u32 %v5073_v17, %v5070_v40  ;;  %v9204_v14 = vrot.slane %v5077_v8, 5  ;;  %v9210_v13 = vunpack.c.l.bf16 %v4994_v21  ;;  %v9212_v26 = vunpack.c.l.bf16 %v5056_v25 }
 0x379   : > { %v6543_v9 = vadd.f32 %v6542_v51, %v6541_v20  ;;  %v9199_v0 = vadd.f32 %v8935_v50, %v3919_v38  ;;  %v5111_v20 = vshll.u32 %v5881_v44, 16  ;;  %v5108_v50 = vor.u32 %v5107_v30, %v9192_v48  ;;  %v5882_v44 = vld [vmem:[%s7349_s27 + $0x9c] sm:$0xf] }
 0x37a   : > { %v9201_v42 = vpop.f32.mrf.mxu1  ;;  %v6544_v63 = vpop.f32.mrf.mxu0  ;;  %v5083_v38 = vrot.slane %v5081_v12, 4  ;;  %v5142_v51 = vrot.slane %v5140_v31, 4  ;;  %v5032_v40 = vsel %vm7380_vm2, %v5027_v54, %v9163_v34  ;;  %v5042_v21 = vsel %vm7380_vm2, %v5037_v62, %v5041_v11 }
 0x37b   : > { %9678 = vst [vmem:[#allocation50_spill] sm:$0xff] %v9199_v0  ;;  %v3924_v60 = vadd.f32 %v6543_v9, %v8856_v18  ;;  %v5145_v0 = vrot.slane %v5143_v33, 5  ;;  %v5886_v18 = vld [vmem:[%s7349_s27 + $0xac] sm:$0xf]  ;;  %v5066_v33 = vsel %vm7380_vm2, %v5061_v10, %v5065_v47  ;;  %v5099_v17 = vrot.slane %v5098_v53, 4 }
 0x37c   : > { %v9206_v57 = vpop.f32.mrf.mxu1  ;;  %v6545_v41 = vpop.f32.mrf.mxu0  ;;  %v5075_v8 = vrot.slane %v5074_v39, 4  ;;  %v5113_v12 = vrot.slane %v5111_v20, 5  ;;  %v5149_v54 = vshll.u32 %v5886_v18, 16  ;;  %v9232_v47 = vunpack.c.l.bf16 %v5032_v40 }
 0x37d   : > { %v6546_v1 = vadd.f32 %v6545_v41, %v6544_v63  ;;  %v9216_v9 = vadd.f32 %v8953_v52, %v3924_v60  ;;  %v5087_v52 = vshll.u32 %v5878_v4, 16  ;;  %v5109_v63 = vrot.slane %v5108_v50, 4 }
 0x37e   : > { %v9218_v45 = vpop.f32.mrf.mxu1  ;;  %v6547_v22 = vpop.f32.mrf.mxu0  ;;  %v5084_v60 = vor.u32 %v5083_v38, %v9204_v14  ;;  %v5146_v34 = vor.u32 %v5145_v0, %v5142_v51  ;;  %v9234_v10 = vunpack.c.l.bf16 %v5066_v33  ;;  %v5104_v53 = vsel %vm7380_vm2, %v5099_v17, %v9192_v48 }
 0x37f   : > { %9679 = vst [vmem:[#allocation51_spill] sm:$0xff] %v9216_v9  ;;  %v3927_v25 = vadd.f32 %v6546_v1, %v8858_v58  ;;  %v5153_v39 = vshrl.u32 %v5886_v18, 16  ;;  %v5116_v20 = vshrl.u32 %v5882_v44, 16  ;;  %v5119_v0 = vshll.u32 %v5882_v44, 16 }
 0x380   : > { %v9229_v30 = vpop.f32.mrf.mxu1  ;;  %v6548_v31 = vpop.f32.mrf.mxu0  ;;  %v9245_v4 = vunpack.c.l.bf16 %v5042_v21  ;;  %v5089_v38 = vrot.slane %v5087_v52, 5  ;;  %v5085_v48 = vrot.slane %v5084_v60, 4  ;;  %v5147_v18 = vrot.slane %v5146_v34, 4  ;;  %v5887_v60 = vld [vmem:[%s7349_s27 + $0xb0] sm:$0x1] }
 0x381   : > { %v6549_v41 = vadd.f32 %v6548_v31, %v6547_v22  ;;  %v9237_v11 = vadd.f32 %v8963_v35, %v3927_v25  ;;  %v5080_v35 = vsel %vm7380_vm2, %v5075_v8, %v9204_v14  ;;  %v5114_v22 = vsel %vm7380_vm2, %v5109_v63, %v5113_v12  ;;  %v5883_v14 = vld [vmem:[%s7349_s27 + $0xa0] sm:$0xf] }
 0x382   : > { %v9239_v58 = vpop.f32.mrf.mxu1  ;;  %v6550_v62 = vpop.f32.mrf.mxu0  ;;  %v5151_v40 = vrot.slane %v5149_v54, 5  ;;  %v9259_v17 = vunpack.c.l.bf16 %v5104_v53  ;;  %v6595_v25 = vadd.f32 %v8979_v32, %v8966_v36  ;;  %v5118_v52 = vrot.slane %v5116_v20, 4  ;;  %v9277_v36 = vld [vmem:[%s9619_s5] ss:$0 sm:$0xff]  ;;  %v9682_v53 = vld [vmem:[#allocation32_spill] sm:$0xff] }
 0x383   : > { %9680 = vst [vmem:[#allocation52_spill] sm:$0xff] %v9237_v11  ;;  %v3932_v50 = vadd.f32 %v6549_v41, %v8860_v49  ;;  %v6601_v49 = vadd.f32 %v9021_v3, %v9010_v2  ;;  %v5121_v44 = vrot.slane %v5119_v0, 5  ;;  %v5155_v31 = vrot.slane %v5153_v39, 4  ;;  %v9683_v20 = vld [vmem:[#allocation19_spill] sm:$0xff] }
 0x384   : > { %v9250_v51 = vpop.f32.mrf.mxu1  ;;  %v6551_v1 = vpop.f32.mrf.mxu0  ;;  %v9267_v3 = vunpack.c.l.bf16 %v5080_v35  ;;  %v5090_v54 = vsel %vm7380_vm2, %v5085_v48, %v5089_v38  ;;  %v5125_v41 = vshll.u32 %v5883_v14, 16  ;;  %v6604_v39 = vadd.f32 %v9682_v53, %v9037_v56  ;;  %v9297_v38 = vld [vmem:[%s9620_s6] ss:$0 sm:$0xff] }
 0x385   : > { %v9257_v33 = vadd.f32 %v8946_v29, %v3932_v50  ;;  %v6552_v21 = vadd.f32 %v6551_v1, %v6550_v62  ;;  %v9269_v29 = vunpack.c.l.bf16 %v5114_v22  ;;  %v5129_v62 = vshrl.u32 %v5883_v14, 16  ;;  %v9685_v50 = vld [vmem:[#allocation6_spill] sm:$0xff]  ;;  %v5884_v22 = vld [vmem:[%s7349_s27 + $0xa4] sm:$0x1] }
 0x386   : > { %v9264_v8 = vpop.f32.mrf.mxu1  ;;  %v6971_v12 = vpop.f32.mrf.mxu0  ;;  %v5122_v56 = vor.u32 %v5121_v44, %v5118_v52  ;;  %v5159_v14 = vshll.u32 %v5887_v60, 16  ;;  %v9301_v53 = vunpack.c.l.bf16 %v5090_v54  ;;  %v5135_v11 = vshll.u32 %v5884_v22, 16  ;;  %v9689_v44 = vld [vmem:[#allocation7_spill] sm:$0xff] }
 0x387   : > { %9681 = vst [vmem:[#allocation53_spill] sm:$0xff] %v9257_v33  ;;  %v3935_v63 = vadd.f32 %v6552_v21, %v8865_v15  ;;  %v4550_v2 = vadd.f32 %v6971_v12, %v6601_v49  ;;  %v5152_v15 = vsel %vm7380_vm2, %v5147_v18, %v5151_v40  ;;  %v9686_v49 = vld [vmem:[#allocation21_spill] sm:$0xff]  ;;  %v9687_v21 = vld [vmem:[#allocation26_spill] sm:$0xff]  ;;  %v5156_v18 = vor.u32 %v5155_v31, %v5151_v40  ;;  %v9691_v22 = vld [vmem:[#allocation35_spill] sm:$0xff] }
 0x388   : > { %v9272_v34 = vpop.f32.mrf.mxu1  ;;  %v4541_v32 = vpop.f32.mrf.mxu0  ;;  %v6598_v12 = vadd.f32 %v9687_v21, %v9686_v49  ;;  %v9305_v49 = vunpack.c.l.bf16 %v5152_v15  ;;  %v9307_v21 = vrot.slane %v5125_v41, 5  ;;  %v6613_v54 = vadd.f32 %v9092_v7, %v9082_v46  ;;  %v9693_v7 = vld [vmem:[#allocation5_spill] sm:$0xff] }
 0x389   : > { %v9286_v0 = vadd.f32 %v9683_v20, %v3935_v63  ;;  %v4670_v35 = vadd.f32 %v4550_v2, %v9685_v50  ;;  %v4542_v1 = vadd.f32 %v6595_v25, %v4541_v32  ;;  %v9688_v2 = vld [vmem:[#allocation4_spill] sm:$0xff]  ;;  %v9319_v41 = vrot.slane %v5122_v56, 4 }
 0x38a   : > { %v9292_v33 = vpop.f32.mrf.mxu1  ;;  %v6972_v48 = vpop.f32.mrf.mxu0 }
 0x38b   : > { %9684 = vst [vmem:[#allocation32_spill] sm:$0xff] %v9286_v0  ;;  %v4709_v63 = vmul.f32 %v9277_v36, %v4670_v35  ;;  %v4668_v25 = vadd.f32 %v4542_v1, %v9688_v2  ;;  %v4553_v32 = vadd.f32 %v6972_v48, %v6604_v39  ;;  %v9309_v0 = vrot.slane %v5129_v62, 4  ;;  %v9690_v1 = vld [vmem:[#allocation33_spill] sm:$0xff] }
 0x38c   : > { %v9303_v20 = vpop.f32.mrf.mxu1  ;;  %v4544_v50 = vpop.f32.mrf.mxu0  ;;  %v9321_v62 = vrot.slane %v5156_v18, 4  ;;  %v9323_v35 = vrot.slane %v5159_v14, 5  ;;  %v6607_v48 = vadd.f32 %v9691_v22, %v9690_v1 }
 0x38d   : > { %v4748_v40 = vadd.f32 %v9297_v38, %v4709_v63  ;;  %v4707_v52 = vmul.f32 %v9277_v36, %v4668_v25  ;;  %v4671_v31 = vadd.f32 %v4553_v32, %v9689_v44  ;;  %v4545_v60 = vadd.f32 %v6598_v12, %v4544_v50  ;;  %v9692_v63 = vld [vmem:[#allocation22_spill] sm:$0xff]  ;;  %v9331_v32 = vld [vmem:[%s7349_s27 + $0xc0] sm:$0xf] }
 0x38e   : > { %v9317_v39 = vpop.f32.mrf.mxu1  ;;  %v6975_v15 = vpop.f32.mrf.mxu0  ;;  %v5132_v50 = vor.u32 %v9309_v0, %v9307_v21  ;;  %v9694_v44 = vld [vmem:[#allocation23_spill] sm:$0xff]  ;;  %v9696_v0 = vld [vmem:[#allocation36_spill] sm:$0xff] }
 0x38f   : > { %v5277_v2 = vadd.f32 %v9692_v63, %v4748_v40  ;;  %v4746_v25 = vadd.f32 %v9297_v38, %v4707_v52  ;;  %v4710_v12 = vmul.f32 %v9277_v36, %v4671_v31  ;;  %v4669_v56 = vadd.f32 %v4545_v60, %v9693_v7 }
 0x390   : > { %v9338_v46 = vpop.f32.mrf.mxu1  ;;  %v4566_v18 = vadd.f32 %v6975_v15, %v6613_v54  ;;  %v4557_v14 = vpop.f32.mrf.mxu0  ;;  %v9343_v40 = vrot.slane %v5135_v11, 5  ;;  %v6616_v63 = vadd.f32 %v9119_v6, %v9099_v19  ;;  %v9695_v54 = vld [vmem:[#allocation10_spill] sm:$0xff]  ;;  %v5191_v11 = vshll.u32 %v9331_v32, 16 }
 0x391   : > { %v5309_v52 = vmax.f32 %v5277_v2, 0.0  ;;  %v5275_v31 = vadd.f32 %v9694_v44, %v4746_v25  ;;  %v4749_v1 = vadd.f32 %v9297_v38, %v4710_v12  ;;  %v4558_v22 = vadd.f32 %v6607_v48, %v4557_v14  ;;  %v9697_v12 = vld [vmem:[#allocation24_spill] sm:$0xff] }
 0x392   : > { %v9349_v9 = vpop.f32.mrf.mxu1  ;;  %v4708_v60 = vmul.f32 %v9277_v36, %v4669_v56  ;;  %v4674_v15 = vadd.f32 %v4566_v18, %v9695_v54  ;;  %v6976_v7 = vpop.f32.mrf.mxu0  ;;  %v6610_v2 = vadd.f32 %v9078_v61, %v9696_v0  ;;  %v9698_v14 = vld [vmem:[#allocation8_spill] sm:$0xff]  ;;  %v6625_v61 = vadd.f32 %v9189_v5, %v9177_v16 }
 0x393   : > { %5341 = vst [vmem:[%s9336_s23 + $0x10] sm:$0xff] %v5309_v52  ;;  %v5307_v25 = vmax.f32 %v5275_v31, 0.0  ;;  %v5278_v48 = vadd.f32 %v9697_v12, %v4749_v1  ;;  %v4672_v44 = vadd.f32 %v4558_v22, %v9698_v14  ;;  %v4569_v18 = vadd.f32 %v6976_v7, %v6616_v63  ;;  %v9699_v22 = vld [vmem:[#allocation27_spill] sm:$0xff] }
 0x394   : > { %v4747_v19 = vadd.f32 %v9297_v38, %v4708_v60  ;;  %v9360_v6 = vpop.f32.mrf.mxu1  ;;  %v4713_v56 = vmul.f32 %v9277_v36, %v4674_v15  ;;  %v4560_v54 = vpop.f32.mrf.mxu0  ;;  %v9700_v15 = vld [vmem:[#allocation11_spill] sm:$0xff]  ;;  %v5128_v7 = vsel %vm7380_vm2, %v9319_v41, %v9307_v21  ;;  %v6619_v16 = vadd.f32 %v9139_v24, %v9134_v28  ;;  %v9703_v24 = vld [vmem:[#allocation30_spill] sm:$0xff] }
 0x395   : > { %5339 = vst [vmem:[%s9336_s23] sm:$0xff] %v5307_v25  ;;  %v5310_v52 = vmax.f32 %v5278_v48, 0.0  ;;  %v4711_v31 = vmul.f32 %v9277_v36, %v4672_v44  ;;  %v4561_v1 = vadd.f32 %v6610_v2, %v4560_v54  ;;  %v4675_v14 = vadd.f32 %v4569_v18, %v9700_v15  ;;  %v9701_v2 = vld [vmem:[#allocation9_spill] sm:$0xff] }
 0x396   : > { %v5276_v0 = vadd.f32 %v9699_v22, %v4747_v19  ;;  %v4752_v60 = vadd.f32 %v9297_v38, %v4713_v56  ;;  %v9370_v12 = vpop.f32.mrf.mxu1  ;;  %v6979_v63 = vpop.f32.mrf.mxu0  ;;  %v9702_v19 = vld [vmem:[#allocation29_spill] sm:$0xff]  ;;  %v5162_v28 = vsel %vm7380_vm2, %v9321_v62, %v9323_v35  ;;  %v9402_v35 = vrot.slane %v5132_v50, 4 }
 0x397   : > { %5342 = vst [vmem:[%s9336_s23 + $0x18] sm:$0xff] %v5310_v52  ;;  %v4750_v5 = vadd.f32 %v9297_v38, %v4711_v31  ;;  %v4673_v25 = vadd.f32 %v4561_v1, %v9701_v2  ;;  %v4582_v48 = vadd.f32 %v6979_v63, %v6625_v61  ;;  %v4714_v54 = vmul.f32 %v9277_v36, %v4675_v14  ;;  %v9704_v52 = vld [vmem:[#allocation14_spill] sm:$0xff]  ;;  %v9394_v1 = vld [vmem:[%s7349_s27 + $0xc4] sm:$0xf] }
 0x398   : > { %v5308_v44 = vmax.f32 %v5276_v0, 0.0  ;;  %v5281_v56 = vadd.f32 %v9702_v19, %v4752_v60  ;;  %v9383_v18 = vpop.f32.mrf.mxu1  ;;  %v4573_v22 = vpop.f32.mrf.mxu0  ;;  %v6628_v0 = vadd.f32 %v9201_v42, %v9195_v55  ;;  %v6622_v63 = vadd.f32 %v9170_v23, %v9156_v43 }
 0x399   : > { %v5279_v21 = vadd.f32 %v9703_v24, %v4750_v5  ;;  %v4712_v41 = vmul.f32 %v9277_v36, %v4673_v25  ;;  %v4678_v61 = vadd.f32 %v4582_v48, %v9704_v52  ;;  %v4574_v31 = vadd.f32 %v6619_v16, %v4573_v22  ;;  %v9705_v25 = vld [vmem:[#allocation12_spill] sm:$0xff] }
 0x39a   : > { %5340 = vst [vmem:[%s9336_s23 + $0x8] sm:$0xff] %v5308_v44  ;;  %v5313_v60 = vmax.f32 %v5281_v56, 0.0  ;;  %v4753_v15 = vadd.f32 %v9297_v38, %v4714_v54  ;;  %v9400_v14 = vpop.f32.mrf.mxu1  ;;  %v6980_v62 = vpop.f32.mrf.mxu0  ;;  %v5197_v50 = vshll.u32 %v9394_v1, 16  ;;  %v9417_v54 = vunpack.c.l.bf16 %v5128_v7  ;;  %v9708_v7 = vld [vmem:[#allocation13_spill] sm:$0xff] }
 0x39b   : > { %v5311_v5 = vmax.f32 %v5279_v21, 0.0  ;;  %v4751_v16 = vadd.f32 %v9297_v38, %v4712_v41  ;;  %v4717_v2 = vmul.f32 %v9277_v36, %v4678_v61  ;;  %v4676_v48 = vadd.f32 %v4574_v31, %v9705_v25  ;;  %v9706_v41 = vld [vmem:[#allocation15_spill] sm:$0xff]  ;;  %v9709_v25 = vld [vmem:[#allocation42_spill] sm:$0xff] }
 0x39c   : > { %5345 = vst [vmem:[%s9336_s23 + $0x30] sm:$0xff] %v5313_v60  ;;  %v5282_v55 = vadd.f32 %v9106_v37, %v4753_v15  ;;  %v9410_v42 = vpop.f32.mrf.mxu1  ;;  %v4585_v44 = vadd.f32 %v6980_v62, %v6628_v0  ;;  %v4576_v19 = vpop.f32.mrf.mxu0  ;;  %v6637_v37 = vadd.f32 %v9264_v8, %v9250_v51  ;;  %v9707_v0 = vld [vmem:[#allocation39_spill] sm:$0xff] }
 0x39d   : > { %5343 = vst [vmem:[%s9336_s23 + $0x20] sm:$0xff] %v5311_v5  ;;  %v5280_v23 = vadd.f32 %v9108_v59, %v4751_v16  ;;  %v4756_v43 = vadd.f32 %v9297_v38, %v4717_v2  ;;  %v4577_v56 = vadd.f32 %v6622_v63, %v4576_v19  ;;  %v4715_v21 = vmul.f32 %v9277_v36, %v4676_v48 }
 0x39e   : > { %v5314_v22 = vmax.f32 %v5282_v55, 0.0  ;;  %v9421_v24 = vpop.f32.mrf.mxu1  ;;  %v4679_v52 = vadd.f32 %v4585_v44, %v9706_v41  ;;  %v6983_v61 = vpop.f32.mrf.mxu0  ;;  %v6631_v59 = vadd.f32 %v9218_v45, %v9206_v57  ;;  %v9434_v16 = vunpack.c.l.bf16 %v5162_v28 }
 0x39f   : > { %v5312_v31 = vmax.f32 %v5280_v23, 0.0  ;;  %v5285_v60 = vadd.f32 %v9707_v0, %v4756_v43  ;;  %v4677_v15 = vadd.f32 %v4577_v56, %v9708_v7  ;;  %v4754_v51 = vadd.f32 %v9297_v38, %v4715_v21  ;;  %v9710_v23 = vld [vmem:[#allocation18_spill] sm:$0xff]  ;;  %v9715_v7 = vld [vmem:[#allocation20_spill] sm:$0xff] }
 0x3a0   : > { %5346 = vst [vmem:[%s9336_s23 + $0x38] sm:$0xff] %v5314_v22  ;;  %v9431_v8 = vpop.f32.mrf.mxu1  ;;  %v4718_v62 = vmul.f32 %v9277_v36, %v4679_v52  ;;  %v4598_v63 = vadd.f32 %v6983_v61, %v6637_v37  ;;  %v4589_v5 = vpop.f32.mrf.mxu0  ;;  %v6640_v57 = vadd.f32 %v9292_v33, %v9272_v34  ;;  %v5138_v28 = vsel %vm7380_vm2, %v9402_v35, %v9343_v40  ;;  %v9711_v37 = vld [vmem:[#allocation16_spill] sm:$0xff] }
 0x3a1   : > { %5344 = vst [vmem:[%s9336_s23 + $0x28] sm:$0xff] %v5312_v31  ;;  %v5317_v45 = vmax.f32 %v5285_v60, 0.0  ;;  %v4716_v2 = vmul.f32 %v9277_v36, %v4677_v15  ;;  %v4590_v55 = vadd.f32 %v6631_v59, %v4589_v5  ;;  %v5283_v48 = vadd.f32 %v9709_v25, %v4754_v51  ;;  %v9712_v52 = vld [vmem:[#allocation40_spill] sm:$0xff] }
 0x3a2   : > { %v4757_v44 = vadd.f32 %v9297_v38, %v4718_v62  ;;  %v9442_v19 = vpop.f32.mrf.mxu1  ;;  %v4682_v43 = vadd.f32 %v4598_v63, %v9710_v23  ;;  %v6984_v56 = vpop.f32.mrf.mxu0  ;;  %v6634_v33 = vadd.f32 %v9239_v58, %v9229_v30  ;;  %v9713_v60 = vshrl.u32 %v9331_v32, 16  ;;  %v9714_v35 = vld [vmem:[#allocation44_spill] sm:$0xff] }
 0x3a3   : > { %5349 = vst [vmem:[%s9336_s23 + $0x50] sm:$0xff] %v5317_v45  ;;  %v4755_v34 = vadd.f32 %v9297_v38, %v4716_v2  ;;  %v4680_v22 = vadd.f32 %v4590_v55, %v9711_v37  ;;  %v4601_v21 = vadd.f32 %v6984_v56, %v6640_v57  ;;  %v5315_v41 = vmax.f32 %v5283_v48, 0.0 }
 0x3a4   : > { %v5286_v61 = vadd.f32 %v9712_v52, %v4757_v44  ;;  %v6659_v59 = vpop.f32.mrf.mxu1  ;;  %v4721_v31 = vmul.f32 %v9277_v36, %v4682_v43  ;;  %v4592_v0 = vpop.f32.mrf.mxu0  ;;  %v9458_v40 = vrot.slane %v9713_v60, 4  ;;  %v6649_v62 = vadd.f32 %v9370_v12, %v9360_v6  ;;  %v9716_v12 = vld [vmem:[#allocation45_spill] sm:$0xff] }
 0x3a5   : > { %v5284_v30 = vadd.f32 %v9714_v35, %v4755_v34  ;;  %v4719_v58 = vmul.f32 %v9277_v36, %v4680_v22  ;;  %v4683_v15 = vadd.f32 %v4601_v21, %v9715_v7  ;;  %v4593_v51 = vadd.f32 %v6634_v33, %v4592_v0  ;;  %5347 = vst [vmem:[%s9336_s23 + $0x40] sm:$0xff] %v5315_v41  ;;  %v9717_v43 = vld [vmem:[#allocation17_spill] sm:$0xff]  ;;  %v9721_v7 = vld [vmem:[#allocation3_spill] sm:$0xff] }
 0x3a6   : > { %v5318_v63 = vmax.f32 %v5286_v61, 0.0  ;;  %v4760_v5 = vadd.f32 %v9297_v38, %v4721_v31  ;;  %v6660_v57 = vpop.f32.mrf.mxu1  ;;  %v6987_v45 = vpop.f32.mrf.mxu0  ;;  %v9469_v2 = vrot.slane %v5191_v11, 5  ;;  %v6643_v55 = vadd.f32 %v9317_v39, %v9303_v20  ;;  %v9718_v20 = vld [vmem:[#allocation46_spill] sm:$0xff]  ;;  %v9488_v21 = vld [vmem:[%s7349_s27 + $0xb4] sm:$0xf]  ;;  %v9719_v31 = vld [vmem:[#allocation28_spill] sm:$0xff] }
 0x3a7   : > { %v5316_v25 = vmax.f32 %v5284_v30, 0.0  ;;  %v4758_v48 = vadd.f32 %v9297_v38, %v4719_v58  ;;  %v4722_v6 = vmul.f32 %v9277_v36, %v4683_v15  ;;  %v4681_v56 = vadd.f32 %v4593_v51, %v9717_v43 }
 0x3a8   : > { %5350 = vst [vmem:[%s9336_s23 + $0x58] sm:$0xff] %v5318_v63  ;;  %v5289_v44 = vadd.f32 %v9716_v12, %v4760_v5  ;;  %v6662_v23 = vpop.f32.mrf.mxu1  ;;  %v4614_v33 = vadd.f32 %v6987_v45, %v6649_v62  ;;  %v4605_v34 = vpop.f32.mrf.mxu0  ;;  %v9480_v32 = vrot.slane %v5197_v50, 5  ;;  %v9485_v22 = vunpack.c.l.bf16 %v5138_v28  ;;  %v9720_v28 = vld [vmem:[#allocation47_spill] sm:$0xff] }
 0x3a9   : > { %5348 = vst [vmem:[%s9336_s23 + $0x48] sm:$0xff] %v5316_v25  ;;  %v5287_v39 = vadd.f32 %v9718_v20, %v4758_v48  ;;  %v4761_v11 = vadd.f32 %v9297_v38, %v4722_v6  ;;  %v4606_v37 = vadd.f32 %v6643_v55, %v4605_v34  ;;  %v6652_v41 = vadd.f32 %v9400_v14, %v9383_v18  ;;  %v9505_v25 = vld [vmem:[%s7349_s27 + $0xb8] sm:$0xf]  ;;  %v9723_v34 = vld [vmem:[#allocation25_spill] sm:$0xff] }
 0x3aa   : > { %v5321_v52 = vmax.f32 %v5289_v44, 0.0  ;;  %v6663_v61 = vpop.f32.mrf.mxu1  ;;  %v4720_v50 = vmul.f32 %v9277_v36, %v4681_v56  ;;  %v4686_v0 = vadd.f32 %v4614_v33, %v9719_v31  ;;  %v6988_v60 = vpop.f32.mrf.mxu0  ;;  %v6646_v35 = vadd.f32 %v9349_v9, %v9338_v46  ;;  %v9722_v44 = vld [vmem:[#allocation31_spill] sm:$0xff] }
 0x3ab   : > { %v5319_v30 = vmax.f32 %v5287_v39, 0.0  ;;  %v5290_v58 = vadd.f32 %v9720_v28, %v4761_v11  ;;  %v4684_v15 = vadd.f32 %v4606_v37, %v9721_v7  ;;  %v4617_v62 = vadd.f32 %v6988_v60, %v6652_v41 }
 0x3ac   : > { %5353 = vst [vmem:[%s9336_s23 + $0x70] sm:$0xff] %v5321_v52  ;;  %v4759_v18 = vadd.f32 %v9297_v38, %v4720_v50  ;;  %v6665_v14 = vpop.f32.mrf.mxu1  ;;  %v4725_v51 = vmul.f32 %v9277_v36, %v4686_v0  ;;  %v4608_v63 = vpop.f32.mrf.mxu0  ;;  %v5164_v5 = vshrl.u32 %v9488_v21, 16  ;;  %v6661_v45 = vadd.f32 %v6660_v57, %v6659_v59  ;;  %v9724_v50 = vld [vmem:[#allocation38_spill] sm:$0xff] }
 0x3ad   : > { %5351 = vst [vmem:[%s9336_s23 + $0x60] sm:$0xff] %v5319_v30  ;;  %v5322_v9 = vmax.f32 %v5290_v58, 0.0  ;;  %v4723_v46 = vmul.f32 %v9277_v36, %v4684_v15  ;;  %v4609_v55 = vadd.f32 %v6646_v35, %v4608_v63  ;;  %v4687_v43 = vadd.f32 %v4617_v62, %v9722_v44  ;;  %v9726_v44 = vld [vmem:[#allocation41_spill] sm:$0xff] }
 0x3ae   : > { %v5288_v48 = vadd.f32 %v9210_v13, %v4759_v18  ;;  %v4764_v6 = vadd.f32 %v9297_v38, %v4725_v51  ;;  %v6666_v12 = vpop.f32.mrf.mxu1  ;;  %v6991_v56 = vpop.f32.mrf.mxu0  ;;  %v5167_v33 = vshll.u32 %v9488_v21, 16  ;;  %v6655_v59 = vadd.f32 %v9421_v24, %v9410_v42  ;;  %v9725_v51 = vld [vmem:[#allocation34_spill] sm:$0xff] }
 0x3af   : > { %5354 = vst [vmem:[%s9336_s23 + $0x78] sm:$0xff] %v5322_v9  ;;  %v4762_v57 = vadd.f32 %v9297_v38, %v4723_v46  ;;  %v4685_v20 = vadd.f32 %v4609_v55, %v9723_v34  ;;  %v4630_v39 = vadd.f32 %v6991_v56, %v6661_v45  ;;  %v4726_v41 = vmul.f32 %v9277_v36, %v4687_v43  ;;  %v9727_v34 = vld [vmem:[#allocation37_spill] sm:$0xff] }
 0x3b0   : > { %v5320_v11 = vmax.f32 %v5288_v48, 0.0  ;;  %v5293_v13 = vadd.f32 %v9212_v26, %v4764_v6  ;;  %v9517_v37 = vpop.f32.mrf.mxu1  ;;  %v4621_v52 = vpop.f32.mrf.mxu0  ;;  %v5173_v21 = vshll.u32 %v9505_v25, 16  ;;  %v6664_v60 = vadd.f32 %v6663_v61, %v6662_v23 }
 0x3b1   : > { %v5291_v42 = vadd.f32 %v9232_v47, %v4762_v57  ;;  %v4724_v24 = vmul.f32 %v9277_v36, %v4685_v20  ;;  %v4690_v31 = vadd.f32 %v4630_v39, %v9724_v50  ;;  %v4622_v0 = vadd.f32 %v6655_v59, %v4621_v52 }
 0x3b2   : > { %5352 = vst [vmem:[%s9336_s23 + $0x68] sm:$0xff] %v5320_v11  ;;  %v5325_v35 = vmax.f32 %v5293_v13, 0.0  ;;  %v4765_v26 = vadd.f32 %v9297_v38, %v4726_v41  ;;  %v6669_v30 = vpop.f32.mrf.mxu1  ;;  %v6992_v28 = vpop.f32.mrf.mxu0  ;;  %v5177_v58 = vshrl.u32 %v9505_v25, 16  ;;  %v6658_v7 = vadd.f32 %v9442_v19, %v9431_v8 }
 0x3b3   : > { %v5323_v15 = vmax.f32 %v5291_v42, 0.0  ;;  %v4763_v47 = vadd.f32 %v9297_v38, %v4724_v24  ;;  %v4729_v18 = vmul.f32 %v9277_v36, %v4690_v31  ;;  %v4688_v62 = vadd.f32 %v4622_v0, %v9725_v51  ;;  %v5890_v42 = vld [vmem:[%s7349_s27 + $0xbc] sm:$0x1] }
 0x3b4   : > { %5357 = vst [vmem:[%s9336_s23 + $0x90] sm:$0xff] %v5325_v35  ;;  %v5294_v23 = vadd.f32 %v9234_v10, %v4765_v26  ;;  %v6671_v61 = vpop.f32.mrf.mxu1  ;;  %v4633_v63 = vadd.f32 %v6992_v28, %v6664_v60  ;;  %v4624_v45 = vpop.f32.mrf.mxu0  ;;  %v5166_v9 = vrot.slane %v5164_v5, 4  ;;  %v5169_v55 = vrot.slane %v5167_v33, 5  ;;  %v9728_v26 = vld [vmem:[#allocation49_spill] sm:$0xff] }
 0x3b5   : > { %5355 = vst [vmem:[%s9336_s23 + $0x80] sm:$0xff] %v5323_v15  ;;  %v5292_v46 = vadd.f32 %v9245_v4, %v4763_v47  ;;  %v4768_v8 = vadd.f32 %v9297_v38, %v4729_v18  ;;  %v4625_v19 = vadd.f32 %v6658_v7, %v4624_v45  ;;  %v6667_v25 = vadd.f32 %v6666_v12, %v6665_v14  ;;  %v9729_v7 = vld [vmem:[#allocation43_spill] sm:$0xff] }
 0x3b6   : > { %v5326_v48 = vmax.f32 %v5294_v23, 0.0  ;;  %v6672_v6 = vpop.f32.mrf.mxu1  ;;  %v4727_v10 = vmul.f32 %v9277_v36, %v4688_v62  ;;  %v4691_v43 = vadd.f32 %v4633_v63, %v9726_v44  ;;  %v6995_v56 = vpop.f32.mrf.mxu0  ;;  %v5201_v39 = vshrl.u32 %v9394_v1, 16  ;;  %v9731_v44 = vld [vmem:[#allocation48_spill] sm:$0xff] }
 0x3b7   : > { %v5324_v59 = vmax.f32 %v5292_v46, 0.0  ;;  %v5297_v5 = vadd.f32 %v9259_v17, %v4768_v8  ;;  %v6673_v57 = vadd.f32 %v6672_v6, %v6671_v61  ;;  %v4689_v4 = vadd.f32 %v4625_v19, %v9727_v34  ;;  %v9730_v6 = vld [vmem:[#allocation50_spill] sm:$0xff] }
 0x3b8   : > { %5358 = vst [vmem:[%s9336_s23 + $0x98] sm:$0xff] %v5326_v48  ;;  %v4766_v20 = vadd.f32 %v9297_v38, %v4727_v10  ;;  %v6674_v33 = vpop.f32.mrf.mxu1  ;;  %v4730_v14 = vmul.f32 %v9277_v36, %v4691_v43  ;;  %v4637_v12 = vpop.f32.mrf.mxu0  ;;  %v9545_v11 = vrot.slane %v5173_v21, 5  ;;  %v5170_v60 = vor.u32 %v5169_v55, %v5166_v9 }
 0x3b9   : > { %5356 = vst [vmem:[%s9336_s23 + $0x88] sm:$0xff] %v5324_v59  ;;  %v5329_v13 = vmax.f32 %v5297_v5, 0.0  ;;  %v4728_v41 = vmul.f32 %v9277_v36, %v4689_v4  ;;  %v4646_v17 = vadd.f32 %v6995_v56, %v6673_v57  ;;  %v4638_v52 = vadd.f32 %v6667_v25, %v4637_v12 }
 0x3ba   : > { %v5295_v24 = vadd.f32 %v9267_v3, %v4766_v20  ;;  %v4769_v50 = vadd.f32 %v9297_v38, %v4730_v14  ;;  %v6675_v31 = vpop.f32.mrf.mxu1  ;;  %v6996_v0 = vpop.f32.mrf.mxu0  ;;  %v5179_v35 = vrot.slane %v5177_v58, 4  ;;  %v6670_v47 = vadd.f32 %v6669_v30, %v9517_v37 }
 0x3bb   : > { %5361 = vst [vmem:[%s9336_s23 + $0xb0] sm:$0xff] %v5329_v13  ;;  %v6676_v1 = vadd.f32 %v6675_v31, %v6674_v33  ;;  %v4767_v21 = vadd.f32 %v9297_v38, %v4728_v41  ;;  %v4694_v28 = vadd.f32 %v4646_v17, %v9728_v26  ;;  %v4692_v15 = vadd.f32 %v4638_v52, %v9729_v7  ;;  %v9732_v17 = vld [vmem:[#allocation51_spill] sm:$0xff]  ;;  %v5893_v52 = vld [vmem:[%s7349_s27 + $0xc8] sm:$0x1] }
 0x3bc   : > { %v5327_v18 = vmax.f32 %v5295_v24, 0.0  ;;  %v5298_v3 = vadd.f32 %v9269_v29, %v4769_v50  ;;  %v6677_v23 = vpop.f32.mrf.mxu1  ;;  %v4640_v61 = vpop.f32.mrf.mxu0  ;;  %v5183_v51 = vshll.u32 %v5890_v42, 16  ;;  %v5171_v30 = vrot.slane %v5170_v60, 4 }
 0x3bd   : > { %v5296_v58 = vadd.f32 %v9301_v53, %v4767_v21  ;;  %v4733_v62 = vmul.f32 %v9277_v36, %v4694_v28  ;;  %v4731_v63 = vmul.f32 %v9277_v36, %v4692_v15  ;;  %v4649_v45 = vadd.f32 %v6996_v0, %v6676_v1 }
 0x3be   : > { %5359 = vst [vmem:[%s9336_s23 + $0xa0] sm:$0xff] %v5327_v18  ;;  %v5330_v9 = vmax.f32 %v5298_v3, 0.0  ;;  %v6678_v46 = vpop.f32.mrf.mxu1  ;;  %v4641_v8 = vadd.f32 %v6670_v47, %v4640_v61  ;;  %v6999_v37 = vpop.f32.mrf.mxu0  ;;  %v5180_v29 = vor.u32 %v5179_v35, %v9545_v11  ;;  %v5194_v56 = vor.u32 %v9469_v2, %v9458_v40  ;;  %v9733_v3 = vld [vmem:[#allocation52_spill] sm:$0xff] }
 0x3bf   : > { %v5328_v19 = vmax.f32 %v5296_v58, 0.0  ;;  %v4772_v55 = vadd.f32 %v9297_v38, %v4733_v62  ;;  %v6679_v25 = vadd.f32 %v6678_v46, %v6677_v23  ;;  %v4770_v53 = vadd.f32 %v9297_v38, %v4731_v63 }
 0x3c0   : > { %5362 = vst [vmem:[%s9336_s23 + $0xb8] sm:$0xff] %v5330_v9  ;;  %v6680_v48 = vpop.f32.mrf.mxu1  ;;  %v4695_v10 = vadd.f32 %v4649_v45, %v9730_v6  ;;  %v4693_v43 = vadd.f32 %v4641_v8, %v9731_v44  ;;  %v4653_v59 = vpop.f32.mrf.mxu0  ;;  %v5203_v5 = vrot.slane %v5201_v39, 4  ;;  %v5185_v20 = vrot.slane %v5183_v51, 5  ;;  %v9735_v44 = vld [vmem:[#allocation32_spill] sm:$0xff] }
 0x3c1   : > { %5360 = vst [vmem:[%s9336_s23 + $0xa8] sm:$0xff] %v5328_v19  ;;  %v5301_v57 = vadd.f32 %v9305_v49, %v4772_v55  ;;  %v5299_v34 = vadd.f32 %v9417_v54, %v4770_v53  ;;  %v4654_v4 = vadd.f32 %v6679_v25, %v4653_v59  ;;  %v5176_v40 = vsel %vm7380_vm2, %v5171_v30, %v9545_v11  ;;  %v9734_v30 = vld [vmem:[#allocation53_spill] sm:$0xff] }
 0x3c2   : > { %v4734_v33 = vmul.f32 %v9277_v36, %v4695_v10  ;;  %v6681_v14 = vpop.f32.mrf.mxu1  ;;  %v4732_v12 = vmul.f32 %v9277_v36, %v4693_v43  ;;  %v7000_v2 = vpop.f32.mrf.mxu0  ;;  %v5181_v39 = vrot.slane %v5180_v29, 4  ;;  %v5195_v31 = vrot.slane %v5194_v56, 4 }
 0x3c3   : > { %v5333_v13 = vmax.f32 %v5301_v57, 0.0  ;;  %v5331_v41 = vmax.f32 %v5299_v34, 0.0  ;;  %v6682_v49 = vadd.f32 %v6681_v14, %v6680_v48  ;;  %v4696_v54 = vadd.f32 %v4654_v4, %v9732_v17 }
 0x3c4   : > { %v4773_v42 = vadd.f32 %v9297_v38, %v4734_v33  ;;  %v4771_v24 = vadd.f32 %v9297_v38, %v4732_v12  ;;  %v6683_v50 = vpop.f32.mrf.mxu1  ;;  %v4656_v0 = vpop.f32.mrf.mxu0  ;;  %v5271_v11 = vunpack.c.l.bf16 %v5176_v40  ;;  %v5204_v35 = vor.u32 %v5203_v5, %v9480_v32 }
 0x3c5   : > { %5365 = vst [vmem:[%s9336_s23 + $0xd0] sm:$0xff] %v5333_v13  ;;  %5363 = vst [vmem:[%s9336_s23 + $0xc0] sm:$0xff] %v5331_v41  ;;  %v4735_v60 = vmul.f32 %v9277_v36, %v4696_v54  ;;  %v4657_v1 = vadd.f32 %v6682_v49, %v4656_v0  ;;  %v5207_v7 = vshll.u32 %v5893_v52, 16  ;;  %v5186_v15 = vsel %vm7380_vm2, %v5181_v39, %v5185_v20 }
 0x3c6   : > { %v5302_v21 = vadd.f32 %v9434_v16, %v4773_v42  ;;  %v5300_v26 = vadd.f32 %v9485_v22, %v4771_v24  ;;  %v6684_v28 = vpop.f32.mrf.mxu1  ;;  %v5272_v45 = vunpack.c.l.bf16 %v5186_v15  ;;  %v5200_v22 = vsel %vm7380_vm2, %v5195_v31, %v9480_v32 }
 0x3c7   : > { %v6685_v47 = vadd.f32 %v6684_v28, %v6683_v50  ;;  %v4774_v18 = vadd.f32 %v9297_v38, %v4735_v60  ;;  %v4697_v23 = vadd.f32 %v4657_v1, %v9733_v3  ;;  %v5205_v46 = vrot.slane %v5204_v35, 4 }
 0x3c8   : > { %v5334_v61 = vmax.f32 %v5302_v21, 0.0  ;;  %v5332_v51 = vmax.f32 %v5300_v26, 0.0  ;;  %v6686_v58 = vpop.f32.mrf.mxu1  ;;  %v5209_v8 = vrot.slane %v5207_v7, 5  ;;  %v5273_v53 = vunpack.c.l.bf16 %v5200_v22 }
 0x3c9   : > { %v4662_v62 = vadd.f32 %v6999_v37, %v6685_v47  ;;  %v5303_v63 = vadd.f32 %v5271_v11, %v4774_v18  ;;  %v4736_v16 = vmul.f32 %v9277_v36, %v4697_v23 }
 0x3ca   : > { %5366 = vst [vmem:[%s9336_s23 + $0xd8] sm:$0xff] %v5334_v61  ;;  %5364 = vst [vmem:[%s9336_s23 + $0xc8] sm:$0xff] %v5332_v51  ;;  %v6687_v9 = vpop.f32.mrf.mxu1  ;;  %v5210_v32 = vsel %vm7380_vm2, %v5205_v46, %v5209_v8 }
 0x3cb   : > { %v4698_v29 = vadd.f32 %v4662_v62, %v9734_v30  ;;  %v5335_v19 = vmax.f32 %v5303_v63, 0.0  ;;  %v6688_v55 = vadd.f32 %v6687_v9, %v6686_v58  ;;  %v4775_v37 = vadd.f32 %v9297_v38, %v4736_v16 }
 0x3cc   : > { %v5274_v57 = vunpack.c.l.bf16 %v5210_v32 }
 0x3cd   : > { %v4737_v25 = vmul.f32 %v9277_v36, %v4698_v29  ;;  %5367 = vst [vmem:[%s9336_s23 + $0xe0] sm:$0xff] %v5335_v19  ;;  %v4665_v48 = vadd.f32 %v7000_v2, %v6688_v55  ;;  %v5304_v6 = vadd.f32 %v5272_v45, %v4775_v37 }
 0x3cf   : > { %v4776_v10 = vadd.f32 %v9297_v38, %v4737_v25  ;;  %v4699_v43 = vadd.f32 %v4665_v48, %v9735_v44  ;;  %v5336_v56 = vmax.f32 %v5304_v6, 0.0 }
 0x3d1   : > { %v5305_v59 = vadd.f32 %v5273_v53, %v4776_v10  ;;  %v4738_v5 = vmul.f32 %v9277_v36, %v4699_v43  ;;  %5368 = vst [vmem:[%s9336_s23 + $0xe8] sm:$0xff] %v5336_v56 }
 0x3d3   : > { %v5337_v34 = vmax.f32 %v5305_v59, 0.0  ;;  %v4777_v4 = vadd.f32 %v9297_v38, %v4738_v5 }
 0x3d5   : > { %5369 = vst [vmem:[%s9336_s23 + $0xf0] sm:$0xff] %v5337_v34  ;;  %v5306_v20 = vadd.f32 %v5274_v57, %v4777_v4 }
 0x3d7   : > { %v5338_v33 = vmax.f32 %v5306_v20, 0.0 }
 0x3d9   : > { %5370 = vst [vmem:[%s9336_s23 + $0xf8] sm:$0xff] %v5338_v33 }
 0x3da PF: > { %s17_s24 = sadd.s32 1, %s7228_s24  }
 0x3db   : > { %p14_p4 = scmp.ge.s32.totalorder %s17_s24, 4  }
 0x3dd   :  { %16 = sbr.rel (!%p14_p4) target bundleno = 1 (0x1), region = 85 }

</bundles_post_ra>
